<compile_context>
chip_gen: v5e
topology: v5e:2x2
jax: 0.10.0
libtpu: 0.0.40
codegen_flags: <defaults>
</compile_context>

<pallas_src>
import functools
import math

import jax
import jax.numpy as jnp
from jax.experimental import pallas as pl
from jax.experimental.pallas import tpu as pltpu


def _layernorm(x, gamma, beta, eps=1e-5):
    mean = jnp.mean(x, axis=-1, keepdims=True)
    var = jnp.mean((x - mean) ** 2, axis=-1, keepdims=True)
    return (x - mean) * jax.lax.rsqrt(var + eps) * gamma + beta


def block_kernel(x_ref, wq_ref, wkv_ref, wo_ref, bo_ref,
                 ln1g_ref, ln1b_ref, ln2g_ref, ln2b_ref,
                 w1_ref, b1_ref, w2_ref, b2_ref,
                 o_ref,
                 h_sc, qh_sc, kh_sc, vh_sc, kv2d_sc, c_sc, m_sc, l_sc, acc_sc,
                 *, n_head, head_size, block_k):
    f32, bf16 = jnp.float32, jnp.bfloat16
    nh, hs, bk = n_head, head_size, block_k
    j = pl.program_id(1)
    n_kv = pl.num_programs(1)
    T, C = h_sc.shape

    # ---- first KV block of each batch element: ln1 + scaled-Q projection ----
    @pl.when(j == 0)
    def _():
        x = x_ref[0].astype(f32)                                     # (T, C)
        h1b = _layernorm(x, ln1g_ref[0], ln1b_ref[0]).astype(bf16)
        h_sc[...] = h1b                                              # reused by every KV block
        # One lane-dense (T,C)@(C,C) matmul; hs**-0.5 already folded into wq.
        q2d = jnp.dot(h1b, wq_ref[...], preferred_element_type=f32)
        c_sc[...] = q2d.astype(bf16)                                 # staging for head split
        for h in range(nh):                                          # head-major via VMEM slices
            qh_sc[h] = c_sc[:, h * hs:(h + 1) * hs]
        m_sc[...] = jnp.full_like(m_sc, -1e30)
        l_sc[...] = jnp.zeros_like(l_sc)
        acc_sc[...] = jnp.zeros_like(acc_sc)

    # ---- every KV block: fused K/V projection + online-softmax update -------
    start = pl.multiple_of(j * bk, bk)
    hk = h_sc[pl.ds(start, bk), :]                                   # (bk, C) bf16, already ln1'd
    kv2d = jnp.dot(hk, wkv_ref[...], preferred_element_type=f32)     # (bk, 2C) fused K|V
    kv2d_sc[...] = kv2d.astype(bf16)
    for h in range(nh):                                              # head split via VMEM slices
        kh_sc[h] = kv2d_sc[:, h * hs:(h + 1) * hs]
        vh_sc[h] = kv2d_sc[:, C + h * hs:C + (h + 1) * hs]

    s = jnp.einsum('hqd,hkd->hqk', qh_sc[...], kh_sc[...],
                   preferred_element_type=f32)                       # (nh, T, bk) f32

    # 2-D causal mask for this KV block, broadcast over heads in the where().
    rowi = jax.lax.broadcasted_iota(jnp.int32, (T, bk), 0)
    coli = jax.lax.broadcasted_iota(jnp.int32, (T, bk), 1) + j * bk
    mask = rowi >= coli                                              # (T, bk) bool

    m_prev = m_sc[...]                                               # (nh, T, 1)
    m_new = jnp.maximum(m_prev, jnp.max(s, axis=-1, keepdims=True))
    alpha = jnp.exp(m_prev - m_new)
    # multiplicative masking: exact even for rows fully masked in this block
    p = jnp.where(mask[None], jnp.exp(s - m_new), 0.0)               # (nh, T, bk)
    l_sc[...] = alpha * l_sc[...] + jnp.sum(p, axis=-1, keepdims=True)
    acc_sc[...] = alpha * acc_sc[...] + jnp.einsum(
        'hqk,hkd->hqd', p.astype(bf16), vh_sc[...],
        preferred_element_type=f32)                                  # (nh, T, hs)
    m_sc[...] = m_new

    # ---- last KV block: out-proj + residual + ln2 + FFN + residual ----------
    @pl.when(j == n_kv - 1)
    def _():
        x = x_ref[0].astype(f32)
        for h in range(nh):                                          # head concat via VMEM slices
            attn_h = acc_sc[h] * pl.reciprocal(l_sc[h], approx=True)  # (T, hs)
            c_sc[:, h * hs:(h + 1) * hs] = attn_h.astype(bf16)
        # single full-depth (T,C)@(C,C) output projection
        sa = jnp.dot(c_sc[...], wo_ref[...],
                     preferred_element_type=f32) + bo_ref[0]
        x1 = x + sa

        h2 = _layernorm(x1, ln2g_ref[0], ln2b_ref[0]).astype(bf16)
        ff = jnp.dot(h2, w1_ref[...], preferred_element_type=f32) + b1_ref[0]
        ff = jnp.maximum(ff, 0.0)
        ff = jnp.dot(ff.astype(bf16), w2_ref[...],
                     preferred_element_type=f32) + b2_ref[0]
        o_ref[0] = (x1 + ff).astype(o_ref.dtype)


def _vmem_limit_bytes(T, C, H, n_head, block_k, weight_buffers):
    """Explicit scoped-VMEM limit sized from the real footprint (+ margin)."""
    hs = C // n_head
    bf2, f4 = 2, 4
    weights = (C * C + C * 2 * C + C * C + C * H + H * C) * bf2 + (6 * C + H) * f4
    act_blocks = 2 * (2 * T * C * f4)                 # x + out blocks, double-buffered
    scratch = (2 * T * C * bf2 + n_head * T * hs * bf2
               + 2 * n_head * block_k * hs * bf2 + block_k * 2 * C * bf2
               + 2 * n_head * T * f4 + n_head * T * hs * f4)
    total = weights * weight_buffers + act_blocks + scratch
    # stay below the smallest physical VMEM (64 MiB on v7x)
    return min(64 << 20, max(32 << 20, int(1.25 * total) + (8 << 20)))


def _build_block_call(B, T, C, H, n_head, block_k, out_dtype, single_buffer_weights):
    hs = C // n_head
    n_kv = T // block_k
    kernel = functools.partial(block_kernel, n_head=n_head, head_size=hs,
                               block_k=block_k)

    def wspec(shape):
        # Grid-invariant weights: single-buffer to halve their VMEM footprint.
        if single_buffer_weights:
            return pl.BlockSpec(shape, lambda b, j: (0,) * len(shape),
                                pipeline_mode=pl.Buffered(1))
        return pl.BlockSpec(shape, lambda b, j: (0,) * len(shape))

    weight_buffers = 1 if single_buffer_weights else 2

    return pl.pallas_call(
        kernel,
        out_shape=jax.ShapeDtypeStruct((B, T, C), out_dtype),
        grid_spec=pltpu.PrefetchScalarGridSpec(
            num_scalar_prefetch=0,
            grid=(B, n_kv),
            in_specs=[
                pl.BlockSpec((1, T, C), lambda b, j: (b, 0, 0)),   # x
                wspec((C, C)),                                     # wq (pre-scaled)
                wspec((C, 2 * C)),                                 # wkv (fused K|V)
                wspec((C, C)),                                     # wo
                wspec((1, C)),                                     # bo
                wspec((1, C)), wspec((1, C)),                      # ln1 gamma/beta
                wspec((1, C)), wspec((1, C)),                      # ln2 gamma/beta
                wspec((C, H)), wspec((1, H)),                      # w1, b1
                wspec((H, C)), wspec((1, C)),                      # w2, b2
            ],
            out_specs=pl.BlockSpec((1, T, C), lambda b, j: (b, 0, 0)),
            scratch_shapes=[
                pltpu.VMEM((T, C), jnp.bfloat16),                  # h_sc  : ln1(x)
                pltpu.VMEM((n_head, T, hs), jnp.bfloat16),         # qh_sc : Q head-major
                pltpu.VMEM((n_head, block_k, hs), jnp.bfloat16),   # kh_sc
                pltpu.VMEM((n_head, block_k, hs), jnp.bfloat16),   # vh_sc
                pltpu.VMEM((block_k, 2 * C), jnp.bfloat16),        # kv2d_sc staging
                pltpu.VMEM((T, C), jnp.bfloat16),                  # c_sc  : Q/attn staging
                pltpu.VMEM((n_head, T, 1), jnp.float32),           # m_sc
                pltpu.VMEM((n_head, T, 1), jnp.float32),           # l_sc
                pltpu.VMEM((n_head, T, hs), jnp.float32),          # acc_sc
            ]),
        compiler_params=pltpu.CompilerParams(
            dimension_semantics=("parallel", "arbitrary"),
            vmem_limit_bytes=_vmem_limit_bytes(T, C, H, n_head, block_k,
                                               weight_buffers)),
    )


def transformer_block(x, params, *, n_head, block_k=None):
    B, T, C = x.shape
    hs = C // n_head
    H = 4 * C
    bf16 = jnp.bfloat16

    if block_k is None:
        block_k = T if T <= 512 else 512
    assert T % block_k == 0, "block_k must divide T"

    # one-time wrapper-side weight prep (plain JAX ops)
    scale = hs ** (-0.5)
    wq = (params["wq"] * scale).astype(bf16)                         # scale folded into wq
    wkv = jnp.concatenate([params["wk"], params["wv"]], axis=1).astype(bf16)
    wo = params["wo"].astype(bf16)
    w1 = params["w1"].astype(bf16)
    w2 = params["w2"].astype(bf16)

    args = (x, wq, wkv, wo, params["bo"],
            params["ln1g"], params["ln1b"], params["ln2g"], params["ln2b"],
            w1, params["b1"], w2, params["b2"])

    try:
        fn = _build_block_call(B, T, C, H, n_head, block_k, x.dtype,
                               single_buffer_weights=True)
        return jax.block_until_ready(fn(*args))
    except Exception:
        # Fallback if single-buffered (pl.Buffered(1)) weight specs are not
        # supported by this Pallas version: use default double buffering.
        fn = _build_block_call(B, T, C, H, n_head, block_k, x.dtype,
                               single_buffer_weights=False)
        return fn(*args)


# -------------------- pure-JAX reference for verification --------------------
# Mirrors the PyTorch Block math with the same bf16-operand / f32-accumulation
# convention (and the same folded-in attention scale) so the check is tight.
def reference_block(x, params, *, n_head):
    B, T, C = x.shape
    hs = C // n_head
    bf16, f32 = jnp.bfloat16, jnp.float32

    def mm(a, b):
        return jnp.matmul(a.astype(bf16), b.astype(bf16),
                          preferred_element_type=f32)

    def ln(y, g, b):
        m = jnp.mean(y, axis=-1, keepdims=True)
        v = jnp.mean((y - m) ** 2, axis=-1, keepdims=True)
        return (y - m) * jax.lax.rsqrt(v + 1e-5) * g + b

    scale = hs ** (-0.5)
    h = ln(x, params["ln1g"][0], params["ln1b"][0])
    q = mm(h, params["wq"] * scale)
    k = mm(h, params["wk"])
    v = mm(h, params["wv"])
    mask = jnp.tril(jnp.ones((T, T), bool))
    outs = []
    for hd in range(n_head):
        sl = slice(hd * hs, (hd + 1) * hs)
        wei = mm(q[..., sl], jnp.swapaxes(k[..., sl], -1, -2))
        wei = jnp.where(mask, wei, -1e30)
        wei = jax.nn.softmax(wei, axis=-1)
        outs.append(mm(wei, v[..., sl]))
    sa = mm(jnp.concatenate(outs, axis=-1), params["wo"]) + params["bo"][0]
    x1 = x + sa
    h2 = ln(x1, params["ln2g"][0], params["ln2b"][0])
    ff = jnp.maximum(mm(h2, params["w1"]) + params["b1"][0], 0.0)
    ff = mm(ff, params["w2"]) + params["b2"][0]
    return x1 + ff


if __name__ == "__main__":
    # small shapes: B=2, T(block_size)=16, n_embd=32, n_head=4 -> head_size=8
    # block_k=8 -> two KV blocks, so the online-softmax path is exercised.
    B, T, C, n_head = 2, 16, 32, 4
    H = 4 * C

    key = jax.random.PRNGKey(0)
    keys = jax.random.split(key, 16)
    s = 0.1
    params = {
        "wq":  s * jax.random.normal(keys[0], (C, C), jnp.float32),
        "wk":  s * jax.random.normal(keys[1], (C, C), jnp.float32),
        "wv":  s * jax.random.normal(keys[2], (C, C), jnp.float32),
        "wo":  s * jax.random.normal(keys[3], (C, C), jnp.float32),
        "bo":  s * jax.random.normal(keys[4], (1, C), jnp.float32),
        "ln1g": 1.0 + s * jax.random.normal(keys[5], (1, C), jnp.float32),
        "ln1b": s * jax.random.normal(keys[6], (1, C), jnp.float32),
        "ln2g": 1.0 + s * jax.random.normal(keys[7], (1, C), jnp.float32),
        "ln2b": s * jax.random.normal(keys[8], (1, C), jnp.float32),
        "w1":  s * jax.random.normal(keys[9], (C, H), jnp.float32),
        "b1":  s * jax.random.normal(keys[10], (1, H), jnp.float32),
        "w2":  s * jax.random.normal(keys[11], (H, C), jnp.float32),
        "b2":  s * jax.random.normal(keys[12], (1, C), jnp.float32),
    }
    x = jax.random.normal(keys[13], (B, T, C), jnp.float32)

    out = transformer_block(x, params, n_head=n_head, block_k=8)
    out = jax.block_until_ready(out)

    ref = reference_block(x, params, n_head=n_head)
    assert out.shape == (B, T, C)
    err = float(jnp.max(jnp.abs(out - ref)))
    assert jnp.allclose(out, ref, atol=5e-3, rtol=5e-3), f"mismatch vs reference, max abs err={err}"

    print("KERNEL_OK")
</pallas_src>

<mosaic_0001>
module attributes {stable_mosaic.version = 11 : i64} {
  func.func @block_kernel(%arg0: i32, %arg1: i32, %arg2: memref<1x16x32xf32, #tpu.memory_space<vmem>>, %arg3: memref<32x32xbf16, #tpu.memory_space<vmem>>, %arg4: memref<32x64xbf16, #tpu.memory_space<vmem>>, %arg5: memref<32x32xbf16, #tpu.memory_space<vmem>>, %arg6: memref<1x32xf32, #tpu.memory_space<vmem>>, %arg7: memref<1x32xf32, #tpu.memory_space<vmem>>, %arg8: memref<1x32xf32, #tpu.memory_space<vmem>>, %arg9: memref<1x32xf32, #tpu.memory_space<vmem>>, %arg10: memref<1x32xf32, #tpu.memory_space<vmem>>, %arg11: memref<32x128xbf16, #tpu.memory_space<vmem>>, %arg12: memref<1x128xf32, #tpu.memory_space<vmem>>, %arg13: memref<128x32xbf16, #tpu.memory_space<vmem>>, %arg14: memref<1x32xf32, #tpu.memory_space<vmem>>, %arg15: memref<1x16x32xf32, #tpu.memory_space<vmem>>, %arg16: memref<16x32xbf16, #tpu.memory_space<vmem>>, %arg17: memref<4x16x8xbf16, #tpu.memory_space<vmem>>, %arg18: memref<4x8x8xbf16, #tpu.memory_space<vmem>>, %arg19: memref<4x8x8xbf16, #tpu.memory_space<vmem>>, %arg20: memref<8x64xbf16, #tpu.memory_space<vmem>>, %arg21: memref<16x32xbf16, #tpu.memory_space<vmem>>, %arg22: memref<4x16x1xf32, #tpu.memory_space<vmem>>, %arg23: memref<4x16x1xf32, #tpu.memory_space<vmem>>, %arg24: memref<4x16x8xf32, #tpu.memory_space<vmem>>) attributes {dimension_semantics = [#tpu.dimension_semantics<parallel>, #tpu.dimension_semantics<arbitrary>], iteration_bounds = array<i64: 2, 2>, scalar_prefetch = 0 : i64, scratch_operands = 9 : i64, tpu.core_type = #tpu.core_type<tc>, window_params = [{transform_indices = @transform_0, window_bounds = array<i64: 1, 16, 32>}, {pipeline_mode = #tpu.pipeline_mode<synchronous>, transform_indices = @transform_1, window_bounds = array<i64: 32, 32>}, {pipeline_mode = #tpu.pipeline_mode<synchronous>, transform_indices = @transform_2, window_bounds = array<i64: 32, 64>}, {pipeline_mode = #tpu.pipeline_mode<synchronous>, transform_indices = @transform_3, window_bounds = array<i64: 32, 32>}, {pipeline_mode = #tpu.pipeline_mode<synchronous>, transform_indices = @transform_4, window_bounds = array<i64: 1, 32>}, {pipeline_mode = #tpu.pipeline_mode<synchronous>, transform_indices = @transform_5, window_bounds = array<i64: 1, 32>}, {pipeline_mode = #tpu.pipeline_mode<synchronous>, transform_indices = @transform_6, window_bounds = array<i64: 1, 32>}, {pipeline_mode = #tpu.pipeline_mode<synchronous>, transform_indices = @transform_7, window_bounds = array<i64: 1, 32>}, {pipeline_mode = #tpu.pipeline_mode<synchronous>, transform_indices = @transform_8, window_bounds = array<i64: 1, 32>}, {pipeline_mode = #tpu.pipeline_mode<synchronous>, transform_indices = @transform_9, window_bounds = array<i64: 32, 128>}, {pipeline_mode = #tpu.pipeline_mode<synchronous>, transform_indices = @transform_10, window_bounds = array<i64: 1, 128>}, {pipeline_mode = #tpu.pipeline_mode<synchronous>, transform_indices = @transform_11, window_bounds = array<i64: 128, 32>}, {pipeline_mode = #tpu.pipeline_mode<synchronous>, transform_indices = @transform_12, window_bounds = array<i64: 1, 32>}, {transform_indices = @transform_13, window_bounds = array<i64: 1, 16, 32>}]} {
    %c0_i32 = arith.constant 0 : i32
    %0 = arith.cmpi eq, %arg1, %c0_i32 : i32
    %1 = arith.extui %0 : i1 to i32
    %c0_i32_0 = arith.constant 0 : i32
    %2 = arith.cmpi ne, %1, %c0_i32_0 : i32
    scf.if %2 {
      %c0_69 = arith.constant 0 : index
      %c0_70 = arith.constant 0 : index
      %c0_71 = arith.constant 0 : index
      %84 = vector.load %arg2[%c0_69, %c0_70, %c0_71] : memref<1x16x32xf32, #tpu.memory_space<vmem>>, vector<1x16x32xf32>
      %85 = vector.shape_cast %84 : vector<1x16x32xf32> to vector<16x32xf32>
      %c0_72 = arith.constant 0 : index
      %c0_73 = arith.constant 0 : index
      %86 = vector.load %arg7[%c0_72, %c0_73] : memref<1x32xf32, #tpu.memory_space<vmem>>, vector<1x32xf32>
      %87 = vector.shape_cast %86 : vector<1x32xf32> to vector<32xf32>
      %c0_74 = arith.constant 0 : index
      %c0_75 = arith.constant 0 : index
      %88 = vector.load %arg8[%c0_74, %c0_75] : memref<1x32xf32, #tpu.memory_space<vmem>>, vector<1x32xf32>
      %89 = vector.shape_cast %88 : vector<1x32xf32> to vector<32xf32>
      %cst_76 = arith.constant dense<0.000000e+00> : vector<16xf32>
      %90 = vector.multi_reduction <add>, %85, %cst_76 [1] : vector<16x32xf32> to vector<16xf32>
      %91 = vector.shape_cast %90 : vector<16xf32> to vector<16x1xf32>
      %cst_77 = arith.constant 3.200000e+01 : f32
      %92 = vector.broadcast %cst_77 : f32 to vector<16x1xf32>
      %93 = arith.divf %91, %92 : vector<16x1xf32>
      %94 = vector.broadcast %93 : vector<16x1xf32> to vector<16x32xf32>
      %95 = arith.subf %85, %94 : vector<16x32xf32>
      %96 = arith.mulf %95, %95 : vector<16x32xf32>
      %cst_78 = arith.constant dense<0.000000e+00> : vector<16xf32>
      %97 = vector.multi_reduction <add>, %96, %cst_78 [1] : vector<16x32xf32> to vector<16xf32>
      %98 = vector.shape_cast %97 : vector<16xf32> to vector<16x1xf32>
      %cst_79 = arith.constant 3.200000e+01 : f32
      %99 = vector.broadcast %cst_79 : f32 to vector<16x1xf32>
      %100 = arith.divf %98, %99 : vector<16x1xf32>
      %101 = vector.broadcast %93 : vector<16x1xf32> to vector<16x32xf32>
      %102 = arith.subf %85, %101 : vector<16x32xf32>
      %cst_80 = arith.constant 9.99999974E-6 : f32
      %103 = vector.broadcast %cst_80 : f32 to vector<16x1xf32>
      %104 = arith.addf %100, %103 : vector<16x1xf32>
      %105 = math.rsqrt %104 : vector<16x1xf32>
      %106 = vector.broadcast %105 : vector<16x1xf32> to vector<16x32xf32>
      %107 = arith.mulf %102, %106 : vector<16x32xf32>
      %108 = vector.shape_cast %87 : vector<32xf32> to vector<1x32xf32>
      %109 = vector.broadcast %108 : vector<1x32xf32> to vector<16x32xf32>
      %110 = arith.mulf %107, %109 : vector<16x32xf32>
      %111 = vector.shape_cast %89 : vector<32xf32> to vector<1x32xf32>
      %112 = vector.broadcast %111 : vector<1x32xf32> to vector<16x32xf32>
      %113 = arith.addf %110, %112 : vector<16x32xf32>
      %114 = arith.truncf %113 : vector<16x32xf32> to vector<16x32xbf16>
      %c0_81 = arith.constant 0 : index
      %c0_82 = arith.constant 0 : index
      %115 = vector.load %arg16[%c0_81, %c0_82] : memref<16x32xbf16, #tpu.memory_space<vmem>>, vector<16x32xbf16>
      tpu.vector_store %arg16[%c0_81, %c0_82], %114 {strides = array<i32>} : memref<16x32xbf16, #tpu.memory_space<vmem>>, vector<16x32xbf16>,
      %c0_83 = arith.constant 0 : index
      %c0_84 = arith.constant 0 : index
      %116 = vector.load %arg3[%c0_83, %c0_84] : memref<32x32xbf16, #tpu.memory_space<vmem>>, vector<32x32xbf16>
      %cst_85 = arith.constant dense<0.000000e+00> : vector<16x32xf32>
      %117 = tpu.matmul %114, %116, %cst_85 {dimension_numbers = #tpu.dot_dimension_numbers<[1], [0], [0], [1], [0, 0, 1, 1], [], []>} : vector<16x32xbf16>, vector<32x32xbf16>, vector<16x32xf32> -> vector<16x32xf32>
      %118 = arith.truncf %117 : vector<16x32xf32> to vector<16x32xbf16>
      %c0_86 = arith.constant 0 : index
      %c0_87 = arith.constant 0 : index
      %119 = vector.load %arg21[%c0_86, %c0_87] : memref<16x32xbf16, #tpu.memory_space<vmem>>, vector<16x32xbf16>
      tpu.vector_store %arg21[%c0_86, %c0_87], %118 {strides = array<i32>} : memref<16x32xbf16, #tpu.memory_space<vmem>>, vector<16x32xbf16>,
      %c0_88 = arith.constant 0 : index
      %c0_89 = arith.constant 0 : index
      %120 = vector.load %arg21[%c0_88, %c0_89] : memref<16x32xbf16, #tpu.memory_space<vmem>>, vector<16x8xbf16>
      %c0_90 = arith.constant 0 : index
      %c0_91 = arith.constant 0 : index
      %c0_92 = arith.constant 0 : index
      %121 = vector.load %arg17[%c0_90, %c0_91, %c0_92] : memref<4x16x8xbf16, #tpu.memory_space<vmem>>, vector<1x16x8xbf16>
      %122 = vector.shape_cast %121 : vector<1x16x8xbf16> to vector<16x8xbf16>
      %123 = vector.shape_cast %120 : vector<16x8xbf16> to vector<1x16x8xbf16>
      tpu.vector_store %arg17[%c0_90, %c0_91, %c0_92], %123 {strides = array<i32>} : memref<4x16x8xbf16, #tpu.memory_space<vmem>>, vector<1x16x8xbf16>,
      %c0_93 = arith.constant 0 : index
      %c8_94 = arith.constant 8 : index
      %124 = vector.load %arg21[%c0_93, %c8_94] : memref<16x32xbf16, #tpu.memory_space<vmem>>, vector<16x8xbf16>
      %c1_95 = arith.constant 1 : index
      %c0_96 = arith.constant 0 : index
      %c0_97 = arith.constant 0 : index
      %125 = vector.load %arg17[%c1_95, %c0_96, %c0_97] : memref<4x16x8xbf16, #tpu.memory_space<vmem>>, vector<1x16x8xbf16>
      %126 = vector.shape_cast %125 : vector<1x16x8xbf16> to vector<16x8xbf16>
      %127 = vector.shape_cast %124 : vector<16x8xbf16> to vector<1x16x8xbf16>
      tpu.vector_store %arg17[%c1_95, %c0_96, %c0_97], %127 {strides = array<i32>} : memref<4x16x8xbf16, #tpu.memory_space<vmem>>, vector<1x16x8xbf16>,
      %c0_98 = arith.constant 0 : index
      %c16_99 = arith.constant 16 : index
      %128 = vector.load %arg21[%c0_98, %c16_99] : memref<16x32xbf16, #tpu.memory_space<vmem>>, vector<16x8xbf16>
      %c2_100 = arith.constant 2 : index
      %c0_101 = arith.constant 0 : index
      %c0_102 = arith.constant 0 : index
      %129 = vector.load %arg17[%c2_100, %c0_101, %c0_102] : memref<4x16x8xbf16, #tpu.memory_space<vmem>>, vector<1x16x8xbf16>
      %130 = vector.shape_cast %129 : vector<1x16x8xbf16> to vector<16x8xbf16>
      %131 = vector.shape_cast %128 : vector<16x8xbf16> to vector<1x16x8xbf16>
      tpu.vector_store %arg17[%c2_100, %c0_101, %c0_102], %131 {strides = array<i32>} : memref<4x16x8xbf16, #tpu.memory_space<vmem>>, vector<1x16x8xbf16>,
      %c0_103 = arith.constant 0 : index
      %c24_104 = arith.constant 24 : index
      %132 = vector.load %arg21[%c0_103, %c24_104] : memref<16x32xbf16, #tpu.memory_space<vmem>>, vector<16x8xbf16>
      %c3_105 = arith.constant 3 : index
      %c0_106 = arith.constant 0 : index
      %c0_107 = arith.constant 0 : index
      %133 = vector.load %arg17[%c3_105, %c0_106, %c0_107] : memref<4x16x8xbf16, #tpu.memory_space<vmem>>, vector<1x16x8xbf16>
      %134 = vector.shape_cast %133 : vector<1x16x8xbf16> to vector<16x8xbf16>
      %135 = vector.shape_cast %132 : vector<16x8xbf16> to vector<1x16x8xbf16>
      tpu.vector_store %arg17[%c3_105, %c0_106, %c0_107], %135 {strides = array<i32>} : memref<4x16x8xbf16, #tpu.memory_space<vmem>>, vector<1x16x8xbf16>,
      %cst_108 = arith.constant -1.000000e+30 : f32
      %136 = vector.broadcast %cst_108 : f32 to vector<4x16x1xf32>
      %c0_109 = arith.constant 0 : index
      %c0_110 = arith.constant 0 : index
      %c0_111 = arith.constant 0 : index
      %137 = vector.load %arg22[%c0_109, %c0_110, %c0_111] : memref<4x16x1xf32, #tpu.memory_space<vmem>>, vector<4x16x1xf32>
      tpu.vector_store %arg22[%c0_109, %c0_110, %c0_111], %136 {strides = array<i32>} : memref<4x16x1xf32, #tpu.memory_space<vmem>>, vector<4x16x1xf32>,
      %cst_112 = arith.constant 0.000000e+00 : f32
      %138 = vector.broadcast %cst_112 : f32 to vector<4x16x1xf32>
      %c0_113 = arith.constant 0 : index
      %c0_114 = arith.constant 0 : index
      %c0_115 = arith.constant 0 : index
      %139 = vector.load %arg23[%c0_113, %c0_114, %c0_115] : memref<4x16x1xf32, #tpu.memory_space<vmem>>, vector<4x16x1xf32>
      tpu.vector_store %arg23[%c0_113, %c0_114, %c0_115], %138 {strides = array<i32>} : memref<4x16x1xf32, #tpu.memory_space<vmem>>, vector<4x16x1xf32>,
      %cst_116 = arith.constant 0.000000e+00 : f32
      %140 = vector.broadcast %cst_116 : f32 to vector<4x16x8xf32>
      %c0_117 = arith.constant 0 : index
      %c0_118 = arith.constant 0 : index
      %c0_119 = arith.constant 0 : index
      %141 = vector.load %arg24[%c0_117, %c0_118, %c0_119] : memref<4x16x8xf32, #tpu.memory_space<vmem>>, vector<4x16x8xf32>
      tpu.vector_store %arg24[%c0_117, %c0_118, %c0_119], %140 {strides = array<i32>} : memref<4x16x8xf32, #tpu.memory_space<vmem>>, vector<4x16x8xf32>,
    } else {
    }
    %c8_i32 = arith.constant 8 : i32
    %3 = arith.muli %arg1, %c8_i32 : i32
    %4 = tpu.assume_multiple %3, 8 : i32
    %5 = arith.index_cast %4 : i32 to index
    %c0 = arith.constant 0 : index
    %6 = vector.load %arg16[%5, %c0] : memref<16x32xbf16, #tpu.memory_space<vmem>>, vector<8x32xbf16>
    %c0_1 = arith.constant 0 : index
    %c0_2 = arith.constant 0 : index
    %7 = vector.load %arg4[%c0_1, %c0_2] : memref<32x64xbf16, #tpu.memory_space<vmem>>, vector<32x64xbf16>
    %cst = arith.constant dense<0.000000e+00> : vector<8x64xf32>
    %8 = tpu.matmul %6, %7, %cst {dimension_numbers = #tpu.dot_dimension_numbers<[1], [0], [0], [1], [0, 0, 1, 1], [], []>} : vector<8x32xbf16>, vector<32x64xbf16>, vector<8x64xf32> -> vector<8x64xf32>
    %9 = arith.truncf %8 : vector<8x64xf32> to vector<8x64xbf16>
    %c0_3 = arith.constant 0 : index
    %c0_4 = arith.constant 0 : index
    %10 = vector.load %arg20[%c0_3, %c0_4] : memref<8x64xbf16, #tpu.memory_space<vmem>>, vector<8x64xbf16>
    tpu.vector_store %arg20[%c0_3, %c0_4], %9 {strides = array<i32>} : memref<8x64xbf16, #tpu.memory_space<vmem>>, vector<8x64xbf16>,
    %c0_5 = arith.constant 0 : index
    %c0_6 = arith.constant 0 : index
    %11 = vector.load %arg20[%c0_5, %c0_6] : memref<8x64xbf16, #tpu.memory_space<vmem>>, vector<8x8xbf16>
    %c0_7 = arith.constant 0 : index
    %c0_8 = arith.constant 0 : index
    %c0_9 = arith.constant 0 : index
    %12 = vector.load %arg18[%c0_7, %c0_8, %c0_9] : memref<4x8x8xbf16, #tpu.memory_space<vmem>>, vector<1x8x8xbf16>
    %13 = vector.shape_cast %12 : vector<1x8x8xbf16> to vector<8x8xbf16>
    %14 = vector.shape_cast %11 : vector<8x8xbf16> to vector<1x8x8xbf16>
    tpu.vector_store %arg18[%c0_7, %c0_8, %c0_9], %14 {strides = array<i32>} : memref<4x8x8xbf16, #tpu.memory_space<vmem>>, vector<1x8x8xbf16>,
    %c0_10 = arith.constant 0 : index
    %c32 = arith.constant 32 : index
    %15 = vector.load %arg20[%c0_10, %c32] : memref<8x64xbf16, #tpu.memory_space<vmem>>, vector<8x8xbf16>
    %c0_11 = arith.constant 0 : index
    %c0_12 = arith.constant 0 : index
    %c0_13 = arith.constant 0 : index
    %16 = vector.load %arg19[%c0_11, %c0_12, %c0_13] : memref<4x8x8xbf16, #tpu.memory_space<vmem>>, vector<1x8x8xbf16>
    %17 = vector.shape_cast %16 : vector<1x8x8xbf16> to vector<8x8xbf16>
    %18 = vector.shape_cast %15 : vector<8x8xbf16> to vector<1x8x8xbf16>
    tpu.vector_store %arg19[%c0_11, %c0_12, %c0_13], %18 {strides = array<i32>} : memref<4x8x8xbf16, #tpu.memory_space<vmem>>, vector<1x8x8xbf16>,
    %c0_14 = arith.constant 0 : index
    %c8 = arith.constant 8 : index
    %19 = vector.load %arg20[%c0_14, %c8] : memref<8x64xbf16, #tpu.memory_space<vmem>>, vector<8x8xbf16>
    %c1 = arith.constant 1 : index
    %c0_15 = arith.constant 0 : index
    %c0_16 = arith.constant 0 : index
    %20 = vector.load %arg18[%c1, %c0_15, %c0_16] : memref<4x8x8xbf16, #tpu.memory_space<vmem>>, vector<1x8x8xbf16>
    %21 = vector.shape_cast %20 : vector<1x8x8xbf16> to vector<8x8xbf16>
    %22 = vector.shape_cast %19 : vector<8x8xbf16> to vector<1x8x8xbf16>
    tpu.vector_store %arg18[%c1, %c0_15, %c0_16], %22 {strides = array<i32>} : memref<4x8x8xbf16, #tpu.memory_space<vmem>>, vector<1x8x8xbf16>,
    %c0_17 = arith.constant 0 : index
    %c40 = arith.constant 40 : index
    %23 = vector.load %arg20[%c0_17, %c40] : memref<8x64xbf16, #tpu.memory_space<vmem>>, vector<8x8xbf16>
    %c1_18 = arith.constant 1 : index
    %c0_19 = arith.constant 0 : index
    %c0_20 = arith.constant 0 : index
    %24 = vector.load %arg19[%c1_18, %c0_19, %c0_20] : memref<4x8x8xbf16, #tpu.memory_space<vmem>>, vector<1x8x8xbf16>
    %25 = vector.shape_cast %24 : vector<1x8x8xbf16> to vector<8x8xbf16>
    %26 = vector.shape_cast %23 : vector<8x8xbf16> to vector<1x8x8xbf16>
    tpu.vector_store %arg19[%c1_18, %c0_19, %c0_20], %26 {strides = array<i32>} : memref<4x8x8xbf16, #tpu.memory_space<vmem>>, vector<1x8x8xbf16>,
    %c0_21 = arith.constant 0 : index
    %c16 = arith.constant 16 : index
    %27 = vector.load %arg20[%c0_21, %c16] : memref<8x64xbf16, #tpu.memory_space<vmem>>, vector<8x8xbf16>
    %c2 = arith.constant 2 : index
    %c0_22 = arith.constant 0 : index
    %c0_23 = arith.constant 0 : index
    %28 = vector.load %arg18[%c2, %c0_22, %c0_23] : memref<4x8x8xbf16, #tpu.memory_space<vmem>>, vector<1x8x8xbf16>
    %29 = vector.shape_cast %28 : vector<1x8x8xbf16> to vector<8x8xbf16>
    %30 = vector.shape_cast %27 : vector<8x8xbf16> to vector<1x8x8xbf16>
    tpu.vector_store %arg18[%c2, %c0_22, %c0_23], %30 {strides = array<i32>} : memref<4x8x8xbf16, #tpu.memory_space<vmem>>, vector<1x8x8xbf16>,
    %c0_24 = arith.constant 0 : index
    %c48 = arith.constant 48 : index
    %31 = vector.load %arg20[%c0_24, %c48] : memref<8x64xbf16, #tpu.memory_space<vmem>>, vector<8x8xbf16>
    %c2_25 = arith.constant 2 : index
    %c0_26 = arith.constant 0 : index
    %c0_27 = arith.constant 0 : index
    %32 = vector.load %arg19[%c2_25, %c0_26, %c0_27] : memref<4x8x8xbf16, #tpu.memory_space<vmem>>, vector<1x8x8xbf16>
    %33 = vector.shape_cast %32 : vector<1x8x8xbf16> to vector<8x8xbf16>
    %34 = vector.shape_cast %31 : vector<8x8xbf16> to vector<1x8x8xbf16>
    tpu.vector_store %arg19[%c2_25, %c0_26, %c0_27], %34 {strides = array<i32>} : memref<4x8x8xbf16, #tpu.memory_space<vmem>>, vector<1x8x8xbf16>,
    %c0_28 = arith.constant 0 : index
    %c24 = arith.constant 24 : index
    %35 = vector.load %arg20[%c0_28, %c24] : memref<8x64xbf16, #tpu.memory_space<vmem>>, vector<8x8xbf16>
    %c3 = arith.constant 3 : index
    %c0_29 = arith.constant 0 : index
    %c0_30 = arith.constant 0 : index
    %36 = vector.load %arg18[%c3, %c0_29, %c0_30] : memref<4x8x8xbf16, #tpu.memory_space<vmem>>, vector<1x8x8xbf16>
    %37 = vector.shape_cast %36 : vector<1x8x8xbf16> to vector<8x8xbf16>
    %38 = vector.shape_cast %35 : vector<8x8xbf16> to vector<1x8x8xbf16>
    tpu.vector_store %arg18[%c3, %c0_29, %c0_30], %38 {strides = array<i32>} : memref<4x8x8xbf16, #tpu.memory_space<vmem>>, vector<1x8x8xbf16>,
    %c0_31 = arith.constant 0 : index
    %c56 = arith.constant 56 : index
    %39 = vector.load %arg20[%c0_31, %c56] : memref<8x64xbf16, #tpu.memory_space<vmem>>, vector<8x8xbf16>
    %c3_32 = arith.constant 3 : index
    %c0_33 = arith.constant 0 : index
    %c0_34 = arith.constant 0 : index
    %40 = vector.load %arg19[%c3_32, %c0_33, %c0_34] : memref<4x8x8xbf16, #tpu.memory_space<vmem>>, vector<1x8x8xbf16>
    %41 = vector.shape_cast %40 : vector<1x8x8xbf16> to vector<8x8xbf16>
    %42 = vector.shape_cast %39 : vector<8x8xbf16> to vector<1x8x8xbf16>
    tpu.vector_store %arg19[%c3_32, %c0_33, %c0_34], %42 {strides = array<i32>} : memref<4x8x8xbf16, #tpu.memory_space<vmem>>, vector<1x8x8xbf16>,
    %c0_35 = arith.constant 0 : index
    %c0_36 = arith.constant 0 : index
    %c0_37 = arith.constant 0 : index
    %43 = vector.load %arg17[%c0_35, %c0_36, %c0_37] : memref<4x16x8xbf16, #tpu.memory_space<vmem>>, vector<4x16x8xbf16>
    %c0_38 = arith.constant 0 : index
    %c0_39 = arith.constant 0 : index
    %c0_40 = arith.constant 0 : index
    %44 = vector.load %arg18[%c0_38, %c0_39, %c0_40] : memref<4x8x8xbf16, #tpu.memory_space<vmem>>, vector<4x8x8xbf16>
    "tpu.trace_start"() <{level = 10 : i32, message = "hqd,hkd->hqk"}> : () -> ()
    %cst_41 = arith.constant dense<0.000000e+00> : vector<4x16x8xf32>
    %45 = tpu.matmul %43, %44, %cst_41 {dimension_numbers = #tpu.dot_dimension_numbers<[2], [2], [1], [1], [0, 0, 0, 1, 1, 1], [0], [0]>} : vector<4x16x8xbf16>, vector<4x8x8xbf16>, vector<4x16x8xf32> -> vector<4x16x8xf32>
    "tpu.trace_stop"() : () -> ()
    %46 = tpu.iota {dimensions = array<i32: 0>} : vector<16x8xi32>
    %47 = tpu.iota {dimensions = array<i32: 1>} : vector<16x8xi32>
    %c8_i32_42 = arith.constant 8 : i32
    %48 = arith.muli %arg1, %c8_i32_42 : i32
    %49 = vector.broadcast %48 : i32 to vector<16x8xi32>
    %50 = arith.addi %47, %49 : vector<16x8xi32>
    %51 = arith.cmpi sge, %46, %50 : vector<16x8xi32>
    %c0_43 = arith.constant 0 : index
    %c0_44 = arith.constant 0 : index
    %c0_45 = arith.constant 0 : index
    %52 = vector.load %arg22[%c0_43, %c0_44, %c0_45] : memref<4x16x1xf32, #tpu.memory_space<vmem>>, vector<4x16x1xf32>
    %cst_46 = arith.constant dense<0xFF800000> : vector<4x16xf32>
    %53 = vector.multi_reduction <maximumf>, %45, %cst_46 [2] : vector<4x16x8xf32> to vector<4x16xf32>
    %54 = vector.shape_cast %53 : vector<4x16xf32> to vector<4x16x1xf32>
    %55 = arith.maximumf %52, %54 : vector<4x16x1xf32>
    %56 = arith.subf %52, %55 : vector<4x16x1xf32>
    %57 = math.exp %56 : vector<4x16x1xf32>
    %58 = vector.shape_cast %51 : vector<16x8xi1> to vector<1x16x8xi1>
    %59 = vector.broadcast %55 : vector<4x16x1xf32> to vector<4x16x8xf32>
    %60 = arith.subf %45, %59 : vector<4x16x8xf32>
    %61 = math.exp %60 : vector<4x16x8xf32>
    %cst_47 = arith.constant 0.000000e+00 : f32
    %62 = vector.shape_cast %58 : vector<1x16x8xi1> to vector<1x16x8xi1>
    %63 = vector.broadcast %62 : vector<1x16x8xi1> to vector<4x16x8xi1>
    %64 = vector.broadcast %cst_47 : f32 to vector<4x16x8xf32>
    %65 = arith.select %63, %61, %64 : vector<4x16x8xi1>, vector<4x16x8xf32>
    %c0_48 = arith.constant 0 : index
    %c0_49 = arith.constant 0 : index
    %c0_50 = arith.constant 0 : index
    %66 = vector.load %arg23[%c0_48, %c0_49, %c0_50] : memref<4x16x1xf32, #tpu.memory_space<vmem>>, vector<4x16x1xf32>
    %67 = arith.mulf %57, %66 : vector<4x16x1xf32>
    %cst_51 = arith.constant dense<0.000000e+00> : vector<4x16xf32>
    %68 = vector.multi_reduction <add>, %65, %cst_51 [2] : vector<4x16x8xf32> to vector<4x16xf32>
    %69 = vector.shape_cast %68 : vector<4x16xf32> to vector<4x16x1xf32>
    %70 = arith.addf %67, %69 : vector<4x16x1xf32>
    %c0_52 = arith.constant 0 : index
    %c0_53 = arith.constant 0 : index
    %c0_54 = arith.constant 0 : index
    %71 = vector.load %arg23[%c0_52, %c0_53, %c0_54] : memref<4x16x1xf32, #tpu.memory_space<vmem>>, vector<4x16x1xf32>
    tpu.vector_store %arg23[%c0_52, %c0_53, %c0_54], %70 {strides = array<i32>} : memref<4x16x1xf32, #tpu.memory_space<vmem>>, vector<4x16x1xf32>,
    %c0_55 = arith.constant 0 : index
    %c0_56 = arith.constant 0 : index
    %c0_57 = arith.constant 0 : index
    %72 = vector.load %arg24[%c0_55, %c0_56, %c0_57] : memref<4x16x8xf32, #tpu.memory_space<vmem>>, vector<4x16x8xf32>
    %73 = vector.broadcast %57 : vector<4x16x1xf32> to vector<4x16x8xf32>
    %74 = arith.mulf %73, %72 : vector<4x16x8xf32>
    %75 = arith.truncf %65 : vector<4x16x8xf32> to vector<4x16x8xbf16>
    %c0_58 = arith.constant 0 : index
    %c0_59 = arith.constant 0 : index
    %c0_60 = arith.constant 0 : index
    %76 = vector.load %arg19[%c0_58, %c0_59, %c0_60] : memref<4x8x8xbf16, #tpu.memory_space<vmem>>, vector<4x8x8xbf16>
    "tpu.trace_start"() <{level = 10 : i32, message = "hqk,hkd->hqd"}> : () -> ()
    %cst_61 = arith.constant dense<0.000000e+00> : vector<4x16x8xf32>
    %77 = tpu.matmul %75, %76, %cst_61 {dimension_numbers = #tpu.dot_dimension_numbers<[2], [1], [1], [2], [0, 0, 0, 1, 1, 2], [0], [0]>} : vector<4x16x8xbf16>, vector<4x8x8xbf16>, vector<4x16x8xf32> -> vector<4x16x8xf32>
    "tpu.trace_stop"() : () -> ()
    %78 = arith.addf %74, %77 : vector<4x16x8xf32>
    %c0_62 = arith.constant 0 : index
    %c0_63 = arith.constant 0 : index
    %c0_64 = arith.constant 0 : index
    %79 = vector.load %arg24[%c0_62, %c0_63, %c0_64] : memref<4x16x8xf32, #tpu.memory_space<vmem>>, vector<4x16x8xf32>
    tpu.vector_store %arg24[%c0_62, %c0_63, %c0_64], %78 {strides = array<i32>} : memref<4x16x8xf32, #tpu.memory_space<vmem>>, vector<4x16x8xf32>,
    %c0_65 = arith.constant 0 : index
    %c0_66 = arith.constant 0 : index
    %c0_67 = arith.constant 0 : index
    %80 = vector.load %arg22[%c0_65, %c0_66, %c0_67] : memref<4x16x1xf32, #tpu.memory_space<vmem>>, vector<4x16x1xf32>
    tpu.vector_store %arg22[%c0_65, %c0_66, %c0_67], %55 {strides = array<i32>} : memref<4x16x1xf32, #tpu.memory_space<vmem>>, vector<4x16x1xf32>,
    %c1_i32 = arith.constant 1 : i32
    %81 = arith.cmpi eq, %arg1, %c1_i32 : i32
    %82 = arith.extui %81 : i1 to i32
    %c0_i32_68 = arith.constant 0 : i32
    %83 = arith.cmpi ne, %82, %c0_i32_68 : i32
    scf.if %83 {
      %c0_69 = arith.constant 0 : index
      %c0_70 = arith.constant 0 : index
      %c0_71 = arith.constant 0 : index
      %84 = vector.load %arg2[%c0_69, %c0_70, %c0_71] : memref<1x16x32xf32, #tpu.memory_space<vmem>>, vector<1x16x32xf32>
      %85 = vector.shape_cast %84 : vector<1x16x32xf32> to vector<16x32xf32>
      %c0_72 = arith.constant 0 : index
      %c0_73 = arith.constant 0 : index
      %c0_74 = arith.constant 0 : index
      %86 = vector.load %arg24[%c0_72, %c0_73, %c0_74] : memref<4x16x8xf32, #tpu.memory_space<vmem>>, vector<1x16x8xf32>
      %87 = vector.shape_cast %86 : vector<1x16x8xf32> to vector<16x8xf32>
      %c0_75 = arith.constant 0 : index
      %c0_76 = arith.constant 0 : index
      %c0_77 = arith.constant 0 : index
      %88 = vector.load %arg23[%c0_75, %c0_76, %c0_77] : memref<4x16x1xf32, #tpu.memory_space<vmem>>, vector<1x16x1xf32>
      %89 = vector.shape_cast %88 : vector<1x16x1xf32> to vector<16x1xf32>
      %90 = tpu.reciprocal %89 {approx = true} : vector<16x1xf32> -> vector<16x1xf32>
      %91 = vector.broadcast %90 : vector<16x1xf32> to vector<16x8xf32>
      %92 = arith.mulf %87, %91 : vector<16x8xf32>
      %93 = arith.truncf %92 : vector<16x8xf32> to vector<16x8xbf16>
      %c0_78 = arith.constant 0 : index
      %c0_79 = arith.constant 0 : index
      %94 = vector.load %arg21[%c0_78, %c0_79] : memref<16x32xbf16, #tpu.memory_space<vmem>>, vector<16x8xbf16>
      tpu.vector_store %arg21[%c0_78, %c0_79], %93 {strides = array<i32>} : memref<16x32xbf16, #tpu.memory_space<vmem>>, vector<16x8xbf16>,
      %c1_80 = arith.constant 1 : index
      %c0_81 = arith.constant 0 : index
      %c0_82 = arith.constant 0 : index
      %95 = vector.load %arg24[%c1_80, %c0_81, %c0_82] : memref<4x16x8xf32, #tpu.memory_space<vmem>>, vector<1x16x8xf32>
      %96 = vector.shape_cast %95 : vector<1x16x8xf32> to vector<16x8xf32>
      %c1_83 = arith.constant 1 : index
      %c0_84 = arith.constant 0 : index
      %c0_85 = arith.constant 0 : index
      %97 = vector.load %arg23[%c1_83, %c0_84, %c0_85] : memref<4x16x1xf32, #tpu.memory_space<vmem>>, vector<1x16x1xf32>
      %98 = vector.shape_cast %97 : vector<1x16x1xf32> to vector<16x1xf32>
      %99 = tpu.reciprocal %98 {approx = true} : vector<16x1xf32> -> vector<16x1xf32>
      %100 = vector.broadcast %99 : vector<16x1xf32> to vector<16x8xf32>
      %101 = arith.mulf %96, %100 : vector<16x8xf32>
      %102 = arith.truncf %101 : vector<16x8xf32> to vector<16x8xbf16>
      %c0_86 = arith.constant 0 : index
      %c8_87 = arith.constant 8 : index
      %103 = vector.load %arg21[%c0_86, %c8_87] : memref<16x32xbf16, #tpu.memory_space<vmem>>, vector<16x8xbf16>
      tpu.vector_store %arg21[%c0_86, %c8_87], %102 {strides = array<i32>} : memref<16x32xbf16, #tpu.memory_space<vmem>>, vector<16x8xbf16>,
      %c2_88 = arith.constant 2 : index
      %c0_89 = arith.constant 0 : index
      %c0_90 = arith.constant 0 : index
      %104 = vector.load %arg24[%c2_88, %c0_89, %c0_90] : memref<4x16x8xf32, #tpu.memory_space<vmem>>, vector<1x16x8xf32>
      %105 = vector.shape_cast %104 : vector<1x16x8xf32> to vector<16x8xf32>
      %c2_91 = arith.constant 2 : index
      %c0_92 = arith.constant 0 : index
      %c0_93 = arith.constant 0 : index
      %106 = vector.load %arg23[%c2_91, %c0_92, %c0_93] : memref<4x16x1xf32, #tpu.memory_space<vmem>>, vector<1x16x1xf32>
      %107 = vector.shape_cast %106 : vector<1x16x1xf32> to vector<16x1xf32>
      %108 = tpu.reciprocal %107 {approx = true} : vector<16x1xf32> -> vector<16x1xf32>
      %109 = vector.broadcast %108 : vector<16x1xf32> to vector<16x8xf32>
      %110 = arith.mulf %105, %109 : vector<16x8xf32>
      %111 = arith.truncf %110 : vector<16x8xf32> to vector<16x8xbf16>
      %c0_94 = arith.constant 0 : index
      %c16_95 = arith.constant 16 : index
      %112 = vector.load %arg21[%c0_94, %c16_95] : memref<16x32xbf16, #tpu.memory_space<vmem>>, vector<16x8xbf16>
      tpu.vector_store %arg21[%c0_94, %c16_95], %111 {strides = array<i32>} : memref<16x32xbf16, #tpu.memory_space<vmem>>, vector<16x8xbf16>,
      %c3_96 = arith.constant 3 : index
      %c0_97 = arith.constant 0 : index
      %c0_98 = arith.constant 0 : index
      %113 = vector.load %arg24[%c3_96, %c0_97, %c0_98] : memref<4x16x8xf32, #tpu.memory_space<vmem>>, vector<1x16x8xf32>
      %114 = vector.shape_cast %113 : vector<1x16x8xf32> to vector<16x8xf32>
      %c3_99 = arith.constant 3 : index
      %c0_100 = arith.constant 0 : index
      %c0_101 = arith.constant 0 : index
      %115 = vector.load %arg23[%c3_99, %c0_100, %c0_101] : memref<4x16x1xf32, #tpu.memory_space<vmem>>, vector<1x16x1xf32>
      %116 = vector.shape_cast %115 : vector<1x16x1xf32> to vector<16x1xf32>
      %117 = tpu.reciprocal %116 {approx = true} : vector<16x1xf32> -> vector<16x1xf32>
      %118 = vector.broadcast %117 : vector<16x1xf32> to vector<16x8xf32>
      %119 = arith.mulf %114, %118 : vector<16x8xf32>
      %120 = arith.truncf %119 : vector<16x8xf32> to vector<16x8xbf16>
      %c0_102 = arith.constant 0 : index
      %c24_103 = arith.constant 24 : index
      %121 = vector.load %arg21[%c0_102, %c24_103] : memref<16x32xbf16, #tpu.memory_space<vmem>>, vector<16x8xbf16>
      tpu.vector_store %arg21[%c0_102, %c24_103], %120 {strides = array<i32>} : memref<16x32xbf16, #tpu.memory_space<vmem>>, vector<16x8xbf16>,
      %c0_104 = arith.constant 0 : index
      %c0_105 = arith.constant 0 : index
      %122 = vector.load %arg21[%c0_104, %c0_105] : memref<16x32xbf16, #tpu.memory_space<vmem>>, vector<16x32xbf16>
      %c0_106 = arith.constant 0 : index
      %c0_107 = arith.constant 0 : index
      %123 = vector.load %arg5[%c0_106, %c0_107] : memref<32x32xbf16, #tpu.memory_space<vmem>>, vector<32x32xbf16>
      %cst_108 = arith.constant dense<0.000000e+00> : vector<16x32xf32>
      %124 = tpu.matmul %122, %123, %cst_108 {dimension_numbers = #tpu.dot_dimension_numbers<[1], [0], [0], [1], [0, 0, 1, 1], [], []>} : vector<16x32xbf16>, vector<32x32xbf16>, vector<16x32xf32> -> vector<16x32xf32>
      %c0_109 = arith.constant 0 : index
      %c0_110 = arith.constant 0 : index
      %125 = vector.load %arg6[%c0_109, %c0_110] : memref<1x32xf32, #tpu.memory_space<vmem>>, vector<1x32xf32>
      %126 = vector.shape_cast %125 : vector<1x32xf32> to vector<32xf32>
      %127 = vector.shape_cast %126 : vector<32xf32> to vector<1x32xf32>
      %128 = vector.broadcast %127 : vector<1x32xf32> to vector<16x32xf32>
      %129 = arith.addf %124, %128 : vector<16x32xf32>
      %130 = arith.addf %85, %129 : vector<16x32xf32>
      %c0_111 = arith.constant 0 : index
      %c0_112 = arith.constant 0 : index
      %131 = vector.load %arg9[%c0_111, %c0_112] : memref<1x32xf32, #tpu.memory_space<vmem>>, vector<1x32xf32>
      %132 = vector.shape_cast %131 : vector<1x32xf32> to vector<32xf32>
      %c0_113 = arith.constant 0 : index
      %c0_114 = arith.constant 0 : index
      %133 = vector.load %arg10[%c0_113, %c0_114] : memref<1x32xf32, #tpu.memory_space<vmem>>, vector<1x32xf32>
      %134 = vector.shape_cast %133 : vector<1x32xf32> to vector<32xf32>
      %cst_115 = arith.constant dense<0.000000e+00> : vector<16xf32>
      %135 = vector.multi_reduction <add>, %130, %cst_115 [1] : vector<16x32xf32> to vector<16xf32>
      %136 = vector.shape_cast %135 : vector<16xf32> to vector<16x1xf32>
      %cst_116 = arith.constant 3.200000e+01 : f32
      %137 = vector.broadcast %cst_116 : f32 to vector<16x1xf32>
      %138 = arith.divf %136, %137 : vector<16x1xf32>
      %139 = vector.broadcast %138 : vector<16x1xf32> to vector<16x32xf32>
      %140 = arith.subf %130, %139 : vector<16x32xf32>
      %141 = arith.mulf %140, %140 : vector<16x32xf32>
      %cst_117 = arith.constant dense<0.000000e+00> : vector<16xf32>
      %142 = vector.multi_reduction <add>, %141, %cst_117 [1] : vector<16x32xf32> to vector<16xf32>
      %143 = vector.shape_cast %142 : vector<16xf32> to vector<16x1xf32>
      %cst_118 = arith.constant 3.200000e+01 : f32
      %144 = vector.broadcast %cst_118 : f32 to vector<16x1xf32>
      %145 = arith.divf %143, %144 : vector<16x1xf32>
      %146 = vector.broadcast %138 : vector<16x1xf32> to vector<16x32xf32>
      %147 = arith.subf %130, %146 : vector<16x32xf32>
      %cst_119 = arith.constant 9.99999974E-6 : f32
      %148 = vector.broadcast %cst_119 : f32 to vector<16x1xf32>
      %149 = arith.addf %145, %148 : vector<16x1xf32>
      %150 = math.rsqrt %149 : vector<16x1xf32>
      %151 = vector.broadcast %150 : vector<16x1xf32> to vector<16x32xf32>
      %152 = arith.mulf %147, %151 : vector<16x32xf32>
      %153 = vector.shape_cast %132 : vector<32xf32> to vector<1x32xf32>
      %154 = vector.broadcast %153 : vector<1x32xf32> to vector<16x32xf32>
      %155 = arith.mulf %152, %154 : vector<16x32xf32>
      %156 = vector.shape_cast %134 : vector<32xf32> to vector<1x32xf32>
      %157 = vector.broadcast %156 : vector<1x32xf32> to vector<16x32xf32>
      %158 = arith.addf %155, %157 : vector<16x32xf32>
      %159 = arith.truncf %158 : vector<16x32xf32> to vector<16x32xbf16>
      %c0_120 = arith.constant 0 : index
      %c0_121 = arith.constant 0 : index
      %160 = vector.load %arg11[%c0_120, %c0_121] : memref<32x128xbf16, #tpu.memory_space<vmem>>, vector<32x128xbf16>
      %cst_122 = arith.constant dense<0.000000e+00> : vector<16x128xf32>
      %161 = tpu.matmul %159, %160, %cst_122 {dimension_numbers = #tpu.dot_dimension_numbers<[1], [0], [0], [1], [0, 0, 1, 1], [], []>} : vector<16x32xbf16>, vector<32x128xbf16>, vector<16x128xf32> -> vector<16x128xf32>
      %c0_123 = arith.constant 0 : index
      %c0_124 = arith.constant 0 : index
      %162 = vector.load %arg12[%c0_123, %c0_124] : memref<1x128xf32, #tpu.memory_space<vmem>>, vector<1x128xf32>
      %163 = vector.shape_cast %162 : vector<1x128xf32> to vector<128xf32>
      %164 = vector.shape_cast %163 : vector<128xf32> to vector<1x128xf32>
      %165 = vector.broadcast %164 : vector<1x128xf32> to vector<16x128xf32>
      %166 = arith.addf %161, %165 : vector<16x128xf32>
      %cst_125 = arith.constant 0.000000e+00 : f32
      %167 = vector.broadcast %cst_125 : f32 to vector<16x128xf32>
      %168 = arith.maximumf %166, %167 : vector<16x128xf32>
      %169 = arith.truncf %168 : vector<16x128xf32> to vector<16x128xbf16>
      %c0_126 = arith.constant 0 : index
      %c0_127 = arith.constant 0 : index
      %170 = vector.load %arg13[%c0_126, %c0_127] : memref<128x32xbf16, #tpu.memory_space<vmem>>, vector<128x32xbf16>
      %cst_128 = arith.constant dense<0.000000e+00> : vector<16x32xf32>
      %171 = tpu.matmul %169, %170, %cst_128 {dimension_numbers = #tpu.dot_dimension_numbers<[1], [0], [0], [1], [0, 0, 1, 1], [], []>} : vector<16x128xbf16>, vector<128x32xbf16>, vector<16x32xf32> -> vector<16x32xf32>
      %c0_129 = arith.constant 0 : index
      %c0_130 = arith.constant 0 : index
      %172 = vector.load %arg14[%c0_129, %c0_130] : memref<1x32xf32, #tpu.memory_space<vmem>>, vector<1x32xf32>
      %173 = vector.shape_cast %172 : vector<1x32xf32> to vector<32xf32>
      %174 = vector.shape_cast %173 : vector<32xf32> to vector<1x32xf32>
      %175 = vector.broadcast %174 : vector<1x32xf32> to vector<16x32xf32>
      %176 = arith.addf %171, %175 : vector<16x32xf32>
      %177 = arith.addf %130, %176 : vector<16x32xf32>
      %c0_131 = arith.constant 0 : index
      %c0_132 = arith.constant 0 : index
      %c0_133 = arith.constant 0 : index
      %178 = vector.load %arg15[%c0_131, %c0_132, %c0_133] : memref<1x16x32xf32, #tpu.memory_space<vmem>>, vector<1x16x32xf32>
      %179 = vector.shape_cast %178 : vector<1x16x32xf32> to vector<16x32xf32>
      %180 = vector.shape_cast %177 : vector<16x32xf32> to vector<1x16x32xf32>
      tpu.vector_store %arg15[%c0_131, %c0_132, %c0_133], %180 {strides = array<i32>} : memref<1x16x32xf32, #tpu.memory_space<vmem>>, vector<1x16x32xf32>,
    } else {
    }
    return
  }
  func.func @transform_0(%arg0: i32, %arg1: i32) -> (i32, i32, i32) {
    %c0_i32 = arith.constant 0 : i32
    %c0_i32_0 = arith.constant 0 : i32
    %c0_i32_1 = arith.constant 0 : i32
    return %arg0, %c0_i32, %c0_i32_0 : i32, i32, i32
  }
  func.func @transform_1(%arg0: i32, %arg1: i32) -> (i32, i32) {
    %c0_i32 = arith.constant 0 : i32
    %c0_i32_0 = arith.constant 0 : i32
    %c0_i32_1 = arith.constant 0 : i32
    return %c0_i32, %c0_i32_0 : i32, i32
  }
  func.func @transform_2(%arg0: i32, %arg1: i32) -> (i32, i32) {
    %c0_i32 = arith.constant 0 : i32
    %c0_i32_0 = arith.constant 0 : i32
    %c0_i32_1 = arith.constant 0 : i32
    return %c0_i32, %c0_i32_0 : i32, i32
  }
  func.func @transform_3(%arg0: i32, %arg1: i32) -> (i32, i32) {
    %c0_i32 = arith.constant 0 : i32
    %c0_i32_0 = arith.constant 0 : i32
    %c0_i32_1 = arith.constant 0 : i32
    return %c0_i32, %c0_i32_0 : i32, i32
  }
  func.func @transform_4(%arg0: i32, %arg1: i32) -> (i32, i32) {
    %c0_i32 = arith.constant 0 : i32
    %c0_i32_0 = arith.constant 0 : i32
    %c0_i32_1 = arith.constant 0 : i32
    return %c0_i32, %c0_i32_0 : i32, i32
  }
  func.func @transform_5(%arg0: i32, %arg1: i32) -> (i32, i32) {
    %c0_i32 = arith.constant 0 : i32
    %c0_i32_0 = arith.constant 0 : i32
    %c0_i32_1 = arith.constant 0 : i32
    return %c0_i32, %c0_i32_0 : i32, i32
  }
  func.func @transform_6(%arg0: i32, %arg1: i32) -> (i32, i32) {
    %c0_i32 = arith.constant 0 : i32
    %c0_i32_0 = arith.constant 0 : i32
    %c0_i32_1 = arith.constant 0 : i32
    return %c0_i32, %c0_i32_0 : i32, i32
  }
  func.func @transform_7(%arg0: i32, %arg1: i32) -> (i32, i32) {
    %c0_i32 = arith.constant 0 : i32
    %c0_i32_0 = arith.constant 0 : i32
    %c0_i32_1 = arith.constant 0 : i32
    return %c0_i32, %c0_i32_0 : i32, i32
  }
  func.func @transform_8(%arg0: i32, %arg1: i32) -> (i32, i32) {
    %c0_i32 = arith.constant 0 : i32
    %c0_i32_0 = arith.constant 0 : i32
    %c0_i32_1 = arith.constant 0 : i32
    return %c0_i32, %c0_i32_0 : i32, i32
  }
  func.func @transform_9(%arg0: i32, %arg1: i32) -> (i32, i32) {
    %c0_i32 = arith.constant 0 : i32
    %c0_i32_0 = arith.constant 0 : i32
    %c0_i32_1 = arith.constant 0 : i32
    return %c0_i32, %c0_i32_0 : i32, i32
  }
  func.func @transform_10(%arg0: i32, %arg1: i32) -> (i32, i32) {
    %c0_i32 = arith.constant 0 : i32
    %c0_i32_0 = arith.constant 0 : i32
    %c0_i32_1 = arith.constant 0 : i32
    return %c0_i32, %c0_i32_0 : i32, i32
  }
  func.func @transform_11(%arg0: i32, %arg1: i32) -> (i32, i32) {
    %c0_i32 = arith.constant 0 : i32
    %c0_i32_0 = arith.constant 0 : i32
    %c0_i32_1 = arith.constant 0 : i32
    return %c0_i32, %c0_i32_0 : i32, i32
  }
  func.func @transform_12(%arg0: i32, %arg1: i32) -> (i32, i32) {
    %c0_i32 = arith.constant 0 : i32
    %c0_i32_0 = arith.constant 0 : i32
    %c0_i32_1 = arith.constant 0 : i32
    return %c0_i32, %c0_i32_0 : i32, i32
  }
  func.func @transform_13(%arg0: i32, %arg1: i32) -> (i32, i32, i32) {
    %c0_i32 = arith.constant 0 : i32
    %c0_i32_0 = arith.constant 0 : i32
    %c0_i32_1 = arith.constant 0 : i32
    return %arg0, %c0_i32, %c0_i32_0 : i32, i32, i32
  }
}

module attributes {stable_mosaic.version = 11 : i64} {
  func.func @block_kernel(%arg0: i32, %arg1: i32, %arg2: memref<1x16x32xf32, #tpu.memory_space<vmem>>, %arg3: memref<32x32xbf16, #tpu.memory_space<vmem>>, %arg4: memref<32x64xbf16, #tpu.memory_space<vmem>>, %arg5: memref<32x32xbf16, #tpu.memory_space<vmem>>, %arg6: memref<1x32xf32, #tpu.memory_space<vmem>>, %arg7: memref<1x32xf32, #tpu.memory_space<vmem>>, %arg8: memref<1x32xf32, #tpu.memory_space<vmem>>, %arg9: memref<1x32xf32, #tpu.memory_space<vmem>>, %arg10: memref<1x32xf32, #tpu.memory_space<vmem>>, %arg11: memref<32x128xbf16, #tpu.memory_space<vmem>>, %arg12: memref<1x128xf32, #tpu.memory_space<vmem>>, %arg13: memref<128x32xbf16, #tpu.memory_space<vmem>>, %arg14: memref<1x32xf32, #tpu.memory_space<vmem>>, %arg15: memref<1x16x32xf32, #tpu.memory_space<vmem>>, %arg16: memref<16x32xbf16, #tpu.memory_space<vmem>>, %arg17: memref<4x16x8xbf16, #tpu.memory_space<vmem>>, %arg18: memref<4x8x8xbf16, #tpu.memory_space<vmem>>, %arg19: memref<4x8x8xbf16, #tpu.memory_space<vmem>>, %arg20: memref<8x64xbf16, #tpu.memory_space<vmem>>, %arg21: memref<16x32xbf16, #tpu.memory_space<vmem>>, %arg22: memref<4x16x1xf32, #tpu.memory_space<vmem>>, %arg23: memref<4x16x1xf32, #tpu.memory_space<vmem>>, %arg24: memref<4x16x8xf32, #tpu.memory_space<vmem>>) attributes {dimension_semantics = [#tpu.dimension_semantics<parallel>, #tpu.dimension_semantics<arbitrary>], iteration_bounds = array<i64: 2, 2>, scalar_prefetch = 0 : i64, scratch_operands = 9 : i64, tpu.core_type = #tpu.core_type<tc>, window_params = [{transform_indices = @transform_0, window_bounds = array<i64: 1, 16, 32>}, {pipeline_mode = #tpu.pipeline_mode<synchronous>, transform_indices = @transform_1, window_bounds = array<i64: 32, 32>}, {pipeline_mode = #tpu.pipeline_mode<synchronous>, transform_indices = @transform_2, window_bounds = array<i64: 32, 64>}, {pipeline_mode = #tpu.pipeline_mode<synchronous>, transform_indices = @transform_3, window_bounds = array<i64: 32, 32>}, {pipeline_mode = #tpu.pipeline_mode<synchronous>, transform_indices = @transform_4, window_bounds = array<i64: 1, 32>}, {pipeline_mode = #tpu.pipeline_mode<synchronous>, transform_indices = @transform_5, window_bounds = array<i64: 1, 32>}, {pipeline_mode = #tpu.pipeline_mode<synchronous>, transform_indices = @transform_6, window_bounds = array<i64: 1, 32>}, {pipeline_mode = #tpu.pipeline_mode<synchronous>, transform_indices = @transform_7, window_bounds = array<i64: 1, 32>}, {pipeline_mode = #tpu.pipeline_mode<synchronous>, transform_indices = @transform_8, window_bounds = array<i64: 1, 32>}, {pipeline_mode = #tpu.pipeline_mode<synchronous>, transform_indices = @transform_9, window_bounds = array<i64: 32, 128>}, {pipeline_mode = #tpu.pipeline_mode<synchronous>, transform_indices = @transform_10, window_bounds = array<i64: 1, 128>}, {pipeline_mode = #tpu.pipeline_mode<synchronous>, transform_indices = @transform_11, window_bounds = array<i64: 128, 32>}, {pipeline_mode = #tpu.pipeline_mode<synchronous>, transform_indices = @transform_12, window_bounds = array<i64: 1, 32>}, {transform_indices = @transform_13, window_bounds = array<i64: 1, 16, 32>}]} {
    %c0_i32 = arith.constant 0 : i32
    %0 = arith.cmpi eq, %arg1, %c0_i32 : i32
    %1 = arith.extui %0 : i1 to i32
    %c0_i32_0 = arith.constant 0 : i32
    %2 = arith.cmpi ne, %1, %c0_i32_0 : i32
    scf.if %2 {
      %c0_69 = arith.constant 0 : index
      %c0_70 = arith.constant 0 : index
      %c0_71 = arith.constant 0 : index
      %84 = vector.load %arg2[%c0_69, %c0_70, %c0_71] : memref<1x16x32xf32, #tpu.memory_space<vmem>>, vector<1x16x32xf32>
      %85 = vector.shape_cast %84 : vector<1x16x32xf32> to vector<16x32xf32>
      %c0_72 = arith.constant 0 : index
      %c0_73 = arith.constant 0 : index
      %86 = vector.load %arg7[%c0_72, %c0_73] : memref<1x32xf32, #tpu.memory_space<vmem>>, vector<1x32xf32>
      %87 = vector.shape_cast %86 : vector<1x32xf32> to vector<32xf32>
      %c0_74 = arith.constant 0 : index
      %c0_75 = arith.constant 0 : index
      %88 = vector.load %arg8[%c0_74, %c0_75] : memref<1x32xf32, #tpu.memory_space<vmem>>, vector<1x32xf32>
      %89 = vector.shape_cast %88 : vector<1x32xf32> to vector<32xf32>
      %cst_76 = arith.constant dense<0.000000e+00> : vector<16xf32>
      %90 = vector.multi_reduction <add>, %85, %cst_76 [1] : vector<16x32xf32> to vector<16xf32>
      %91 = vector.shape_cast %90 : vector<16xf32> to vector<16x1xf32>
      %cst_77 = arith.constant 3.200000e+01 : f32
      %92 = vector.broadcast %cst_77 : f32 to vector<16x1xf32>
      %93 = arith.divf %91, %92 : vector<16x1xf32>
      %94 = vector.broadcast %93 : vector<16x1xf32> to vector<16x32xf32>
      %95 = arith.subf %85, %94 : vector<16x32xf32>
      %96 = arith.mulf %95, %95 : vector<16x32xf32>
      %cst_78 = arith.constant dense<0.000000e+00> : vector<16xf32>
      %97 = vector.multi_reduction <add>, %96, %cst_78 [1] : vector<16x32xf32> to vector<16xf32>
      %98 = vector.shape_cast %97 : vector<16xf32> to vector<16x1xf32>
      %cst_79 = arith.constant 3.200000e+01 : f32
      %99 = vector.broadcast %cst_79 : f32 to vector<16x1xf32>
      %100 = arith.divf %98, %99 : vector<16x1xf32>
      %101 = vector.broadcast %93 : vector<16x1xf32> to vector<16x32xf32>
      %102 = arith.subf %85, %101 : vector<16x32xf32>
      %cst_80 = arith.constant 9.99999974E-6 : f32
      %103 = vector.broadcast %cst_80 : f32 to vector<16x1xf32>
      %104 = arith.addf %100, %103 : vector<16x1xf32>
      %105 = math.rsqrt %104 : vector<16x1xf32>
      %106 = vector.broadcast %105 : vector<16x1xf32> to vector<16x32xf32>
      %107 = arith.mulf %102, %106 : vector<16x32xf32>
      %108 = vector.shape_cast %87 : vector<32xf32> to vector<1x32xf32>
      %109 = vector.broadcast %108 : vector<1x32xf32> to vector<16x32xf32>
      %110 = arith.mulf %107, %109 : vector<16x32xf32>
      %111 = vector.shape_cast %89 : vector<32xf32> to vector<1x32xf32>
      %112 = vector.broadcast %111 : vector<1x32xf32> to vector<16x32xf32>
      %113 = arith.addf %110, %112 : vector<16x32xf32>
      %114 = arith.truncf %113 : vector<16x32xf32> to vector<16x32xbf16>
      %c0_81 = arith.constant 0 : index
      %c0_82 = arith.constant 0 : index
      %115 = vector.load %arg16[%c0_81, %c0_82] : memref<16x32xbf16, #tpu.memory_space<vmem>>, vector<16x32xbf16>
      tpu.vector_store %arg16[%c0_81, %c0_82], %114 {strides = array<i32>} : memref<16x32xbf16, #tpu.memory_space<vmem>>, vector<16x32xbf16>,
      %c0_83 = arith.constant 0 : index
      %c0_84 = arith.constant 0 : index
      %116 = vector.load %arg3[%c0_83, %c0_84] : memref<32x32xbf16, #tpu.memory_space<vmem>>, vector<32x32xbf16>
      %cst_85 = arith.constant dense<0.000000e+00> : vector<16x32xf32>
      %117 = tpu.matmul %114, %116, %cst_85 {dimension_numbers = #tpu.dot_dimension_numbers<[1], [0], [0], [1], [0, 0, 1, 1], [], []>} : vector<16x32xbf16>, vector<32x32xbf16>, vector<16x32xf32> -> vector<16x32xf32>
      %118 = arith.truncf %117 : vector<16x32xf32> to vector<16x32xbf16>
      %c0_86 = arith.constant 0 : index
      %c0_87 = arith.constant 0 : index
      %119 = vector.load %arg21[%c0_86, %c0_87] : memref<16x32xbf16, #tpu.memory_space<vmem>>, vector<16x32xbf16>
      tpu.vector_store %arg21[%c0_86, %c0_87], %118 {strides = array<i32>} : memref<16x32xbf16, #tpu.memory_space<vmem>>, vector<16x32xbf16>,
      %c0_88 = arith.constant 0 : index
      %c0_89 = arith.constant 0 : index
      %120 = vector.load %arg21[%c0_88, %c0_89] : memref<16x32xbf16, #tpu.memory_space<vmem>>, vector<16x8xbf16>
      %c0_90 = arith.constant 0 : index
      %c0_91 = arith.constant 0 : index
      %c0_92 = arith.constant 0 : index
      %121 = vector.load %arg17[%c0_90, %c0_91, %c0_92] : memref<4x16x8xbf16, #tpu.memory_space<vmem>>, vector<1x16x8xbf16>
      %122 = vector.shape_cast %121 : vector<1x16x8xbf16> to vector<16x8xbf16>
      %123 = vector.shape_cast %120 : vector<16x8xbf16> to vector<1x16x8xbf16>
      tpu.vector_store %arg17[%c0_90, %c0_91, %c0_92], %123 {strides = array<i32>} : memref<4x16x8xbf16, #tpu.memory_space<vmem>>, vector<1x16x8xbf16>,
      %c0_93 = arith.constant 0 : index
      %c8_94 = arith.constant 8 : index
      %124 = vector.load %arg21[%c0_93, %c8_94] : memref<16x32xbf16, #tpu.memory_space<vmem>>, vector<16x8xbf16>
      %c1_95 = arith.constant 1 : index
      %c0_96 = arith.constant 0 : index
      %c0_97 = arith.constant 0 : index
      %125 = vector.load %arg17[%c1_95, %c0_96, %c0_97] : memref<4x16x8xbf16, #tpu.memory_space<vmem>>, vector<1x16x8xbf16>
      %126 = vector.shape_cast %125 : vector<1x16x8xbf16> to vector<16x8xbf16>
      %127 = vector.shape_cast %124 : vector<16x8xbf16> to vector<1x16x8xbf16>
      tpu.vector_store %arg17[%c1_95, %c0_96, %c0_97], %127 {strides = array<i32>} : memref<4x16x8xbf16, #tpu.memory_space<vmem>>, vector<1x16x8xbf16>,
      %c0_98 = arith.constant 0 : index
      %c16_99 = arith.constant 16 : index
      %128 = vector.load %arg21[%c0_98, %c16_99] : memref<16x32xbf16, #tpu.memory_space<vmem>>, vector<16x8xbf16>
      %c2_100 = arith.constant 2 : index
      %c0_101 = arith.constant 0 : index
      %c0_102 = arith.constant 0 : index
      %129 = vector.load %arg17[%c2_100, %c0_101, %c0_102] : memref<4x16x8xbf16, #tpu.memory_space<vmem>>, vector<1x16x8xbf16>
      %130 = vector.shape_cast %129 : vector<1x16x8xbf16> to vector<16x8xbf16>
      %131 = vector.shape_cast %128 : vector<16x8xbf16> to vector<1x16x8xbf16>
      tpu.vector_store %arg17[%c2_100, %c0_101, %c0_102], %131 {strides = array<i32>} : memref<4x16x8xbf16, #tpu.memory_space<vmem>>, vector<1x16x8xbf16>,
      %c0_103 = arith.constant 0 : index
      %c24_104 = arith.constant 24 : index
      %132 = vector.load %arg21[%c0_103, %c24_104] : memref<16x32xbf16, #tpu.memory_space<vmem>>, vector<16x8xbf16>
      %c3_105 = arith.constant 3 : index
      %c0_106 = arith.constant 0 : index
      %c0_107 = arith.constant 0 : index
      %133 = vector.load %arg17[%c3_105, %c0_106, %c0_107] : memref<4x16x8xbf16, #tpu.memory_space<vmem>>, vector<1x16x8xbf16>
      %134 = vector.shape_cast %133 : vector<1x16x8xbf16> to vector<16x8xbf16>
      %135 = vector.shape_cast %132 : vector<16x8xbf16> to vector<1x16x8xbf16>
      tpu.vector_store %arg17[%c3_105, %c0_106, %c0_107], %135 {strides = array<i32>} : memref<4x16x8xbf16, #tpu.memory_space<vmem>>, vector<1x16x8xbf16>,
      %cst_108 = arith.constant -1.000000e+30 : f32
      %136 = vector.broadcast %cst_108 : f32 to vector<4x16x1xf32>
      %c0_109 = arith.constant 0 : index
      %c0_110 = arith.constant 0 : index
      %c0_111 = arith.constant 0 : index
      %137 = vector.load %arg22[%c0_109, %c0_110, %c0_111] : memref<4x16x1xf32, #tpu.memory_space<vmem>>, vector<4x16x1xf32>
      tpu.vector_store %arg22[%c0_109, %c0_110, %c0_111], %136 {strides = array<i32>} : memref<4x16x1xf32, #tpu.memory_space<vmem>>, vector<4x16x1xf32>,
      %cst_112 = arith.constant 0.000000e+00 : f32
      %138 = vector.broadcast %cst_112 : f32 to vector<4x16x1xf32>
      %c0_113 = arith.constant 0 : index
      %c0_114 = arith.constant 0 : index
      %c0_115 = arith.constant 0 : index
      %139 = vector.load %arg23[%c0_113, %c0_114, %c0_115] : memref<4x16x1xf32, #tpu.memory_space<vmem>>, vector<4x16x1xf32>
      tpu.vector_store %arg23[%c0_113, %c0_114, %c0_115], %138 {strides = array<i32>} : memref<4x16x1xf32, #tpu.memory_space<vmem>>, vector<4x16x1xf32>,
      %cst_116 = arith.constant 0.000000e+00 : f32
      %140 = vector.broadcast %cst_116 : f32 to vector<4x16x8xf32>
      %c0_117 = arith.constant 0 : index
      %c0_118 = arith.constant 0 : index
      %c0_119 = arith.constant 0 : index
      %141 = vector.load %arg24[%c0_117, %c0_118, %c0_119] : memref<4x16x8xf32, #tpu.memory_space<vmem>>, vector<4x16x8xf32>
      tpu.vector_store %arg24[%c0_117, %c0_118, %c0_119], %140 {strides = array<i32>} : memref<4x16x8xf32, #tpu.memory_space<vmem>>, vector<4x16x8xf32>,
    } else {
    }
    %c8_i32 = arith.constant 8 : i32
    %3 = arith.muli %arg1, %c8_i32 : i32
    %4 = tpu.assume_multiple %3, 8 : i32
    %5 = arith.index_cast %4 : i32 to index
    %c0 = arith.constant 0 : index
    %6 = vector.load %arg16[%5, %c0] : memref<16x32xbf16, #tpu.memory_space<vmem>>, vector<8x32xbf16>
    %c0_1 = arith.constant 0 : index
    %c0_2 = arith.constant 0 : index
    %7 = vector.load %arg4[%c0_1, %c0_2] : memref<32x64xbf16, #tpu.memory_space<vmem>>, vector<32x64xbf16>
    %cst = arith.constant dense<0.000000e+00> : vector<8x64xf32>
    %8 = tpu.matmul %6, %7, %cst {dimension_numbers = #tpu.dot_dimension_numbers<[1], [0], [0], [1], [0, 0, 1, 1], [], []>} : vector<8x32xbf16>, vector<32x64xbf16>, vector<8x64xf32> -> vector<8x64xf32>
    %9 = arith.truncf %8 : vector<8x64xf32> to vector<8x64xbf16>
    %c0_3 = arith.constant 0 : index
    %c0_4 = arith.constant 0 : index
    %10 = vector.load %arg20[%c0_3, %c0_4] : memref<8x64xbf16, #tpu.memory_space<vmem>>, vector<8x64xbf16>
    tpu.vector_store %arg20[%c0_3, %c0_4], %9 {strides = array<i32>} : memref<8x64xbf16, #tpu.memory_space<vmem>>, vector<8x64xbf16>,
    %c0_5 = arith.constant 0 : index
    %c0_6 = arith.constant 0 : index
    %11 = vector.load %arg20[%c0_5, %c0_6] : memref<8x64xbf16, #tpu.memory_space<vmem>>, vector<8x8xbf16>
    %c0_7 = arith.constant 0 : index
    %c0_8 = arith.constant 0 : index
    %c0_9 = arith.constant 0 : index
    %12 = vector.load %arg18[%c0_7, %c0_8, %c0_9] : memref<4x8x8xbf16, #tpu.memory_space<vmem>>, vector<1x8x8xbf16>
    %13 = vector.shape_cast %12 : vector<1x8x8xbf16> to vector<8x8xbf16>
    %14 = vector.shape_cast %11 : vector<8x8xbf16> to vector<1x8x8xbf16>
    tpu.vector_store %arg18[%c0_7, %c0_8, %c0_9], %14 {strides = array<i32>} : memref<4x8x8xbf16, #tpu.memory_space<vmem>>, vector<1x8x8xbf16>,
    %c0_10 = arith.constant 0 : index
    %c32 = arith.constant 32 : index
    %15 = vector.load %arg20[%c0_10, %c32] : memref<8x64xbf16, #tpu.memory_space<vmem>>, vector<8x8xbf16>
    %c0_11 = arith.constant 0 : index
    %c0_12 = arith.constant 0 : index
    %c0_13 = arith.constant 0 : index
    %16 = vector.load %arg19[%c0_11, %c0_12, %c0_13] : memref<4x8x8xbf16, #tpu.memory_space<vmem>>, vector<1x8x8xbf16>
    %17 = vector.shape_cast %16 : vector<1x8x8xbf16> to vector<8x8xbf16>
    %18 = vector.shape_cast %15 : vector<8x8xbf16> to vector<1x8x8xbf16>
    tpu.vector_store %arg19[%c0_11, %c0_12, %c0_13], %18 {strides = array<i32>} : memref<4x8x8xbf16, #tpu.memory_space<vmem>>, vector<1x8x8xbf16>,
    %c0_14 = arith.constant 0 : index
    %c8 = arith.constant 8 : index
    %19 = vector.load %arg20[%c0_14, %c8] : memref<8x64xbf16, #tpu.memory_space<vmem>>, vector<8x8xbf16>
    %c1 = arith.constant 1 : index
    %c0_15 = arith.constant 0 : index
    %c0_16 = arith.constant 0 : index
    %20 = vector.load %arg18[%c1, %c0_15, %c0_16] : memref<4x8x8xbf16, #tpu.memory_space<vmem>>, vector<1x8x8xbf16>
    %21 = vector.shape_cast %20 : vector<1x8x8xbf16> to vector<8x8xbf16>
    %22 = vector.shape_cast %19 : vector<8x8xbf16> to vector<1x8x8xbf16>
    tpu.vector_store %arg18[%c1, %c0_15, %c0_16], %22 {strides = array<i32>} : memref<4x8x8xbf16, #tpu.memory_space<vmem>>, vector<1x8x8xbf16>,
    %c0_17 = arith.constant 0 : index
    %c40 = arith.constant 40 : index
    %23 = vector.load %arg20[%c0_17, %c40] : memref<8x64xbf16, #tpu.memory_space<vmem>>, vector<8x8xbf16>
    %c1_18 = arith.constant 1 : index
    %c0_19 = arith.constant 0 : index
    %c0_20 = arith.constant 0 : index
    %24 = vector.load %arg19[%c1_18, %c0_19, %c0_20] : memref<4x8x8xbf16, #tpu.memory_space<vmem>>, vector<1x8x8xbf16>
    %25 = vector.shape_cast %24 : vector<1x8x8xbf16> to vector<8x8xbf16>
    %26 = vector.shape_cast %23 : vector<8x8xbf16> to vector<1x8x8xbf16>
    tpu.vector_store %arg19[%c1_18, %c0_19, %c0_20], %26 {strides = array<i32>} : memref<4x8x8xbf16, #tpu.memory_space<vmem>>, vector<1x8x8xbf16>,
    %c0_21 = arith.constant 0 : index
    %c16 = arith.constant 16 : index
    %27 = vector.load %arg20[%c0_21, %c16] : memref<8x64xbf16, #tpu.memory_space<vmem>>, vector<8x8xbf16>
    %c2 = arith.constant 2 : index
    %c0_22 = arith.constant 0 : index
    %c0_23 = arith.constant 0 : index
    %28 = vector.load %arg18[%c2, %c0_22, %c0_23] : memref<4x8x8xbf16, #tpu.memory_space<vmem>>, vector<1x8x8xbf16>
    %29 = vector.shape_cast %28 : vector<1x8x8xbf16> to vector<8x8xbf16>
    %30 = vector.shape_cast %27 : vector<8x8xbf16> to vector<1x8x8xbf16>
    tpu.vector_store %arg18[%c2, %c0_22, %c0_23], %30 {strides = array<i32>} : memref<4x8x8xbf16, #tpu.memory_space<vmem>>, vector<1x8x8xbf16>,
    %c0_24 = arith.constant 0 : index
    %c48 = arith.constant 48 : index
    %31 = vector.load %arg20[%c0_24, %c48] : memref<8x64xbf16, #tpu.memory_space<vmem>>, vector<8x8xbf16>
    %c2_25 = arith.constant 2 : index
    %c0_26 = arith.constant 0 : index
    %c0_27 = arith.constant 0 : index
    %32 = vector.load %arg19[%c2_25, %c0_26, %c0_27] : memref<4x8x8xbf16, #tpu.memory_space<vmem>>, vector<1x8x8xbf16>
    %33 = vector.shape_cast %32 : vector<1x8x8xbf16> to vector<8x8xbf16>
    %34 = vector.shape_cast %31 : vector<8x8xbf16> to vector<1x8x8xbf16>
    tpu.vector_store %arg19[%c2_25, %c0_26, %c0_27], %34 {strides = array<i32>} : memref<4x8x8xbf16, #tpu.memory_space<vmem>>, vector<1x8x8xbf16>,
    %c0_28 = arith.constant 0 : index
    %c24 = arith.constant 24 : index
    %35 = vector.load %arg20[%c0_28, %c24] : memref<8x64xbf16, #tpu.memory_space<vmem>>, vector<8x8xbf16>
    %c3 = arith.constant 3 : index
    %c0_29 = arith.constant 0 : index
    %c0_30 = arith.constant 0 : index
    %36 = vector.load %arg18[%c3, %c0_29, %c0_30] : memref<4x8x8xbf16, #tpu.memory_space<vmem>>, vector<1x8x8xbf16>
    %37 = vector.shape_cast %36 : vector<1x8x8xbf16> to vector<8x8xbf16>
    %38 = vector.shape_cast %35 : vector<8x8xbf16> to vector<1x8x8xbf16>
    tpu.vector_store %arg18[%c3, %c0_29, %c0_30], %38 {strides = array<i32>} : memref<4x8x8xbf16, #tpu.memory_space<vmem>>, vector<1x8x8xbf16>,
    %c0_31 = arith.constant 0 : index
    %c56 = arith.constant 56 : index
    %39 = vector.load %arg20[%c0_31, %c56] : memref<8x64xbf16, #tpu.memory_space<vmem>>, vector<8x8xbf16>
    %c3_32 = arith.constant 3 : index
    %c0_33 = arith.constant 0 : index
    %c0_34 = arith.constant 0 : index
    %40 = vector.load %arg19[%c3_32, %c0_33, %c0_34] : memref<4x8x8xbf16, #tpu.memory_space<vmem>>, vector<1x8x8xbf16>
    %41 = vector.shape_cast %40 : vector<1x8x8xbf16> to vector<8x8xbf16>
    %42 = vector.shape_cast %39 : vector<8x8xbf16> to vector<1x8x8xbf16>
    tpu.vector_store %arg19[%c3_32, %c0_33, %c0_34], %42 {strides = array<i32>} : memref<4x8x8xbf16, #tpu.memory_space<vmem>>, vector<1x8x8xbf16>,
    %c0_35 = arith.constant 0 : index
    %c0_36 = arith.constant 0 : index
    %c0_37 = arith.constant 0 : index
    %43 = vector.load %arg17[%c0_35, %c0_36, %c0_37] : memref<4x16x8xbf16, #tpu.memory_space<vmem>>, vector<4x16x8xbf16>
    %c0_38 = arith.constant 0 : index
    %c0_39 = arith.constant 0 : index
    %c0_40 = arith.constant 0 : index
    %44 = vector.load %arg18[%c0_38, %c0_39, %c0_40] : memref<4x8x8xbf16, #tpu.memory_space<vmem>>, vector<4x8x8xbf16>
    "tpu.trace_start"() <{level = 10 : i32, message = "hqd,hkd->hqk"}> : () -> ()
    %cst_41 = arith.constant dense<0.000000e+00> : vector<4x16x8xf32>
    %45 = tpu.matmul %43, %44, %cst_41 {dimension_numbers = #tpu.dot_dimension_numbers<[2], [2], [1], [1], [0, 0, 0, 1, 1, 1], [0], [0]>} : vector<4x16x8xbf16>, vector<4x8x8xbf16>, vector<4x16x8xf32> -> vector<4x16x8xf32>
    "tpu.trace_stop"() : () -> ()
    %46 = tpu.iota {dimensions = array<i32: 0>} : vector<16x8xi32>
    %47 = tpu.iota {dimensions = array<i32: 1>} : vector<16x8xi32>
    %c8_i32_42 = arith.constant 8 : i32
    %48 = arith.muli %arg1, %c8_i32_42 : i32
    %49 = vector.broadcast %48 : i32 to vector<16x8xi32>
    %50 = arith.addi %47, %49 : vector<16x8xi32>
    %51 = arith.cmpi sge, %46, %50 : vector<16x8xi32>
    %c0_43 = arith.constant 0 : index
    %c0_44 = arith.constant 0 : index
    %c0_45 = arith.constant 0 : index
    %52 = vector.load %arg22[%c0_43, %c0_44, %c0_45] : memref<4x16x1xf32, #tpu.memory_space<vmem>>, vector<4x16x1xf32>
    %cst_46 = arith.constant dense<0xFF800000> : vector<4x16xf32>
    %53 = vector.multi_reduction <maximumf>, %45, %cst_46 [2] : vector<4x16x8xf32> to vector<4x16xf32>
    %54 = vector.shape_cast %53 : vector<4x16xf32> to vector<4x16x1xf32>
    %55 = arith.maximumf %52, %54 : vector<4x16x1xf32>
    %56 = arith.subf %52, %55 : vector<4x16x1xf32>
    %57 = math.exp %56 : vector<4x16x1xf32>
    %58 = vector.shape_cast %51 : vector<16x8xi1> to vector<1x16x8xi1>
    %59 = vector.broadcast %55 : vector<4x16x1xf32> to vector<4x16x8xf32>
    %60 = arith.subf %45, %59 : vector<4x16x8xf32>
    %61 = math.exp %60 : vector<4x16x8xf32>
    %cst_47 = arith.constant 0.000000e+00 : f32
    %62 = vector.shape_cast %58 : vector<1x16x8xi1> to vector<1x16x8xi1>
    %63 = vector.broadcast %62 : vector<1x16x8xi1> to vector<4x16x8xi1>
    %64 = vector.broadcast %cst_47 : f32 to vector<4x16x8xf32>
    %65 = arith.select %63, %61, %64 : vector<4x16x8xi1>, vector<4x16x8xf32>
    %c0_48 = arith.constant 0 : index
    %c0_49 = arith.constant 0 : index
    %c0_50 = arith.constant 0 : index
    %66 = vector.load %arg23[%c0_48, %c0_49, %c0_50] : memref<4x16x1xf32, #tpu.memory_space<vmem>>, vector<4x16x1xf32>
    %67 = arith.mulf %57, %66 : vector<4x16x1xf32>
    %cst_51 = arith.constant dense<0.000000e+00> : vector<4x16xf32>
    %68 = vector.multi_reduction <add>, %65, %cst_51 [2] : vector<4x16x8xf32> to vector<4x16xf32>
    %69 = vector.shape_cast %68 : vector<4x16xf32> to vector<4x16x1xf32>
    %70 = arith.addf %67, %69 : vector<4x16x1xf32>
    %c0_52 = arith.constant 0 : index
    %c0_53 = arith.constant 0 : index
    %c0_54 = arith.constant 0 : index
    %71 = vector.load %arg23[%c0_52, %c0_53, %c0_54] : memref<4x16x1xf32, #tpu.memory_space<vmem>>, vector<4x16x1xf32>
    tpu.vector_store %arg23[%c0_52, %c0_53, %c0_54], %70 {strides = array<i32>} : memref<4x16x1xf32, #tpu.memory_space<vmem>>, vector<4x16x1xf32>,
    %c0_55 = arith.constant 0 : index
    %c0_56 = arith.constant 0 : index
    %c0_57 = arith.constant 0 : index
    %72 = vector.load %arg24[%c0_55, %c0_56, %c0_57] : memref<4x16x8xf32, #tpu.memory_space<vmem>>, vector<4x16x8xf32>
    %73 = vector.broadcast %57 : vector<4x16x1xf32> to vector<4x16x8xf32>
    %74 = arith.mulf %73, %72 : vector<4x16x8xf32>
    %75 = arith.truncf %65 : vector<4x16x8xf32> to vector<4x16x8xbf16>
    %c0_58 = arith.constant 0 : index
    %c0_59 = arith.constant 0 : index
    %c0_60 = arith.constant 0 : index
    %76 = vector.load %arg19[%c0_58, %c0_59, %c0_60] : memref<4x8x8xbf16, #tpu.memory_space<vmem>>, vector<4x8x8xbf16>
    "tpu.trace_start"() <{level = 10 : i32, message = "hqk,hkd->hqd"}> : () -> ()
    %cst_61 = arith.constant dense<0.000000e+00> : vector<4x16x8xf32>
    %77 = tpu.matmul %75, %76, %cst_61 {dimension_numbers = #tpu.dot_dimension_numbers<[2], [1], [1], [2], [0, 0, 0, 1, 1, 2], [0], [0]>} : vector<4x16x8xbf16>, vector<4x8x8xbf16>, vector<4x16x8xf32> -> vector<4x16x8xf32>
    "tpu.trace_stop"() : () -> ()
    %78 = arith.addf %74, %77 : vector<4x16x8xf32>
    %c0_62 = arith.constant 0 : index
    %c0_63 = arith.constant 0 : index
    %c0_64 = arith.constant 0 : index
    %79 = vector.load %arg24[%c0_62, %c0_63, %c0_64] : memref<4x16x8xf32, #tpu.memory_space<vmem>>, vector<4x16x8xf32>
    tpu.vector_store %arg24[%c0_62, %c0_63, %c0_64], %78 {strides = array<i32>} : memref<4x16x8xf32, #tpu.memory_space<vmem>>, vector<4x16x8xf32>,
    %c0_65 = arith.constant 0 : index
    %c0_66 = arith.constant 0 : index
    %c0_67 = arith.constant 0 : index
    %80 = vector.load %arg22[%c0_65, %c0_66, %c0_67] : memref<4x16x1xf32, #tpu.memory_space<vmem>>, vector<4x16x1xf32>
    tpu.vector_store %arg22[%c0_65, %c0_66, %c0_67], %55 {strides = array<i32>} : memref<4x16x1xf32, #tpu.memory_space<vmem>>, vector<4x16x1xf32>,
    %c1_i32 = arith.constant 1 : i32
    %81 = arith.cmpi eq, %arg1, %c1_i32 : i32
    %82 = arith.extui %81 : i1 to i32
    %c0_i32_68 = arith.constant 0 : i32
    %83 = arith.cmpi ne, %82, %c0_i32_68 : i32
    scf.if %83 {
      %c0_69 = arith.constant 0 : index
      %c0_70 = arith.constant 0 : index
      %c0_71 = arith.constant 0 : index
      %84 = vector.load %arg2[%c0_69, %c0_70, %c0_71] : memref<1x16x32xf32, #tpu.memory_space<vmem>>, vector<1x16x32xf32>
      %85 = vector.shape_cast %84 : vector<1x16x32xf32> to vector<16x32xf32>
      %c0_72 = arith.constant 0 : index
      %c0_73 = arith.constant 0 : index
      %c0_74 = arith.constant 0 : index
      %86 = vector.load %arg24[%c0_72, %c0_73, %c0_74] : memref<4x16x8xf32, #tpu.memory_space<vmem>>, vector<1x16x8xf32>
      %87 = vector.shape_cast %86 : vector<1x16x8xf32> to vector<16x8xf32>
      %c0_75 = arith.constant 0 : index
      %c0_76 = arith.constant 0 : index
      %c0_77 = arith.constant 0 : index
      %88 = vector.load %arg23[%c0_75, %c0_76, %c0_77] : memref<4x16x1xf32, #tpu.memory_space<vmem>>, vector<1x16x1xf32>
      %89 = vector.shape_cast %88 : vector<1x16x1xf32> to vector<16x1xf32>
      %90 = tpu.reciprocal %89 {approx = true} : vector<16x1xf32> -> vector<16x1xf32>
      %91 = vector.broadcast %90 : vector<16x1xf32> to vector<16x8xf32>
      %92 = arith.mulf %87, %91 : vector<16x8xf32>
      %93 = arith.truncf %92 : vector<16x8xf32> to vector<16x8xbf16>
      %c0_78 = arith.constant 0 : index
      %c0_79 = arith.constant 0 : index
      %94 = vector.load %arg21[%c0_78, %c0_79] : memref<16x32xbf16, #tpu.memory_space<vmem>>, vector<16x8xbf16>
      tpu.vector_store %arg21[%c0_78, %c0_79], %93 {strides = array<i32>} : memref<16x32xbf16, #tpu.memory_space<vmem>>, vector<16x8xbf16>,
      %c1_80 = arith.constant 1 : index
      %c0_81 = arith.constant 0 : index
      %c0_82 = arith.constant 0 : index
      %95 = vector.load %arg24[%c1_80, %c0_81, %c0_82] : memref<4x16x8xf32, #tpu.memory_space<vmem>>, vector<1x16x8xf32>
      %96 = vector.shape_cast %95 : vector<1x16x8xf32> to vector<16x8xf32>
      %c1_83 = arith.constant 1 : index
      %c0_84 = arith.constant 0 : index
      %c0_85 = arith.constant 0 : index
      %97 = vector.load %arg23[%c1_83, %c0_84, %c0_85] : memref<4x16x1xf32, #tpu.memory_space<vmem>>, vector<1x16x1xf32>
      %98 = vector.shape_cast %97 : vector<1x16x1xf32> to vector<16x1xf32>
      %99 = tpu.reciprocal %98 {approx = true} : vector<16x1xf32> -> vector<16x1xf32>
      %100 = vector.broadcast %99 : vector<16x1xf32> to vector<16x8xf32>
      %101 = arith.mulf %96, %100 : vector<16x8xf32>
      %102 = arith.truncf %101 : vector<16x8xf32> to vector<16x8xbf16>
      %c0_86 = arith.constant 0 : index
      %c8_87 = arith.constant 8 : index
      %103 = vector.load %arg21[%c0_86, %c8_87] : memref<16x32xbf16, #tpu.memory_space<vmem>>, vector<16x8xbf16>
      tpu.vector_store %arg21[%c0_86, %c8_87], %102 {strides = array<i32>} : memref<16x32xbf16, #tpu.memory_space<vmem>>, vector<16x8xbf16>,
      %c2_88 = arith.constant 2 : index
      %c0_89 = arith.constant 0 : index
      %c0_90 = arith.constant 0 : index
      %104 = vector.load %arg24[%c2_88, %c0_89, %c0_90] : memref<4x16x8xf32, #tpu.memory_space<vmem>>, vector<1x16x8xf32>
      %105 = vector.shape_cast %104 : vector<1x16x8xf32> to vector<16x8xf32>
      %c2_91 = arith.constant 2 : index
      %c0_92 = arith.constant 0 : index
      %c0_93 = arith.constant 0 : index
      %106 = vector.load %arg23[%c2_91, %c0_92, %c0_93] : memref<4x16x1xf32, #tpu.memory_space<vmem>>, vector<1x16x1xf32>
      %107 = vector.shape_cast %106 : vector<1x16x1xf32> to vector<16x1xf32>
      %108 = tpu.reciprocal %107 {approx = true} : vector<16x1xf32> -> vector<16x1xf32>
      %109 = vector.broadcast %108 : vector<16x1xf32> to vector<16x8xf32>
      %110 = arith.mulf %105, %109 : vector<16x8xf32>
      %111 = arith.truncf %110 : vector<16x8xf32> to vector<16x8xbf16>
      %c0_94 = arith.constant 0 : index
      %c16_95 = arith.constant 16 : index
      %112 = vector.load %arg21[%c0_94, %c16_95] : memref<16x32xbf16, #tpu.memory_space<vmem>>, vector<16x8xbf16>
      tpu.vector_store %arg21[%c0_94, %c16_95], %111 {strides = array<i32>} : memref<16x32xbf16, #tpu.memory_space<vmem>>, vector<16x8xbf16>,
      %c3_96 = arith.constant 3 : index
      %c0_97 = arith.constant 0 : index
      %c0_98 = arith.constant 0 : index
      %113 = vector.load %arg24[%c3_96, %c0_97, %c0_98] : memref<4x16x8xf32, #tpu.memory_space<vmem>>, vector<1x16x8xf32>
      %114 = vector.shape_cast %113 : vector<1x16x8xf32> to vector<16x8xf32>
      %c3_99 = arith.constant 3 : index
      %c0_100 = arith.constant 0 : index
      %c0_101 = arith.constant 0 : index
      %115 = vector.load %arg23[%c3_99, %c0_100, %c0_101] : memref<4x16x1xf32, #tpu.memory_space<vmem>>, vector<1x16x1xf32>
      %116 = vector.shape_cast %115 : vector<1x16x1xf32> to vector<16x1xf32>
      %117 = tpu.reciprocal %116 {approx = true} : vector<16x1xf32> -> vector<16x1xf32>
      %118 = vector.broadcast %117 : vector<16x1xf32> to vector<16x8xf32>
      %119 = arith.mulf %114, %118 : vector<16x8xf32>
      %120 = arith.truncf %119 : vector<16x8xf32> to vector<16x8xbf16>
      %c0_102 = arith.constant 0 : index
      %c24_103 = arith.constant 24 : index
      %121 = vector.load %arg21[%c0_102, %c24_103] : memref<16x32xbf16, #tpu.memory_space<vmem>>, vector<16x8xbf16>
      tpu.vector_store %arg21[%c0_102, %c24_103], %120 {strides = array<i32>} : memref<16x32xbf16, #tpu.memory_space<vmem>>, vector<16x8xbf16>,
      %c0_104 = arith.constant 0 : index
      %c0_105 = arith.constant 0 : index
      %122 = vector.load %arg21[%c0_104, %c0_105] : memref<16x32xbf16, #tpu.memory_space<vmem>>, vector<16x32xbf16>
      %c0_106 = arith.constant 0 : index
      %c0_107 = arith.constant 0 : index
      %123 = vector.load %arg5[%c0_106, %c0_107] : memref<32x32xbf16, #tpu.memory_space<vmem>>, vector<32x32xbf16>
      %cst_108 = arith.constant dense<0.000000e+00> : vector<16x32xf32>
      %124 = tpu.matmul %122, %123, %cst_108 {dimension_numbers = #tpu.dot_dimension_numbers<[1], [0], [0], [1], [0, 0, 1, 1], [], []>} : vector<16x32xbf16>, vector<32x32xbf16>, vector<16x32xf32> -> vector<16x32xf32>
      %c0_109 = arith.constant 0 : index
      %c0_110 = arith.constant 0 : index
      %125 = vector.load %arg6[%c0_109, %c0_110] : memref<1x32xf32, #tpu.memory_space<vmem>>, vector<1x32xf32>
      %126 = vector.shape_cast %125 : vector<1x32xf32> to vector<32xf32>
      %127 = vector.shape_cast %126 : vector<32xf32> to vector<1x32xf32>
      %128 = vector.broadcast %127 : vector<1x32xf32> to vector<16x32xf32>
      %129 = arith.addf %124, %128 : vector<16x32xf32>
      %130 = arith.addf %85, %129 : vector<16x32xf32>
      %c0_111 = arith.constant 0 : index
      %c0_112 = arith.constant 0 : index
      %131 = vector.load %arg9[%c0_111, %c0_112] : memref<1x32xf32, #tpu.memory_space<vmem>>, vector<1x32xf32>
      %132 = vector.shape_cast %131 : vector<1x32xf32> to vector<32xf32>
      %c0_113 = arith.constant 0 : index
      %c0_114 = arith.constant 0 : index
      %133 = vector.load %arg10[%c0_113, %c0_114] : memref<1x32xf32, #tpu.memory_space<vmem>>, vector<1x32xf32>
      %134 = vector.shape_cast %133 : vector<1x32xf32> to vector<32xf32>
      %cst_115 = arith.constant dense<0.000000e+00> : vector<16xf32>
      %135 = vector.multi_reduction <add>, %130, %cst_115 [1] : vector<16x32xf32> to vector<16xf32>
      %136 = vector.shape_cast %135 : vector<16xf32> to vector<16x1xf32>
      %cst_116 = arith.constant 3.200000e+01 : f32
      %137 = vector.broadcast %cst_116 : f32 to vector<16x1xf32>
      %138 = arith.divf %136, %137 : vector<16x1xf32>
      %139 = vector.broadcast %138 : vector<16x1xf32> to vector<16x32xf32>
      %140 = arith.subf %130, %139 : vector<16x32xf32>
      %141 = arith.mulf %140, %140 : vector<16x32xf32>
      %cst_117 = arith.constant dense<0.000000e+00> : vector<16xf32>
      %142 = vector.multi_reduction <add>, %141, %cst_117 [1] : vector<16x32xf32> to vector<16xf32>
      %143 = vector.shape_cast %142 : vector<16xf32> to vector<16x1xf32>
      %cst_118 = arith.constant 3.200000e+01 : f32
      %144 = vector.broadcast %cst_118 : f32 to vector<16x1xf32>
      %145 = arith.divf %143, %144 : vector<16x1xf32>
      %146 = vector.broadcast %138 : vector<16x1xf32> to vector<16x32xf32>
      %147 = arith.subf %130, %146 : vector<16x32xf32>
      %cst_119 = arith.constant 9.99999974E-6 : f32
      %148 = vector.broadcast %cst_119 : f32 to vector<16x1xf32>
      %149 = arith.addf %145, %148 : vector<16x1xf32>
      %150 = math.rsqrt %149 : vector<16x1xf32>
      %151 = vector.broadcast %150 : vector<16x1xf32> to vector<16x32xf32>
      %152 = arith.mulf %147, %151 : vector<16x32xf32>
      %153 = vector.shape_cast %132 : vector<32xf32> to vector<1x32xf32>
      %154 = vector.broadcast %153 : vector<1x32xf32> to vector<16x32xf32>
      %155 = arith.mulf %152, %154 : vector<16x32xf32>
      %156 = vector.shape_cast %134 : vector<32xf32> to vector<1x32xf32>
      %157 = vector.broadcast %156 : vector<1x32xf32> to vector<16x32xf32>
      %158 = arith.addf %155, %157 : vector<16x32xf32>
      %159 = arith.truncf %158 : vector<16x32xf32> to vector<16x32xbf16>
      %c0_120 = arith.constant 0 : index
      %c0_121 = arith.constant 0 : index
      %160 = vector.load %arg11[%c0_120, %c0_121] : memref<32x128xbf16, #tpu.memory_space<vmem>>, vector<32x128xbf16>
      %cst_122 = arith.constant dense<0.000000e+00> : vector<16x128xf32>
      %161 = tpu.matmul %159, %160, %cst_122 {dimension_numbers = #tpu.dot_dimension_numbers<[1], [0], [0], [1], [0, 0, 1, 1], [], []>} : vector<16x32xbf16>, vector<32x128xbf16>, vector<16x128xf32> -> vector<16x128xf32>
      %c0_123 = arith.constant 0 : index
      %c0_124 = arith.constant 0 : index
      %162 = vector.load %arg12[%c0_123, %c0_124] : memref<1x128xf32, #tpu.memory_space<vmem>>, vector<1x128xf32>
      %163 = vector.shape_cast %162 : vector<1x128xf32> to vector<128xf32>
      %164 = vector.shape_cast %163 : vector<128xf32> to vector<1x128xf32>
      %165 = vector.broadcast %164 : vector<1x128xf32> to vector<16x128xf32>
      %166 = arith.addf %161, %165 : vector<16x128xf32>
      %cst_125 = arith.constant 0.000000e+00 : f32
      %167 = vector.broadcast %cst_125 : f32 to vector<16x128xf32>
      %168 = arith.maximumf %166, %167 : vector<16x128xf32>
      %169 = arith.truncf %168 : vector<16x128xf32> to vector<16x128xbf16>
      %c0_126 = arith.constant 0 : index
      %c0_127 = arith.constant 0 : index
      %170 = vector.load %arg13[%c0_126, %c0_127] : memref<128x32xbf16, #tpu.memory_space<vmem>>, vector<128x32xbf16>
      %cst_128 = arith.constant dense<0.000000e+00> : vector<16x32xf32>
      %171 = tpu.matmul %169, %170, %cst_128 {dimension_numbers = #tpu.dot_dimension_numbers<[1], [0], [0], [1], [0, 0, 1, 1], [], []>} : vector<16x128xbf16>, vector<128x32xbf16>, vector<16x32xf32> -> vector<16x32xf32>
      %c0_129 = arith.constant 0 : index
      %c0_130 = arith.constant 0 : index
      %172 = vector.load %arg14[%c0_129, %c0_130] : memref<1x32xf32, #tpu.memory_space<vmem>>, vector<1x32xf32>
      %173 = vector.shape_cast %172 : vector<1x32xf32> to vector<32xf32>
      %174 = vector.shape_cast %173 : vector<32xf32> to vector<1x32xf32>
      %175 = vector.broadcast %174 : vector<1x32xf32> to vector<16x32xf32>
      %176 = arith.addf %171, %175 : vector<16x32xf32>
      %177 = arith.addf %130, %176 : vector<16x32xf32>
      %c0_131 = arith.constant 0 : index
      %c0_132 = arith.constant 0 : index
      %c0_133 = arith.constant 0 : index
      %178 = vector.load %arg15[%c0_131, %c0_132, %c0_133] : memref<1x16x32xf32, #tpu.memory_space<vmem>>, vector<1x16x32xf32>
      %179 = vector.shape_cast %178 : vector<1x16x32xf32> to vector<16x32xf32>
      %180 = vector.shape_cast %177 : vector<16x32xf32> to vector<1x16x32xf32>
      tpu.vector_store %arg15[%c0_131, %c0_132, %c0_133], %180 {strides = array<i32>} : memref<1x16x32xf32, #tpu.memory_space<vmem>>, vector<1x16x32xf32>,
    } else {
    }
    return
  }
  func.func @transform_0(%arg0: i32, %arg1: i32) -> (i32, i32, i32) {
    %c0_i32 = arith.constant 0 : i32
    %c0_i32_0 = arith.constant 0 : i32
    %c0_i32_1 = arith.constant 0 : i32
    return %arg0, %c0_i32, %c0_i32_0 : i32, i32, i32
  }
  func.func @transform_1(%arg0: i32, %arg1: i32) -> (i32, i32) {
    %c0_i32 = arith.constant 0 : i32
    %c0_i32_0 = arith.constant 0 : i32
    %c0_i32_1 = arith.constant 0 : i32
    return %c0_i32, %c0_i32_0 : i32, i32
  }
  func.func @transform_2(%arg0: i32, %arg1: i32) -> (i32, i32) {
    %c0_i32 = arith.constant 0 : i32
    %c0_i32_0 = arith.constant 0 : i32
    %c0_i32_1 = arith.constant 0 : i32
    return %c0_i32, %c0_i32_0 : i32, i32
  }
  func.func @transform_3(%arg0: i32, %arg1: i32) -> (i32, i32) {
    %c0_i32 = arith.constant 0 : i32
    %c0_i32_0 = arith.constant 0 : i32
    %c0_i32_1 = arith.constant 0 : i32
    return %c0_i32, %c0_i32_0 : i32, i32
  }
  func.func @transform_4(%arg0: i32, %arg1: i32) -> (i32, i32) {
    %c0_i32 = arith.constant 0 : i32
    %c0_i32_0 = arith.constant 0 : i32
    %c0_i32_1 = arith.constant 0 : i32
    return %c0_i32, %c0_i32_0 : i32, i32
  }
  func.func @transform_5(%arg0: i32, %arg1: i32) -> (i32, i32) {
    %c0_i32 = arith.constant 0 : i32
    %c0_i32_0 = arith.constant 0 : i32
    %c0_i32_1 = arith.constant 0 : i32
    return %c0_i32, %c0_i32_0 : i32, i32
  }
  func.func @transform_6(%arg0: i32, %arg1: i32) -> (i32, i32) {
    %c0_i32 = arith.constant 0 : i32
    %c0_i32_0 = arith.constant 0 : i32
    %c0_i32_1 = arith.constant 0 : i32
    return %c0_i32, %c0_i32_0 : i32, i32
  }
  func.func @transform_7(%arg0: i32, %arg1: i32) -> (i32, i32) {
    %c0_i32 = arith.constant 0 : i32
    %c0_i32_0 = arith.constant 0 : i32
    %c0_i32_1 = arith.constant 0 : i32
    return %c0_i32, %c0_i32_0 : i32, i32
  }
  func.func @transform_8(%arg0: i32, %arg1: i32) -> (i32, i32) {
    %c0_i32 = arith.constant 0 : i32
    %c0_i32_0 = arith.constant 0 : i32
    %c0_i32_1 = arith.constant 0 : i32
    return %c0_i32, %c0_i32_0 : i32, i32
  }
  func.func @transform_9(%arg0: i32, %arg1: i32) -> (i32, i32) {
    %c0_i32 = arith.constant 0 : i32
    %c0_i32_0 = arith.constant 0 : i32
    %c0_i32_1 = arith.constant 0 : i32
    return %c0_i32, %c0_i32_0 : i32, i32
  }
  func.func @transform_10(%arg0: i32, %arg1: i32) -> (i32, i32) {
    %c0_i32 = arith.constant 0 : i32
    %c0_i32_0 = arith.constant 0 : i32
    %c0_i32_1 = arith.constant 0 : i32
    return %c0_i32, %c0_i32_0 : i32, i32
  }
  func.func @transform_11(%arg0: i32, %arg1: i32) -> (i32, i32) {
    %c0_i32 = arith.constant 0 : i32
    %c0_i32_0 = arith.constant 0 : i32
    %c0_i32_1 = arith.constant 0 : i32
    return %c0_i32, %c0_i32_0 : i32, i32
  }
  func.func @transform_12(%arg0: i32, %arg1: i32) -> (i32, i32) {
    %c0_i32 = arith.constant 0 : i32
    %c0_i32_0 = arith.constant 0 : i32
    %c0_i32_1 = arith.constant 0 : i32
    return %c0_i32, %c0_i32_0 : i32, i32
  }
  func.func @transform_13(%arg0: i32, %arg1: i32) -> (i32, i32, i32) {
    %c0_i32 = arith.constant 0 : i32
    %c0_i32_0 = arith.constant 0 : i32
    %c0_i32_1 = arith.constant 0 : i32
    return %arg0, %c0_i32, %c0_i32_0 : i32, i32, i32
  }
}

</mosaic_0001>

<bundles_post_ra>
// kernel: tpu_custom_call.1
= control target key start
LH: loop header
LB: loop body
LE: loop exit
PB: predicated region body
PF: predicated region fallthrough
CT: control target
= control target key end

     0   :  { %s2747_s0 = inlined_call_operand.vmem [shape: f32[2,16,32], index: 0, kind: input, shape index: {}]   ;;  %s2748_s1 = inlined_call_operand.vmem [shape: bf16[32,32], index: 1, kind: input, shape index: {}]   ;;  %s2749_s2 = inlined_call_operand.vmem [shape: bf16[32,64], index: 2, kind: input, shape index: {}]   ;;  %s2750_s3 = inlined_call_operand.vmem [shape: bf16[32,32], index: 3, kind: input, shape index: {}]   ;;  %s2751_s4 = inlined_call_operand.vmem [shape: f32[1,32], index: 4, kind: input, shape index: {}]   ;;  %s2752_s5 = inlined_call_operand.vmem [shape: f32[1,32], index: 5, kind: input, shape index: {}]   ;;  %s2753_s6 = inlined_call_operand.vmem [shape: f32[1,32], index: 6, kind: input, shape index: {}]   ;;  %s2754_s7 = inlined_call_operand.vmem [shape: f32[1,32], index: 7, kind: input, shape index: {}]   ;;  %s2755_s8 = inlined_call_operand.vmem [shape: f32[1,32], index: 8, kind: input, shape index: {}]   ;;  %s2756_s9 = inlined_call_operand.hbm [shape: bf16[32,128], index: 9, kind: input, shape index: {}]   ;;  %s2757_s10 = inlined_call_operand.vmem [shape: f32[1,128], index: 10, kind: input, shape index: {}]   ;;  %s2758_s11 = inlined_call_operand.vmem [shape: bf16[128,32], index: 11, kind: input, shape index: {}]   ;;  %s2759_s12 = inlined_call_operand.vmem [shape: f32[1,32], index: 12, kind: input, shape index: {}]   ;;  %s2760_s13 = inlined_call_operand.hbm [shape: f32[2,16,32], index: 13, kind: output, shape index: {}]  }
   0x1   :  { %2769 = sst [smem:[#allocation23_spill]] %s2747_s0 }
   0x2   :  { %2770 = sst [smem:[#allocation24_spill]] %s2748_s1 }
   0x3   :  { %2771 = sst [smem:[#allocation25_spill]] %s2749_s2 }
   0x4   :  { %2772 = sst [smem:[#allocation26_spill]] %s2756_s9 }
   0x5   :  { %2773 = sst [smem:[#allocation27_spill]] %s2760_s13 }
   0x6   :  { %18 = vsyncpa [#allocation12], 0 }
   0x7   :  { %19 = vsyncpa [#allocation13], 0 }
   0x8   :  { %21 = vsyncpa [#allocation13 + $0x1], 0  ;;  %s2267_s25 = smov 0   ;;  %s2269_s26 = smov 0  }
   0x9   :  { %s2271_s27 = smov 0   ;;  %s2273_s28 = smov 0  }
   0xa   :  { %s2275_s29 = smov 0   ;;  %s2277_s30 = smov 0  }
   0xb   :  { %s2279_s14 = smov 0   ;;  %s2281_s15 = smov 0  }
   0xc LB: > { %2774 = sst [smem:[#allocation17_spill]] %s2143_s25  ;;  %s1727_s16 = sadd.s32 4294967295, %s2171_s15   ;;  %s2171_s15 = sphi %s2281_s15, %s27_s15   ;;  %s2167_s14 = sphi %s2279_s14, %s2799_s14   ;;  %s2163_s30 = sphi %s2277_s30, %s2794_s30   ;;  %s2159_s29 = sphi %s2275_s29, %s2798_s29   ;;  %s2155_s28 = sphi %s2273_s28, %s2793_s28   ;;  %s2151_s27 = sphi %s2271_s27, %s2797_s27   ;;  %s2147_s26 = sphi %s2269_s26, %s2796_s26   ;;  %s2143_s25 = sphi %s2267_s25, %s2795_s25  }
   0xd   : > { %2775 = sst [smem:[#allocation18_spill]] %s2163_s30  ;;  %s1728_s17 = sadd.s32 4294967294, %s2171_s15  }
   0xe   : > { %2776 = sst [smem:[#allocation19_spill]] %s2171_s15  ;;  %s36_s18 = sadd.s32 1, %s2163_s30 }
   0xf   : > { %s39_s19 = sadd.s32 1, %s2167_s14  ;;  %p37_p0 = scmp.ge.s32.totalorder %s36_s18, 2 }
  0x10   : > { %s324_s20 = sadd.s32 1, %s2151_s27  ;;  %p334_p1 = scmp.ne.s32.totalorder %s2151_s27, %s2147_s26 }
  0x11   : > { %p335_p2 = scmp.eq.s32.totalorder %s1727_s16, 3  ;;  %s2801_s18 = smov (%p37_p0, %s36_s18), 0 }
  0x12   : > { %2777 = sst [smem:[#allocation20_spill]] %s2801_s18  ;;  %s2803_s19 = smov (!%p37_p0, %s39_s19), %s2167_s14 }
  0x13   : > { %p2317_p3 = por %p335_p2, %p334_p1  ;;  %p340_p4 = scmp.ne.s32.totalorder %s2147_s26, %s2143_s25 }
  0x14   : > { %p41_p5 = scmp.ge.s32.totalorder %s2803_s19, 2  ;;  %p341_p6 = scmp.eq.s32.totalorder %s1728_s17, 3 }
  0x15   : > { %s2778_s21 = scalar_select %p2317_p3, 1, 0 }
  0x16   : > { %p1729_p7 = scmp.ge.s32.totalorder %s2171_s15, 1  ;;  %p348_p8 = scmp.lt.s32.totalorder %s2171_s15, 5 }
  0x17   : > { %2779 = sst [smem:[#allocation21_spill]] %s2778_s21  ;;  %s2805_s19 = smov (%p41_p5, %s2803_s19), 0 }
  0x18   : > { %p2327_p9 = por %p341_p6, %p340_p4  ;;  %p2331_p10 = pnand %p1729_p7, %p348_p8 }
  0x19   : > { %s321_s24 = ssub.s32 %s2167_s14, %s2805_s19  ;;  %p1879_p13 = scmp.eq.s32.totalorder %s1727_s16, 0 }
  0x1a   : > { %s2780_s22 = scalar_select %p2327_p9, 1, 0 }
  0x1b   : > { %p322_p11 = scmp.eq.s32.totalorder %s321_s24, 0  ;;  %p1871_p12 = pneg %p2331_p10 }
  0x1c   : > { %2781 = sst [smem:[#allocation22_spill]] %s2780_s22  ;;  %s2173_s15 = smov [#allocation11]  }
  0x1d   : > { %s2783_s9 = sld [smem:[#allocation26_spill]]  ;;  %s385_s13 = sshll.u32 %s2173_s15, 4  ;;  %s386_s13 = int_to_ptr.vmem [resolvable:$true] %s385_s13 }
  0x1e   : > { %s2343_s25 = scalar_select %p322_p11, %s2151_s27, %s324_s20  }
  0x1f   : > { %p1872_p0 = pnand %p1879_p13, %p1871_p12  ;;  %s2174_s22 = smov 64  }
  0x20   : > { %s2175_s21 = smov 4   ;;  %418 = sbr.rel (%p2331_p10) target bundleno = 2409 (0x969), region = 72 }
  0x23   : > { %s383_s30 = sshll.u32 %s2783_s9, 4  ;;  %s384_s30 = int_to_ptr.hbm [resolvable:$true] %s383_s30 }
  0x24   : > { %1874 = dma.hbm_to_vmem [thread:$0]  (!%p1872_p0), %s384_s30, 256, %s386_s13, [#allocation12], %s2174_s22, %s2174_s22, %s2175_s21  }
  0x25   : > { %2134 = dma.done.wait (%p1879_p13), [#allocation12], 256  }
  0x26   : > { %2136 = vsyncadd (%p1879_p13), [#allocation12], 4294967040  ;;  %s460_s16 = sand.u32 1, %s2147_s26   ;;  %p463_p1 = scmp.lt.s32.totalorder %s2159_s29, 1 }
  0x27   : > { %s1734_s18 = sshll.u32 %s460_s16, 4  ;;  %s2784_s0 = sld [smem:[#allocation23_spill]] }
  0x28   : > { %s464_s20 = scalar_select %p463_p1, %s2159_s29, 1 }
  0x29   : > { %s2357_s13 = scalar_lea.vmem [#allocation14], %s1734_s18  ;;  %p1737_p2 = scmp.ne.s32.totalorder %s2155_s28, 0 }
  0x2a   : > { %s1842_s15 = sshll.u32 %s464_s20, 4  ;;  %s2785_s1 = sld [smem:[#allocation24_spill]] (!%p1737_p2) }
  0x2b   : > { %472 = sbr.rel (%p1737_p2) target bundleno = 591 (0x24f), region = 80  ;;  %s2177_s17 = smov (!%p1737_p2), 112  }
  0x2c   : > { %s2178_s30 = smov (!%p1737_p2), 120   ;;  %s2179_s21 = smov (!%p1737_p2), 104  }
  0x2d   : > { %s2355_s9 = scalar_lea.vmem %s2784_s0, %s1842_s15 }
  0x30   : > { %v473_v0 = vld [vmem:[%s2355_s9] sm:$0xff]  ;;  %vm477_vm0 = vcmask 261120   ;;  %v474_v2 = vld [vmem:[%s2355_s9 + $0x8] sm:$0xff]  ;;  %v2176_v4 = vmov 32.0   ;;  %vm541_vm7 = vcmask 257024   ;;  %vm588_vm9 = vcmask 60416  }
  0x31   : > { %v478_v1 = vsel %vm477_vm0, %v473_v0, 0.0  ;;  %v481_v3 = vsel %vm477_vm0, %v474_v2, 0.0  ;;  %1972 = vrcp.f32 %v2176_v4  ;;  %v1844_v21 = vld [vmem:[%s2785_s1 + $0x8] sm:$0xff]  ;;  %v1843_v24 = vld [vmem:[%s2785_s1] sm:$0xff]  ;;  %vm630_vm10 = vcmask 7168  }
  0x32   : > { %479 = vadd.xlane.f32.xlu0 %v478_v1  ;;  %574 = vmatpush.bf16.msra.mxu0 %v1844_v21  ;;  %v1970_v37 = vld [vmem:[%s2752_s5] ss:$0 sm:$0xff]  ;;  %vm647_vm11 = vcmask 64512  }
  0x33   : > { %v1971_v41 = vld [vmem:[%s2753_s6] ss:$0 sm:$0xff] }
  0x36   : > { %575 = vmatpush.bf16.msra.mxu0 %v1843_v24 }
  0x37   : > { %v1973_v5 = vpop.eup %1972 }
  0x38   : > { %v485_v6 = vmul.f32 32.0, %v1973_v5  ;;  %vm489_vm1 = vweird.f32 %v1973_v5 }
  0x3a   : > { %482 = vadd.xlane.f32.xlu0 %v481_v3  ;;  %v486_v7 = vsub.f32 1.0, %v485_v6 }
  0x3c   : > { %v487_v8 = vmul.f32 %v1973_v5, %v486_v7  ;;  %v2181_v7 = vmov 0.0  }
  0x3d   : > { %639 = vst.msk [vmem:[#allocation9] sm:$0xff] %vm630_vm10, %v2181_v7 }
  0x3e   : > { %v488_v9 = vadd.f32 %v1973_v5, %v487_v8  ;;  %640 = vst.msk [vmem:[#allocation9 + $0x8] sm:$0xff] %vm630_vm10, %v2181_v7 }
  0x3f   : > { %641 = vst.msk [vmem:[#allocation9 + $0x10] sm:$0xff] %vm630_vm10, %v2181_v7 }
  0x40   : > { %v490_v10 = vsel %vm489_vm1, %v1973_v5, %v488_v9  ;;  %v2180_v5 = vmov -1e+30   ;;  %642 = vst.msk [vmem:[#allocation9 + $0x18] sm:$0xff] %vm630_vm10, %v2181_v7 }
  0x41   : > { %631 = vst.msk [vmem:[#allocation8] sm:$0xff] %vm630_vm10, %v2180_v5 }
  0x42   : > { %632 = vst.msk [vmem:[#allocation8 + $0x8] sm:$0xff] %vm630_vm10, %v2180_v5 }
  0x43   : > { %633 = vst.msk [vmem:[#allocation8 + $0x10] sm:$0xff] %vm630_vm10, %v2180_v5 }
  0x44   : > { %634 = vst.msk [vmem:[#allocation8 + $0x18] sm:$0xff] %vm630_vm10, %v2180_v5 }
  0x45   : > { %635 = vst.msk [vmem:[#allocation8 + $0x20] sm:$0xff] %vm630_vm10, %v2180_v5 }
  0x46   : > { %636 = vst.msk [vmem:[#allocation8 + $0x28] sm:$0xff] %vm630_vm10, %v2180_v5 }
  0x47   : > { %637 = vst.msk [vmem:[#allocation8 + $0x30] sm:$0xff] %vm630_vm10, %v2180_v5 }
  0x48   : > { %638 = vst.msk [vmem:[#allocation8 + $0x38] sm:$0xff] %vm630_vm10, %v2180_v5 }
  0x49   : > { %643 = vst.msk [vmem:[#allocation9 + $0x20] sm:$0xff] %vm630_vm10, %v2181_v7 }
  0x4a   : > { %644 = vst.msk [vmem:[#allocation9 + $0x28] sm:$0xff] %vm630_vm10, %v2181_v7 }
  0x4b   : > { %645 = vst.msk [vmem:[#allocation9 + $0x30] sm:$0xff] %vm630_vm10, %v2181_v7 }
  0x4c   : > { %646 = vst.msk [vmem:[#allocation9 + $0x38] sm:$0xff] %vm630_vm10, %v2181_v7 }
  0x4d   : > { %648 = vst.msk [vmem:[#allocation10] sm:$0xff] %vm647_vm11, %v2181_v7 }
  0x4e   : > { %649 = vst.msk [vmem:[#allocation10 + $0x8] sm:$0xff] %vm647_vm11, %v2181_v7 }
  0x4f   : > { %650 = vst.msk [vmem:[#allocation10 + $0x10] sm:$0xff] %vm647_vm11, %v2181_v7 }
  0x50   : > { %651 = vst.msk [vmem:[#allocation10 + $0x18] sm:$0xff] %vm647_vm11, %v2181_v7 }
  0x51   : > { %652 = vst.msk [vmem:[#allocation10 + $0x20] sm:$0xff] %vm647_vm11, %v2181_v7 }
  0x52   : > { %653 = vst.msk [vmem:[#allocation10 + $0x28] sm:$0xff] %vm647_vm11, %v2181_v7 }
  0x53   : > { %654 = vst.msk [vmem:[#allocation10 + $0x30] sm:$0xff] %vm647_vm11, %v2181_v7 }
  0x54   : > { %655 = vst.msk [vmem:[#allocation10 + $0x38] sm:$0xff] %vm647_vm11, %v2181_v7 }
  0xa5   : > { %v480_v11 = vpop.xlane.xlu0 %479 }
  0xa6   : > { %v491_v12 = vmul.f32 %v490_v10, %v480_v11 }
  0xa8   : > { %v493_v13 = vsub.f32 %v473_v0, %v491_v12 }
  0xaa   : > { %v495_v14 = vmul.f32 %v493_v13, %v493_v13 }
  0xac   : > { %v497_v15 = vsel %vm477_vm0, %v495_v14, 0.0 }
  0xad   : > { %498 = vadd.xlane.f32.xlu1 %v497_v15  ;;  %v483_v16 = vpop.xlane.xlu0 %482 }
  0xae   : > { %v492_v17 = vmul.f32 %v490_v10, %v483_v16 }
  0xb0   : > { %v494_v18 = vsub.f32 %v474_v2, %v492_v17 }
  0xb2   : > { %v496_v19 = vmul.f32 %v494_v18, %v494_v18 }
  0xb4   : > { %v500_v20 = vsel %vm477_vm0, %v496_v19, 0.0 }
  0xb5   : > { %501 = vadd.xlane.f32.xlu1 %v500_v20 }
 0x120   : > { %v499_v22 = vpop.xlane.xlu1 %498 }
 0x121   : > { %v503_v23 = vmul.f32 %v499_v22, %v490_v10 }
 0x123   : > { %v505_v25 = vadd.f32 1e-05, %v503_v23 }
 0x125   : > { %1974 = vrsqrt.f32 %v505_v25  ;;  %vm513_vm3 = vweird.f32 %v505_v25 }
 0x128   : > { %v502_v26 = vpop.xlane.xlu1 %501 }
 0x129   : > { %v504_v27 = vmul.f32 %v502_v26, %v490_v10 }
 0x12b   : > { %v1975_v28 = vpop.eup %1974  ;;  %v506_v29 = vadd.f32 1e-05, %v504_v27 }
 0x12c   : > { %v508_v30 = vmul.f32 %v1975_v28, %v505_v25  ;;  %vm514_vm2 = vweird.f32 %v1975_v28 }
 0x12d   : > { %1976 = vrsqrt.f32 %v506_v29  ;;  %vm515_vm4 = vmor %vm513_vm3, %vm514_vm2  ;;  %vm523_vm6 = vweird.f32 %v506_v29 }
 0x12e   : > { %v509_v31 = vmul.f32 %v1975_v28, %v508_v30 }
 0x130   : > { %v510_v32 = vmul.f32 0.5, %v509_v31 }
 0x132   : > { %v511_v33 = vsub.f32 1.5, %v510_v32 }
 0x133   : > { %v1977_v34 = vpop.eup %1976 }
 0x134   : > { %v512_v35 = vmul.f32 %v1975_v28, %v511_v33  ;;  %v518_v36 = vmul.f32 %v1977_v34, %v506_v29  ;;  %vm524_vm5 = vweird.f32 %v1977_v34 }
 0x135   : > { %vm525_vm8 = vmor %vm523_vm6, %vm524_vm5 }
 0x136   : > { %v516_v38 = vsel %vm515_vm4, %v1975_v28, %v512_v35  ;;  %v519_v39 = vmul.f32 %v1977_v34, %v518_v36 }
 0x137   : > { %v527_v40 = vmul.f32 %v516_v38, %v493_v13 }
 0x138   : > { %v520_v42 = vmul.f32 0.5, %v519_v39 }
 0x139   : > { %v532_v43 = vmul.f32 %v1970_v37, %v527_v40 }
 0x13a   : > { %v521_v44 = vsub.f32 1.5, %v520_v42 }
 0x13b   : > { %v537_v45 = vadd.f32 %v1971_v41, %v532_v43 }
 0x13c   : > { %v522_v46 = vmul.f32 %v1977_v34, %v521_v44 }
 0x13d   : > { %v539_v47 = vpack.c.bf16 %v537_v45, %v537_v45 }
 0x13e   : > { %v526_v48 = vsel %vm525_vm8, %v1977_v34, %v522_v46 }
 0x13f   : > { %v528_v49 = vmul.f32 %v526_v48, %v494_v18  ;;  %542 = vst.msk [vmem:[#allocation2] sm:$0xf] %vm541_vm7, %v539_v47  ;;  %v550_v53 = vunpack.c.l.b16 %v539_v47 }
 0x141   : > { %v533_v50 = vmul.f32 %v1970_v37, %v528_v49 }
 0x143   : > { %v538_v51 = vadd.f32 %v1971_v41, %v533_v50 }
 0x145   : > { %v540_v52 = vpack.c.bf16 %v538_v51, %v538_v51 }
 0x147   : > { %v551_v54 = vunpack.c.l.b16 %v540_v52  ;;  %543 = vst.msk [vmem:[#allocation2 + $0x4] sm:$0xf] %vm541_vm7, %v540_v52 }
 0x149   : > { %v552_v55 = vpack.c.b16 %v551_v54, %v550_v53 }
 0x14b   : > { %1746 = vmatmul.msk.bf16.vlgmr.msra.gmra.mxu0 %vm477_vm0, %v552_v55 }
 0x1c8   : > { %v577_v56 = vpop.f32.mrf.mxu0 }
 0x1c9   : > { %v582_v57 = vpack.c.bf16 %v577_v56, %v577_v56 }
 0x1cb   : > { %584 = vst.msk [vmem:[#allocation7] sm:$0xf] %vm541_vm7, %v582_v57 }
 0x1d0   : > { %v579_v58 = vpop.f32.mrf.mxu0 }
 0x1d1   : > { %v583_v59 = vpack.c.bf16 %v579_v58, %v579_v58 }
 0x1d2   : > { %v604_v60 = vld [vmem:[#allocation7] sm:$0xf] }
 0x1d3   : > { %v591_v61 = vld [vmem:[#allocation7] sm:$0xf]  ;;  %585 = vst.msk [vmem:[#allocation7 + $0x4] sm:$0xf] %vm541_vm7, %v583_v59  ;;  %608 = vrot.lane.b32.xlu0 %v604_v60, %s2177_s17 }
 0x1d4   : > { %595 = vrot.lane.b32.xlu2 %v591_v61, %s2178_s30  ;;  %v586_v62 = vld [vmem:[#allocation7] sm:$0xf] }
 0x1d5   : > { %589 = vst.msk [vmem:[#allocation3] sm:$0xf] %vm588_vm9, %v586_v62  ;;  %v617_v2 = vld [vmem:[#allocation7] sm:$0xf] }
 0x1da   : > { %v605_v63 = vld [vmem:[#allocation7 + $0x4] sm:$0xf] }
 0x1db   : > { %v592_v0 = vld [vmem:[#allocation7 + $0x4] sm:$0xf]  ;;  %610 = vrot.lane.b32.xlu1 %v605_v63, %s2177_s17 }
 0x1dc   : > { %597 = vrot.lane.b32.xlu2 %v592_v0, %s2178_s30  ;;  %v587_v1 = vld [vmem:[#allocation7 + $0x4] sm:$0xf] }
 0x1dd   : > { %590 = vst.msk [vmem:[#allocation3 + $0x4] sm:$0xf] %vm588_vm9, %v587_v1  ;;  %v618_v3 = vld [vmem:[#allocation7 + $0x4] sm:$0xf] }
 0x1e4   : > { %621 = vrot.lane.b32.xlu2 %v617_v2, %s2179_s21 }
 0x1ec   : > { %623 = vrot.lane.b32.xlu2 %v618_v3, %s2179_s21 }
 0x22e   : > { %v596_v4 = vpop.permute.xlu2 %595 }
 0x22f   : > { %602 = vst.msk [vmem:[#allocation3 + $0x8] sm:$0xf] %vm588_vm9, %v596_v4 }
 0x236   : > { %v598_v6 = vpop.permute.xlu2 %597 }
 0x237   : > { %603 = vst.msk [vmem:[#allocation3 + $0xc] sm:$0xf] %vm588_vm9, %v598_v6 }
 0x23e   : > { %v622_v8 = vpop.permute.xlu2 %621 }
 0x23f   : > { %628 = vst.msk [vmem:[#allocation3 + $0x18] sm:$0xf] %vm588_vm9, %v622_v8 }
 0x245   : > { %v609_v9 = vpop.permute.xlu0 %608 }
 0x246   : > { %v624_v10 = vpop.permute.xlu2 %623  ;;  %615 = vst.msk [vmem:[#allocation3 + $0x10] sm:$0xf] %vm588_vm9, %v609_v9 }
 0x247   : > { %629 = vst.msk [vmem:[#allocation3 + $0x1c] sm:$0xf] %vm588_vm9, %v624_v10 }
 0x24d   : > { %v611_v11 = vpop.permute.xlu1 %610 }
 0x24e   : > { %616 = vst.msk [vmem:[#allocation3 + $0x14] sm:$0xf] %vm588_vm9, %v611_v11 }
 0x24f PF: > { %s2786_s2 = sld [smem:[#allocation25_spill]]  ;;  %s1747_s18 = sshll.u32 %s2155_s28, 3  ;;  %vm678_vm12 = vcmask 261120   ;;  %vm696_vm13 = vcmask 519168   ;;  %vm699_vm14 = vcmask 60416   ;;  %vm766_vm15 = vcmask 64512  }
 0x250   : > { %s657_s20 = sshra.s32 %s1747_s18, 3  ;;  %s2182_s21 = smov 104   ;;  %v1847_v24 = vld [vmem:[#allocation3] sm:$0xff]  ;;  %v1850_v32 = vld [vmem:[#allocation3 + $0x18] sm:$0xff]  ;;  %v1848_v33 = vld [vmem:[#allocation3 + $0x8] sm:$0xff]  ;;  %vm1059_vm0 = vcmask 7168  }
 0x251   : > { %s1748_s17 = sshll.u32 %s657_s20, 2  ;;  %s2183_s22 = smov 120   ;;  %v2441_v43 = vld [vmem:[#allocation8] sm:$0xff]  ;;  %v2185_v45 = vmov 0   ;;  %v2454_v50 = vld [vmem:[#allocation8 + $0x8] sm:$0xff]  ;;  %v2478_v62 = vld [vmem:[#allocation8 + $0x30] sm:$0xff] }
 0x252   : > { %s660_s30 = scalar_lea.vmem [#allocation2], %s1748_s17  ;;  %s2184_s23 = smov 112   ;;  %1980 = vset.pattern.permute.xlu1 %v2185_v45  ;;  %1978 = vset.pattern.permute.xlu2 %v2185_v45  ;;  %v873_v2 = vld [vmem:[#allocation8 + $0x10] sm:$0xff]  ;;  %v875_v5 = vld [vmem:[#allocation8 + $0x20] sm:$0xff]  ;;  %v2489_v11 = vld [vmem:[#allocation8 + $0x28] sm:$0xff]  ;;  %vm1144_vm1 = vcmask 1043456  }
 0x253   : > { %v661_v14 = vld [vmem:[%s660_s30] sm:$0xf]  ;;  %1979 = vset.pattern.permute.xlu0 %v2185_v45  ;;  %s2186_s20 = smov 88   ;;  %s2187_s15 = smov 80  }
 0x254   : > { %s2188_s24 = smov 96   ;;  %s2189_s17 = smov 72  }
 0x255   : > { %v1846_v12 = vld [vmem:[%s2786_s2 + $0x8] sm:$0xff]  ;;  %v1845_v13 = vld [vmem:[%s2786_s2] sm:$0xff]  ;;  %v1849_v36 = vld [vmem:[#allocation3 + $0x10] sm:$0xff]  ;;  %p1782_p4 = scmp.ne.s32.totalorder %s2155_s28, 1 }
 0x256   : > { %688 = vmatpush.bf16.msra.mxu0 %v1846_v12  ;;  %v2491_v12 = vld [vmem:[#allocation8 + $0x38] sm:$0xff]  ;;  %s2191_s28 = smov (!%p1782_p4), 16   ;;  %s2193_s30 = smov (!%p1782_p4), 24  }
 0x25a   : > { %689 = vmatpush.bf16.msra.mxu0 %v1845_v13 }
 0x25d   : > { %1757 = vmatmul.msk.bf16.vlgmr.msra.gmra.mxu0 %vm678_vm12, %v661_v14 }
 0x2da   : > { %v691_v15 = vpop.f32.mrf.mxu0 }
 0x2db   : > { %v695_v16 = vpack.c.bf16 %v691_v15, %v691_v15 }
 0x2dd   : > { %697 = vst.msk [vmem:[#allocation6] sm:$0xf] %vm696_vm13, %v695_v16 }
 0x2e2   : > { %v693_v17 = vpop.f32.mrf.mxu0 }
 0x2e4   : > { %v735_v18 = vld [vmem:[#allocation6] sm:$0xf] }
 0x2e5   : > { %v707_v19 = vld [vmem:[#allocation6] sm:$0xf]  ;;  %737 = vrot.lane.b32.xlu1 %v735_v18, %s2182_s21 }
 0x2e6   : > { %709 = vrot.lane.b32.xlu0 %v707_v19, %s2183_s22  ;;  %v698_v20 = vld [vmem:[#allocation6] sm:$0xf] }
 0x2e7   : > { %700 = vst.msk [vmem:[#allocation4] sm:$0xf] %vm699_vm14, %v698_v20  ;;  %v721_v21 = vld [vmem:[#allocation6] sm:$0xf] }
 0x2e8   : > { %v714_v61 = vld [vmem:[#allocation6] sm:$0xf] }
 0x2e9   : > { %v728_v9 = vld [vmem:[#allocation6] sm:$0xf] }
 0x2ea   : > { %v701_v17 = vld [vmem:[#allocation6] sm:$0xf] }
 0x2ee   : > { %723 = vrot.lane.b32.xlu0 %v721_v21, %s2184_s23  ;;  %v757_v22 = vld [vmem:[#allocation4] sm:$0xf]  ;;  %v874_v21 = vld [vmem:[#allocation8 + $0x18] sm:$0xff] }
 0x2ef   : > { %v771_v23 = vsel %vm766_vm15, %v757_v22, 0 }
 0x2f0   : > { %780 = vmatpush.bf16.xpose.msra.mxu1 %v771_v23 }
 0x2f7   : > { %1762 = vmatmul.msk.bf16.vlgmr.msra.gmra.mxu1 %vm766_vm15, %v1847_v24 }
 0x357   : > { %v738_v25 = vpop.permute.xlu1 %737 }
 0x358   : > { %v710_v26 = vpop.permute.xlu0 %709  ;;  %741 = vst.msk [vmem:[#allocation4 + $0xc] sm:$0xf] %vm699_vm14, %v738_v25 }
 0x359   : > { %713 = vst.msk [vmem:[#allocation4 + $0x4] sm:$0xf] %vm699_vm14, %v710_v26 }
 0x35f   : > { %v760_v28 = vld [vmem:[#allocation4 + $0xc] sm:$0xf] }
 0x360   : > { %v724_v27 = vpop.permute.xlu0 %723  ;;  %v758_v29 = vld [vmem:[#allocation4 + $0x4] sm:$0xf]  ;;  %v846_v30 = vsel %vm766_vm15, %v760_v28, 0 }
 0x361   : > { %727 = vst.msk [vmem:[#allocation4 + $0x8] sm:$0xf] %vm699_vm14, %v724_v27  ;;  %v796_v31 = vsel %vm766_vm15, %v758_v29, 0  ;;  %855 = vmatpush.bf16.xpose.msrb.mxu0 %v846_v30 }
 0x362   : > { %805 = vmatpush.bf16.xpose.msra.mxu2 %v796_v31  ;;  %v742_v31 = vld [vmem:[#allocation6] sm:$0xf] }
 0x368   : > { %v759_v34 = vld [vmem:[#allocation4 + $0x8] sm:$0xf]  ;;  %1777 = vmatmul.msk.bf16.vlgmr.msrb.gmra.mxu0 %vm766_vm15, %v1850_v32 }
 0x369   : > { %v821_v35 = vsel %vm766_vm15, %v759_v34, 0  ;;  %1767 = vmatmul.msk.bf16.vlgmr.msra.gmra.mxu2 %vm766_vm15, %v1848_v33 }
 0x36a   : > { %830 = vmatpush.bf16.xpose.msra.mxu3 %v821_v35 }
 0x371   : > { %1772 = vmatmul.msk.bf16.vlgmr.msra.gmra.mxu3 %vm766_vm15, %v1849_v36 }
 0x374   : > { %v2429_v37 = vpop.f32.mrf.mxu1 }
 0x375   : > { %v879_v38 = vsel %vm766_vm15, %v2429_v37, -inf }
 0x376   : > { %880 = vmax.xlane.f32.xlu2 %v879_v38  ;;  %v862_v38 = vlaneseq }
 0x37c   : > { %v2433_v39 = vpop.f32.mrf.mxu1 }
 0x37d   : > { %v882_v40 = vsel %vm766_vm15, %v2433_v39, -inf }
 0x37e   : > { %883 = vmax.xlane.f32.xlu2 %v882_v40 }
 0x3e5   : > { %v2437_v41 = vpop.f32.mrf.mxu0 }
 0x3e6   : > { %v897_v42 = vsel %vm766_vm15, %v2437_v41, -inf }
 0x3e7   : > { %898 = vmax.xlane.f32.xlu2 %v897_v42 }
 0x3e9   : > { %v881_v44 = vpop.xlane.xlu2 %880 }
 0x3ea   : > { %v2444_v46 = vmax.f32 %v2441_v43, %v881_v44  ;;  %v867_v44 = vstv %s1747_s18  ;;  %s2192_s18 = smov (!%p1782_p4), 8  }
 0x3ec   : > { %v911_v47 = vsub.f32 %v2441_v43, %v2444_v46  ;;  %1253 = vst.msk [vmem:[#allocation8] sm:$0xff] %vm1059_vm0, %v2444_v46  ;;  %v2450_v48 = vpop.f32.mrf.mxu2  ;;  %v866_v43 = vand.u32 127, %v862_v38 }
 0x3ed   : > { %v885_v49 = vsel %vm766_vm15, %v2450_v48, -inf  ;;  %v2465_v55 = vpop.f32.mrf.mxu0 }
 0x3ee   : > { %886 = vmax.xlane.f32.xlu1 %v885_v49  ;;  %v900_v58 = vsel %vm766_vm15, %v2465_v55, -inf  ;;  %v919_v30 = vmul.f32 1.442695, %v911_v47  ;;  %v2532_v45 = vadd.s32 %v867_v44, %v866_v43 }
 0x3f1   : > { %v884_v51 = vpop.xlane.xlu2 %883 }
 0x3f2   : > { %v2457_v52 = vmax.f32 %v2454_v50, %v884_v51 }
 0x3f4   : > { %v2459_v53 = vpop.f32.mrf.mxu3  ;;  %1254 = vst.msk [vmem:[#allocation8 + $0x8] sm:$0xff] %vm1059_vm0, %v2457_v52  ;;  %v2473_v59 = vpop.f32.mrf.mxu2  ;;  %v912_v51 = vsub.f32 %v2454_v50, %v2457_v52 }
 0x3f5   : > { %v891_v54 = vsel %vm766_vm15, %v2459_v53, -inf  ;;  %v888_v60 = vsel %vm766_vm15, %v2473_v59, -inf }
 0x3f6   : > { %892 = vmax.xlane.f32.xlu2 %v891_v54  ;;  %v921_v54 = vmul.f32 1.442695, %v912_v51 }
 0x3fc   : > { %v2467_v56 = vpop.f32.mrf.mxu3 }
 0x3fd   : > { %v894_v57 = vsel %vm766_vm15, %v2467_v56, -inf }
 0x3fe   : > { %895 = vmax.xlane.f32.xlu0 %v894_v57  ;;  %901 = vmax.xlane.f32.xlu2 %v900_v58 }
 0x406   : > { %889 = vmax.xlane.f32.xlu2 %v888_v60 }
 0x407   : > { %716 = vrot.lane.b32.xlu1 %v714_v61, %s2186_s20 }
 0x40f   : > { %937 = vperm.xlu1 %1980, %v2444_v46   ;;  %v2534_v46 = vshrl.u32 %v862_v38, 7 }
 0x411   : > { %vm869_vm2 = vcmp.ge.s32.totalorder %v2534_v46, %v2532_v45 }
 0x45a   : > { %v899_v63 = vpop.xlane.xlu2 %898 }
 0x45b   : > { %v2481_v0 = vmax.f32 %v2478_v62, %v899_v63 }
 0x45d   : > { %v917_v1 = vsub.f32 %v2478_v62, %v2481_v0  ;;  %1259 = vst.msk [vmem:[#allocation8 + $0x30] sm:$0xff] %vm1059_vm0, %v2481_v0 }
 0x461   : > { %v887_v3 = vpop.xlane.xlu1 %886 }
 0x462   : > { %v905_v4 = vmax.f32 %v873_v2, %v887_v3 }
 0x464   : > { %1255 = vst.msk [vmem:[#allocation8 + $0x10] sm:$0xff] %vm1059_vm0, %v905_v4  ;;  %947 = vperm.xlu2 %1978, %v905_v4   ;;  %v913_v8 = vsub.f32 %v873_v2, %v905_v4 }
 0x466   : > { %v923_v10 = vmul.f32 1.442695, %v913_v8 }
 0x468   : > { %1981 = vpow2.f32 %v923_v10 }
 0x469   : > { %v893_v6 = vpop.xlane.xlu2 %892 }
 0x46a   : > { %v907_v7 = vmax.f32 %v875_v5, %v893_v6 }
 0x46c   : > { %1257 = vst.msk [vmem:[#allocation8 + $0x20] sm:$0xff] %vm1059_vm0, %v907_v7  ;;  %957 = vperm.xlu0 %1979, %v907_v7   ;;  %730 = vrot.lane.b32.xlu2 %v728_v9, %s2187_s15  ;;  %v915_v20 = vsub.f32 %v875_v5, %v907_v7  ;;  %v864_v7 = vadd.s32 8, %v2534_v46  ;;  %v1011_v46 = vld [vmem:[#allocation9] sm:$0xff] }
 0x46e   : > { %v2508_v22 = vpop.eup %1981  ;;  %v927_v23 = vmul.f32 1.442695, %v915_v20  ;;  %vm870_vm3 = vcmp.ge.s32.totalorder %v864_v7, %v2532_v45 }
 0x470   : > { %1983 = vpow2.f32 %v927_v23 }
 0x471   : > { %v896_v13 = vpop.xlane.xlu0 %895  ;;  %v902_v14 = vpop.xlane.xlu2 %901  ;;  %1985 = vpow2.f32 %v919_v30 }
 0x472   : > { %v2494_v15 = vmax.f32 %v2489_v11, %v896_v13  ;;  %v2497_v16 = vmax.f32 %v2491_v12, %v902_v14 }
 0x474   : > { %v916_v18 = vsub.f32 %v2489_v11, %v2494_v15  ;;  %1258 = vst.msk [vmem:[#allocation8 + $0x28] sm:$0xff] %vm1059_vm0, %v2494_v15  ;;  %v918_v19 = vsub.f32 %v2491_v12, %v2497_v16  ;;  %703 = vrot.lane.b32.xlu0 %v701_v17, %s2188_s24  ;;  %942 = vperm.xlu2 %1978, %v2457_v52  }
 0x475   : > { %1260 = vst.msk [vmem:[#allocation8 + $0x38] sm:$0xff] %vm1059_vm0, %v2497_v16 }
 0x476   : > { %v2514_v28 = vpop.eup %1983  ;;  %v929_v45 = vmul.f32 1.442695, %v916_v18  ;;  %v1012_v18 = vld [vmem:[#allocation9 + $0x8] sm:$0xff] }
 0x477   : > { %v2523_v34 = vpop.eup %1985 }
 0x479   : > { %v890_v24 = vpop.xlane.xlu2 %889  ;;  %v717_v25 = vpop.permute.xlu1 %716 }
 0x47a   : > { %v906_v26 = vmax.f32 %v874_v21, %v890_v24  ;;  %720 = vst.msk [vmem:[#allocation5 + $0x4] sm:$0xf] %vm699_vm14, %v717_v25 }
 0x47c   : > { %1256 = vst.msk [vmem:[#allocation8 + $0x18] sm:$0xff] %vm1059_vm0, %v906_v26  ;;  %1088 = vperm.xlu0 %1979, %v2508_v22   ;;  %952 = vperm.xlu1 %1980, %v906_v26   ;;  %v914_v32 = vsub.f32 %v874_v21, %v906_v26 }
 0x47d   : > { %962 = vperm.xlu2 %1978, %v2494_v15  }
 0x47e   : > { %v925_v33 = vmul.f32 1.442695, %v914_v32 }
 0x480   : > { %1987 = vpow2.f32 %v925_v33 }
 0x481   : > { %v1133_v27 = vld [vmem:[#allocation5 + $0x4] sm:$0xf]  ;;  %v938_v35 = vpop.permute.xlu1 %937 }
 0x482   : > { %v1171_v29 = vsel %vm1144_vm1, %v1133_v27, 0  ;;  %v975_v36 = vsub.f32 %v2429_v37, %v938_v35 }
 0x483   : > { %1180 = vmatpush.bf16.msrb.mxu2 %v1171_v29 }
 0x484   : > { %1098 = vperm.xlu0 %1979, %v2514_v28   ;;  %967 = vperm.xlu1 %1980, %v2481_v0   ;;  %v983_v42 = vmul.f32 1.442695, %v975_v36 }
 0x485   : > { %972 = vperm.xlu2 %1978, %v2497_v16  }
 0x486   : > { %v2527_v40 = vpop.eup %1987  ;;  %1989 = vpow2.f32 %v983_v42 }
 0x487   : > { %1991 = vpow2.f32 %v921_v54 }
 0x48c   : > { %744 = vrot.lane.b32.xlu1 %v742_v31, %s2189_s17  ;;  %v1990_v47 = vpop.eup %1989 }
 0x48d   : > { %v1003_v37 = vsel %vm869_vm2, %v1990_v47, 0.0  ;;  %v2545_v61 = vpop.eup %1991 }
 0x48e   : > { %v1027_v49 = vsel %vm766_vm15, %v1003_v37, 0.0  ;;  %v1124_v13 = vpack.c.bf16 %v1003_v37, %v1003_v37 }
 0x490   : > { %v1138_v21 = vunpack.c.l.b16 %v1124_v13 }
 0x494   : > { %1078 = vperm.xlu1 %1980, %v2523_v34  }
 0x49c   : > { %1093 = vperm.xlu1 %1980, %v2527_v40  }
 0x4ae   : > { %1028 = vadd.xlane.f32.xlu2 %v1027_v49 }
 0x4be   : > { %v948_v57 = vpop.permute.xlu2 %947 }
 0x4bf   : > { %v977_v58 = vsub.f32 %v2450_v48, %v948_v57 }
 0x4c1   : > { %v987_v60 = vmul.f32 1.442695, %v977_v58 }
 0x4c3   : > { %1993 = vpow2.f32 %v987_v60 }
 0x4c6   : > { %1083 = vperm.xlu2 %1978, %v2545_v61   ;;  %v731_v63 = vpop.permute.xlu2 %730 }
 0x4c7   : > { %734 = vst.msk [vmem:[#allocation5 + $0x8] sm:$0xf] %vm699_vm14, %v731_v63  ;;  %v931_v63 = vmul.f32 1.442695, %v917_v1  ;;  %v933_v1 = vmul.f32 1.442695, %v918_v19 }
 0x4c9   : > { %v1994_v2 = vpop.eup %1993 }
 0x4ca   : > { %v2552_v3 = vsel %vm869_vm2, %v1994_v2, 0.0 }
 0x4cb   : > { %v1033_v50 = vsel %vm766_vm15, %v2552_v3, 0.0 }
 0x4cc   : > { %1034 = vadd.xlane.f32.xlu1 %v1033_v50 }
 0x4ce   : > { %v943_v48 = vpop.permute.xlu2 %942  ;;  %v1134_v52 = vld [vmem:[#allocation5 + $0x8] sm:$0xf] }
 0x4cf   : > { %v976_v4 = vsub.f32 %v2433_v39, %v943_v48  ;;  %v1196_v5 = vsel %vm1144_vm1, %v1134_v52, 0  ;;  %v1126_v52 = vpack.c.bf16 %v2552_v3, %v2552_v3 }
 0x4d0   : > { %1205 = vmatpush.bf16.msrb.mxu3 %v1196_v5 }
 0x4d1   : > { %v985_v6 = vmul.f32 1.442695, %v976_v4 }
 0x4d3   : > { %1995 = vpow2.f32 %v985_v6  ;;  %v1164_v6 = vunpack.c.l.b16 %v1126_v52 }
 0x4d7   : > { %v963_v8 = vpop.permute.xlu2 %962 }
 0x4d8   : > { %v980_v9 = vsub.f32 %v2467_v56, %v963_v8 }
 0x4d9   : > { %v1996_v10 = vpop.eup %1995 }
 0x4da   : > { %v993_v14 = vmul.f32 1.442695, %v980_v9  ;;  %v1004_v17 = vsel %vm870_vm3, %v1996_v10, 0.0 }
 0x4db   : > { %v1030_v39 = vsel %vm766_vm15, %v1004_v17, 0.0  ;;  %v1125_v20 = vpack.c.bf16 %v1004_v17, %v1004_v17 }
 0x4dc   : > { %1997 = vpow2.f32 %v993_v14  ;;  %1031 = vadd.xlane.f32.xlu0 %v1030_v39 }
 0x4dd   : > { %v1139_v23 = vunpack.c.l.b16 %v1125_v20 }
 0x4de   : > { %v958_v24 = vpop.permute.xlu0 %957 }
 0x4df   : > { %v979_v25 = vsub.f32 %v2459_v53, %v958_v24  ;;  %v973_v26 = vpop.permute.xlu2 %972  ;;  %v1140_v56 = vpack.c.b16 %v1139_v23, %v1138_v21  ;;  %v1019_v23 = vmul.f32 %v2523_v34, %v1011_v46  ;;  %v1020_v34 = vmul.f32 %v2545_v61, %v1012_v18 }
 0x4e0   : > { %v982_v27 = vsub.f32 %v2465_v55, %v973_v26 }
 0x4e1   : > { %v991_v29 = vmul.f32 1.442695, %v979_v25 }
 0x4e2   : > { %v1998_v30 = vpop.eup %1997  ;;  %v997_v31 = vmul.f32 1.442695, %v982_v27 }
 0x4e3   : > { %1999 = vpow2.f32 %v991_v29  ;;  %v1008_v32 = vsel %vm870_vm3, %v1998_v30, 0.0  ;;  %v1013_v29 = vld [vmem:[#allocation9 + $0x10] sm:$0xff] }
 0x4e4   : > { %v1042_v33 = vsel %vm766_vm15, %v1008_v32, 0.0  ;;  %2001 = vpow2.f32 %v997_v31  ;;  %v1129_v53 = vpack.c.bf16 %v1008_v32, %v1008_v32  ;;  %v1021_v31 = vmul.f32 %v2508_v22, %v1013_v29 }
 0x4e5   : > { %1043 = vadd.xlane.f32.xlu1 %v1042_v33 }
 0x4e6   : > { %v704_v35 = vpop.permute.xlu0 %703  ;;  %v1190_v44 = vunpack.c.l.b16 %v1129_v53 }
 0x4e7   : > { %706 = vst.msk [vmem:[#allocation5] sm:$0xf] %vm699_vm14, %v704_v35 }
 0x4e9   : > { %v2000_v36 = vpop.eup %1999 }
 0x4ea   : > { %v1007_v55 = vsel %vm869_vm2, %v2000_v36, 0.0  ;;  %v2002_v43 = vpop.eup %2001  ;;  %v1016_v36 = vld [vmem:[#allocation9 + $0x28] sm:$0xff] }
 0x4eb   : > { %v1039_v38 = vsel %vm766_vm15, %v1007_v55, 0.0  ;;  %v1128_v42 = vpack.c.bf16 %v1007_v55, %v1007_v55  ;;  %v1010_v58 = vsel %vm870_vm3, %v2002_v43, 0.0 }
 0x4ec   : > { %1040 = vadd.xlane.f32.xlu0 %v1039_v38  ;;  %v1048_v2 = vsel %vm766_vm15, %v1010_v58, 0.0  ;;  %v1131_v10 = vpack.c.bf16 %v1010_v58, %v1010_v58 }
 0x4ed   : > { %v1189_v47 = vunpack.c.l.b16 %v1128_v42  ;;  %v1015_v42 = vld [vmem:[#allocation9 + $0x20] sm:$0xff] }
 0x4ee   : > { %v953_v37 = vpop.permute.xlu1 %952  ;;  %v1132_v49 = vld [vmem:[#allocation5] sm:$0xf]  ;;  %v1215_v17 = vunpack.c.l.b16 %v1131_v10  ;;  %v1089_v30 = vpop.permute.xlu0 %1088  ;;  %v1023_v22 = vmul.f32 %v2514_v28, %v1015_v42  ;;  %v1069_v28 = vld [vmem:[#allocation10 + $0x8] sm:$0xff] }
 0x4ef   : > { %v1191_v51 = vpack.c.b16 %v1190_v44, %v1189_v47  ;;  %v978_v54 = vsub.f32 %v2473_v59, %v953_v37  ;;  %v1146_v57 = vsel %vm1144_vm1, %v1132_v49, 0  ;;  %v1018_v47 = vld [vmem:[#allocation9 + $0x38] sm:$0xff] }
 0x4f0   : > { %1155 = vmatpush.bf16.msrb.mxu1 %v1146_v57  ;;  %v1072_v57 = vld [vmem:[#allocation10 + $0x20] sm:$0xff] }
 0x4f1   : > { %v989_v60 = vmul.f32 1.442695, %v978_v54  ;;  %1780 = vmatmul.msk.bf16.vlgmr.msrb.gmra.mxu3 %vm766_vm15, %v1191_v51  ;;  %v1068_v51 = vld [vmem:[#allocation10] sm:$0xff] }
 0x4f3   : > { %2003 = vpow2.f32 %v989_v60  ;;  %1778 = vmatmul.msk.bf16.vlgmr.msrb.gmra.mxu1 %vm766_vm15, %v1140_v56 }
 0x4f4   : > { %1049 = vadd.xlane.f32.xlu0 %v1048_v2  ;;  %2005 = vpow2.f32 %v931_v63 }
 0x4f6   : > { %v968_v59 = vpop.permute.xlu1 %967  ;;  %v1099_v15 = vpop.permute.xlu0 %1098 }
 0x4f7   : > { %v981_v50 = vsub.f32 %v2437_v41, %v968_v59  ;;  %v1120_v2 = vmul.f32 %v1099_v15, %v1072_v57 }
 0x4f9   : > { %v2004_v48 = vpop.eup %2003  ;;  %v995_v5 = vmul.f32 1.442695, %v981_v50  ;;  %v1017_v50 = vld [vmem:[#allocation9 + $0x30] sm:$0xff] }
 0x4fa   : > { %v1006_v4 = vsel %vm870_vm3, %v2004_v48, 0.0  ;;  %v2589_v0 = vpop.eup %2005 }
 0x4fb   : > { %v1127_v62 = vpack.c.bf16 %v1006_v4, %v1006_v4  ;;  %2007 = vpow2.f32 %v995_v5  ;;  %v1036_v21 = vsel %vm766_vm15, %v1006_v4, 0.0  ;;  %v1025_v4 = vmul.f32 %v2589_v0, %v1017_v50 }
 0x4fc   : > { %2009 = vpow2.f32 %v933_v1 }
 0x4fd   : > { %v1165_v8 = vunpack.c.l.b16 %v1127_v62  ;;  %2011 = vpow2.f32 %v929_v45 }
 0x4fe   : > { %1108 = vperm.xlu1 %1980, %v2589_v0   ;;  %v745_v41 = vpop.permute.xlu1 %744 }
 0x4ff   : > { %v1166_v9 = vpack.c.b16 %v1165_v8, %v1164_v6  ;;  %748 = vst.msk [vmem:[#allocation5 + $0xc] sm:$0xf] %vm699_vm14, %v745_v41  ;;  %v1014_v8 = vld [vmem:[#allocation9 + $0x18] sm:$0xff] }
 0x500   : > { %v1022_v41 = vmul.f32 %v2527_v40, %v1014_v8 }
 0x501   : > { %1779 = vmatmul.msk.bf16.vlgmr.msrb.gmra.mxu2 %vm766_vm15, %v1166_v9  ;;  %v2008_v3 = vpop.eup %2007  ;;  %v1070_v9 = vld [vmem:[#allocation10 + $0x10] sm:$0xff] }
 0x502   : > { %v1009_v7 = vsel %vm869_vm2, %v2008_v3, 0.0  ;;  %v2010_v13 = vpop.eup %2009  ;;  %v1118_v10 = vmul.f32 %v1089_v30, %v1070_v9 }
 0x503   : > { %v1045_v12 = vsel %vm766_vm15, %v1009_v7, 0.0  ;;  %v1130_v16 = vpack.c.bf16 %v1009_v7, %v1009_v7  ;;  %v2012_v26 = vpop.eup %2011  ;;  %v1026_v37 = vmul.f32 %v2010_v13, %v1018_v47 }
 0x504   : > { %1046 = vadd.xlane.f32.xlu2 %v1045_v12  ;;  %v1024_v53 = vmul.f32 %v2012_v26, %v1016_v36 }
 0x505   : > { %v1214_v19 = vunpack.c.l.b16 %v1130_v16  ;;  %v1074_v16 = vld [vmem:[#allocation10 + $0x30] sm:$0xff] }
 0x506   : > { %v1135_v14 = vld [vmem:[#allocation5 + $0xc] sm:$0xf]  ;;  %v1079_v56 = vpop.permute.xlu1 %1078 }
 0x507   : > { %v1221_v39 = vsel %vm1144_vm1, %v1135_v14, 0  ;;  %v1216_v20 = vpack.c.b16 %v1215_v17, %v1214_v19  ;;  %v1116_v54 = vmul.f32 %v1079_v56, %v1068_v51  ;;  %v1071_v14 = vld [vmem:[#allocation10 + $0x18] sm:$0xff] }
 0x508   : > { %1113 = vperm.xlu0 %1979, %v2010_v13   ;;  %1230 = vmatpush.bf16.msra.mxu0 %v1221_v39  ;;  %v1073_v13 = vld [vmem:[#allocation10 + $0x28] sm:$0xff] }
 0x50b   : > { %1781 = vmatmul.msk.bf16.vlgmr.msra.gmra.mxu0 %vm766_vm15, %v1216_v20 }
 0x50c   : > { %1037 = vadd.xlane.f32.xlu2 %v1036_v21 }
 0x50e   : > { %v2609_v27 = vpop.permute.xlu1 %1093 }
 0x50f   : > { %v1119_v46 = vmul.f32 %v2609_v27, %v1071_v14 }
 0x521   : > { %v1029_v24 = vpop.xlane.xlu2 %1028 }
 0x522   : > { %v1051_v25 = vadd.f32 %v1029_v24, %v1019_v23 }
 0x524   : > { %1060 = vst.msk [vmem:[#allocation9] sm:$0xff] %vm1059_vm0, %v1051_v25  ;;  %1103 = vperm.xlu2 %1978, %v2012_v26   ;;  %v1075_v25 = vld [vmem:[#allocation10 + $0x38] sm:$0xff] }
 0x529   : > { %v1084_v58 = vpop.permute.xlu2 %1083 }
 0x52a   : > { %v1117_v52 = vmul.f32 %v1084_v58, %v1069_v28 }
 0x53f   : > { %v1035_v32 = vpop.xlane.xlu1 %1034 }
 0x540   : > { %v1053_v11 = vadd.f32 %v1035_v32, %v1021_v31 }
 0x542   : > { %1062 = vst.msk [vmem:[#allocation9 + $0x10] sm:$0xff] %vm1059_vm0, %v1053_v11 }
 0x54f   : > { %v1032_v33 = vpop.xlane.xlu0 %1031 }
 0x550   : > { %v1052_v35 = vadd.f32 %v1032_v33, %v1020_v34 }
 0x552   : > { %1061 = vst.msk [vmem:[#allocation9 + $0x8] sm:$0xff] %vm1059_vm0, %v1052_v35 }
 0x558   : > { %v1044_v55 = vpop.xlane.xlu1 %1043 }
 0x559   : > { %v1056_v38 = vadd.f32 %v1044_v55, %v1024_v53 }
 0x55b   : > { %1065 = vst.msk [vmem:[#allocation9 + $0x28] sm:$0xff] %vm1059_vm0, %v1056_v38 }
 0x55f   : > { %v1041_v43 = vpop.xlane.xlu0 %1040 }
 0x560   : > { %v1055_v44 = vadd.f32 %v1041_v43, %v1023_v22 }
 0x562   : > { %1064 = vst.msk [vmem:[#allocation9 + $0x20] sm:$0xff] %vm1059_vm0, %v1055_v44 }
 0x567   : > { %v1050_v61 = vpop.xlane.xlu0 %1049 }
 0x568   : > { %v1058_v49 = vadd.f32 %v1050_v61, %v1026_v37 }
 0x56a   : > { %1067 = vst.msk [vmem:[#allocation9 + $0x38] sm:$0xff] %vm1059_vm0, %v1058_v49 }
 0x570   : > { %v1157_v60 = vpop.f32.mrf.mxu1  ;;  %v1109_v0 = vpop.permute.xlu1 %1108 }
 0x571   : > { %v1237_v63 = vadd.f32 %v1157_v60, %v1116_v54  ;;  %v1122_v17 = vmul.f32 %v1109_v0, %v1074_v16 }
 0x573   : > { %1245 = vst.msk [vmem:[#allocation10] sm:$0xff] %vm766_vm15, %v1237_v63 }
 0x574   : > { %v1207_v59 = vpop.f32.mrf.mxu3 }
 0x575   : > { %v1241_v48 = vadd.f32 %v1207_v59, %v1120_v2 }
 0x577   : > { %1249 = vst.msk [vmem:[#allocation10 + $0x20] sm:$0xff] %vm766_vm15, %v1241_v48  ;;  %v1047_v5 = vpop.xlane.xlu2 %1046 }
 0x578   : > { %v1159_v62 = vpop.f32.mrf.mxu1  ;;  %v1057_v1 = vadd.f32 %v1047_v5, %v1025_v4 }
 0x579   : > { %v1238_v6 = vadd.f32 %v1159_v62, %v1117_v52 }
 0x57a   : > { %1066 = vst.msk [vmem:[#allocation9 + $0x30] sm:$0xff] %vm1059_vm0, %v1057_v1  ;;  %v1114_v26 = vpop.permute.xlu0 %1113 }
 0x57b   : > { %1246 = vst.msk [vmem:[#allocation10 + $0x8] sm:$0xff] %vm766_vm15, %v1238_v6  ;;  %v1123_v29 = vmul.f32 %v1114_v26, %v1075_v25 }
 0x57c   : > { %v1209_v45 = vpop.f32.mrf.mxu3 }
 0x57f   : > { %v1038_v3 = vpop.xlane.xlu2 %1037 }
 0x580   : > { %v1054_v7 = vadd.f32 %v1038_v3, %v1022_v41 }
 0x582   : > { %1063 = vst.msk [vmem:[#allocation9 + $0x18] sm:$0xff] %vm1059_vm0, %v1054_v7 }
 0x584   : > { %v1182_v12 = vpop.f32.mrf.mxu2 }
 0x585   : > { %v1239_v19 = vadd.f32 %v1182_v12, %v1118_v10 }
 0x587   : > { %1247 = vst.msk [vmem:[#allocation10 + $0x10] sm:$0xff] %vm766_vm15, %v1239_v19  ;;  %v1104_v39 = vpop.permute.xlu2 %1103 }
 0x588   : > { %v1121_v20 = vmul.f32 %v1104_v39, %v1073_v13  ;;  %v1232_v21 = vpop.f32.mrf.mxu0 }
 0x589   : > { %v1243_v40 = vadd.f32 %v1232_v21, %v1122_v17 }
 0x58a   : > { %v1242_v23 = vadd.f32 %v1209_v45, %v1121_v20 }
 0x58b   : > { %1251 = vst.msk [vmem:[#allocation10 + $0x30] sm:$0xff] %vm766_vm15, %v1243_v40 }
 0x58c   : > { %v1184_v24 = vpop.f32.mrf.mxu2  ;;  %1250 = vst.msk [vmem:[#allocation10 + $0x28] sm:$0xff] %vm766_vm15, %v1242_v23 }
 0x58d   : > { %v1240_v56 = vadd.f32 %v1184_v24, %v1119_v46 }
 0x58f   : > { %1248 = vst.msk [vmem:[#allocation10 + $0x18] sm:$0xff] %vm766_vm15, %v1240_v56  ;;  %1264 = sbr.rel (%p1782_p4) target bundleno = 2388 (0x954), region = 84 }
 0x590   : > { %v1234_v30 = vpop.f32.mrf.mxu0 }
 0x591   : > { %v1244_v31 = vadd.f32 %v1234_v30, %v1123_v29 }
 0x593   : > { %1252 = vst.msk [vmem:[#allocation10 + $0x38] sm:$0xff] %vm766_vm15, %v1244_v31 }
 0x594   : > { %v1326_v27 = vld [vmem:[#allocation9 + $0x20] sm:$0xff]  ;;  %v1293_v32 = vld [vmem:[#allocation9 + $0x10] sm:$0xff]  ;;  %v2190_v11 = vmov 0   ;;  %v1327_v15 = vld [vmem:[#allocation9 + $0x28] sm:$0xff]  ;;  %vm1319_vm4 = vcmask 126016   ;;  %vm1352_vm5 = vcmask 191616  }
 0x595   : > { %2014 = vset.pattern.permute.xlu1 %v2190_v11  ;;  %2013 = vset.pattern.permute.xlu0 %v2190_v11  ;;  %2021 = vrcp.f32 %v1326_v27  ;;  %v1359_v18 = vld [vmem:[#allocation9 + $0x30] sm:$0xff]  ;;  %v1294_v34 = vld [vmem:[#allocation9 + $0x18] sm:$0xff]  ;;  %v1270_v55 = vld [vmem:[#allocation9 + $0x8] sm:$0xff]  ;;  %vm1385_vm6 = vcmask 257216  }
 0x596   : > { %2023 = vrcp.f32 %v1293_v32  ;;  %2015 = vset.pattern.permute.xlu2 %v2190_v11  ;;  %v1360_v36 = vld [vmem:[#allocation9 + $0x38] sm:$0xff]  ;;  %v1269_v42 = vld [vmem:[#allocation9] sm:$0xff]  ;;  %v1290_v49 = vld [vmem:[#allocation10 + $0x10] sm:$0xff] }
 0x597   : > { %2025 = vrcp.f32 %v1327_v15  ;;  %v1323_v61 = vld [vmem:[#allocation10 + $0x20] sm:$0xff]  ;;  %v1324_v50 = vld [vmem:[#allocation10 + $0x28] sm:$0xff]  ;;  %v1291_v48 = vld [vmem:[#allocation10 + $0x18] sm:$0xff] }
 0x598   : > { %2027 = vrcp.f32 %v1359_v18  ;;  %v1356_v41 = vld [vmem:[#allocation10 + $0x30] sm:$0xff]  ;;  %v1268_v9 = vld [vmem:[#allocation10 + $0x8] sm:$0xff]  ;;  %v1267_v3 = vld [vmem:[#allocation10] sm:$0xff] }
 0x599   : > { %2029 = vrcp.f32 %v1294_v34  ;;  %v1853_v39 = vld [vmem:[%s2750_s3 + $0x8] sm:$0xff]  ;;  %v1852_v20 = vld [vmem:[%s2750_s3] sm:$0xff]  ;;  %v2194_v34 = vmov 32.0  }
 0x59a   : > { %2031 = vrcp.f32 %v1360_v36  ;;  %v1357_v60 = vld [vmem:[#allocation10 + $0x38] sm:$0xff]  ;;  %1424 = vmatpush.bf16.msra.mxu0 %v1853_v39  ;;  %v2016_v25 = vld [vmem:[%s2751_s4] ss:$0 sm:$0xff] }
 0x59b   : > { %v2022_v33 = vpop.eup %2021  ;;  %2033 = vrcp.f32 %v1270_v55  ;;  %v1265_v26 = vld [vmem:[%s2355_s9] sm:$0xff]  ;;  %v1266_v27 = vld [vmem:[%s2355_s9 + $0x8] sm:$0xff] }
 0x59c   : > { %v2024_v35 = vpop.eup %2023  ;;  %1332 = vperm.xlu1 %2014, %v2022_v33   ;;  %2035 = vrcp.f32 %v1269_v42 }
 0x59d   : > { %1299 = vperm.xlu0 %2013, %v2024_v35   ;;  %v2026_v53 = vpop.eup %2025  ;;  %2037 = vrcp.f32 %v2194_v34 }
 0x59e   : > { %v2028_v38 = vpop.eup %2027  ;;  %1425 = vmatpush.bf16.msra.mxu0 %v1852_v20 }
 0x59f   : > { %v2030_v22 = vpop.eup %2029  ;;  %1365 = vperm.xlu2 %2015, %v2028_v38  }
 0x5a0   : > { %v2032_v43 = vpop.eup %2031 }
 0x5a1   : > { %v2034_v44 = vpop.eup %2033 }
 0x5a2   : > { %v2036_v47 = vpop.eup %2035 }
 0x5a3   : > { %v2038_v33 = vpop.eup %2037 }
 0x5a4   : > { %1337 = vperm.xlu1 %2014, %v2026_v53   ;;  %v1443_v35 = vmul.f32 32.0, %v2038_v33  ;;  %vm1447_vm7 = vweird.f32 %v2038_v33 }
 0x5a5   : > { %1304 = vperm.xlu0 %2013, %v2030_v22  }
 0x5a6   : > { %v1444_v36 = vsub.f32 1.0, %v1443_v35  ;;  %v2020_v35 = vld [vmem:[%s2759_s12] ss:$0 sm:$0xff] }
 0x5a7   : > { %1370 = vperm.xlu2 %2015, %v2032_v43  }
 0x5a8   : > { %v1445_v53 = vmul.f32 %v2038_v33, %v1444_v36 }
 0x5aa   : > { %v1446_v55 = vadd.f32 %v2038_v33, %v1445_v53 }
 0x5ac   : > { %1280 = vperm.xlu1 %2014, %v2034_v44   ;;  %v1448_v38 = vsel %vm1447_vm7, %v2038_v33, %v1446_v55 }
 0x5ad   : > { %1275 = vperm.xlu0 %2013, %v2036_v47  }
 0x5f9   : > { %v1366_v37 = vpop.permute.xlu2 %1365 }
 0x5fa   : > { %v1373_v7 = vmul.f32 %v1366_v37, %v1356_v41 }
 0x5fc   : > { %v1375_v13 = vpack.c.bf16 %v1373_v7, %v1373_v7 }
 0x601   : > { %v1371_v63 = vpop.permute.xlu2 %1370 }
 0x602   : > { %v1374_v59 = vmul.f32 %v1371_v63, %v1357_v60 }
 0x604   : > { %v1376_v4 = vpack.c.bf16 %v1374_v59, %v1374_v59 }
 0x60e   : > { %v1333_v51 = vpop.permute.xlu1 %1332 }
 0x60f   : > { %v1340_v54 = vmul.f32 %v1333_v51, %v1323_v61  ;;  %v1300_v57 = vpop.permute.xlu0 %1299 }
 0x610   : > { %v1307_v58 = vmul.f32 %v1300_v57, %v1290_v49  ;;  %v1855_v57 = vld [vmem:[#allocation11 + $0x8] sm:$0xff] }
 0x611   : > { %v1342_v2 = vpack.c.bf16 %v1340_v54, %v1340_v54  ;;  %1527 = vmatpush.bf16.msra.mxu1 %v1855_v57 }
 0x612   : > { %v1309_v28 = vpack.c.bf16 %v1307_v58, %v1307_v58  ;;  %v1854_v58 = vld [vmem:[#allocation11] sm:$0xff] }
 0x613   : > { %1346 = vrot.lane.b32.xlu1 %v1342_v2, %s2191_s28 }
 0x614   : > { %1313 = vrot.lane.b32.xlu2 %v1309_v28, %s2192_s18  ;;  %v1863_v28 = vld [vmem:[%s2758_s11 + $0x38] sm:$0xff] }
 0x615   : > { %1528 = vmatpush.bf16.msra.mxu1 %v1854_v58  ;;  %1606 = vmatpush.bf16.msra.mxu2 %v1863_v28 }
 0x616   : > { %v1338_v52 = vpop.permute.xlu1 %1337 }
 0x617   : > { %v1341_v5 = vmul.f32 %v1338_v52, %v1324_v50  ;;  %v1305_v62 = vpop.permute.xlu0 %1304 }
 0x618   : > { %v1308_v1 = vmul.f32 %v1305_v62, %v1291_v48  ;;  %v1862_v48 = vld [vmem:[%s2758_s11 + $0x30] sm:$0xff]  ;;  %v1861_v62 = vld [vmem:[%s2758_s11 + $0x28] sm:$0xff] }
 0x619   : > { %v1343_v6 = vpack.c.bf16 %v1341_v5, %v1341_v5  ;;  %1607 = vmatpush.bf16.msra.mxu2 %v1862_v48 }
 0x61a   : > { %v1310_v8 = vpack.c.bf16 %v1308_v1, %v1308_v1 }
 0x61b   : > { %1381 = vrot.lane.b32.xlu1 %v1376_v4, %s2193_s30 }
 0x61c   : > { %1348 = vrot.lane.b32.xlu2 %v1343_v6, %s2191_s28  ;;  %1315 = vrot.lane.b32.xlu0 %v1310_v8, %s2192_s18  ;;  %v1860_v8 = vld [vmem:[%s2758_s11 + $0x20] sm:$0xff] }
 0x61d   : > { %1608 = vmatpush.bf16.msra.mxu2 %v1861_v62 }
 0x61e   : > { %v1281_v10 = vpop.permute.xlu1 %1280 }
 0x61f   : > { %v1284_v12 = vmul.f32 %v1281_v10, %v1268_v9  ;;  %v1276_v16 = vpop.permute.xlu0 %1275 }
 0x620   : > { %v1283_v0 = vmul.f32 %v1276_v16, %v1267_v3 }
 0x621   : > { %v1286_v19 = vpack.c.bf16 %v1284_v12, %v1284_v12  ;;  %1609 = vmatpush.bf16.msra.mxu2 %v1860_v8 }
 0x622   : > { %v1285_v14 = vpack.c.bf16 %v1283_v0, %v1283_v0 }
 0x623   : > { %1288 = vst.msk [vmem:[#allocation7 + $0x4] sm:$0xf] %vm699_vm14, %v1286_v19 }
 0x624   : > { %1287 = vst.msk [vmem:[#allocation7] sm:$0xf] %vm699_vm14, %v1285_v14  ;;  %1379 = vrot.lane.b32.xlu0 %v1375_v13, %s2193_s30  ;;  %v2017_v13 = vld [vmem:[%s2754_s7] ss:$0 sm:$0xff] }
 0x66e   : > { %v1314_v17 = vpop.permute.xlu2 %1313 }
 0x66f   : > { %1320 = vst.msk [vmem:[#allocation7] sm:$0xf] %vm1319_vm4, %v1314_v17 }
 0x676   : > { %v1349_v40 = vpop.permute.xlu2 %1348 }
 0x685   : > { %v1347_v21 = vpop.permute.xlu1 %1346 }
 0x686   : > { %1353 = vst.msk [vmem:[#allocation7] sm:$0xf] %vm1352_vm5, %v1347_v21  ;;  %v2018_v21 = vld [vmem:[%s2755_s8] ss:$0 sm:$0xff] }
 0x68d   : > { %v1382_v46 = vpop.permute.xlu1 %1381 }
 0x68e   : > { %v1316_v45 = vpop.permute.xlu0 %1315 }
 0x68f   : > { %1321 = vst.msk [vmem:[#allocation7 + $0x4] sm:$0xf] %vm1319_vm4, %v1316_v45 }
 0x690   : > { %1354 = vst.msk [vmem:[#allocation7 + $0x4] sm:$0xf] %vm1352_vm5, %v1349_v40 }
 0x691   : > { %1387 = vst.msk [vmem:[#allocation7 + $0x4] sm:$0xf] %vm1385_vm6, %v1382_v46 }
 0x696   : > { %v1380_v23 = vpop.permute.xlu0 %1379 }
 0x697   : > { %1386 = vst.msk [vmem:[#allocation7] sm:$0xf] %vm1385_vm6, %v1380_v23 }
 0x69e   : > { %v1851_v24 = vld [vmem:[#allocation7] sm:$0xff] }
 0x69f   : > { %1795 = vmatmul.msk.bf16.vlgmr.msra.gmra.mxu0 %vm678_vm12, %v1851_v24  ;;  %v1859_v24 = vld [vmem:[%s2758_s11 + $0x18] sm:$0xff] }
 0x6a0   : > { %1610 = vmatpush.bf16.msra.mxu2 %v1859_v24 }
 0x71c   : > { %v1427_v56 = vpop.f32.mrf.mxu0 }
 0x71d   : > { %v1428_v29 = vadd.f32 %v2016_v25, %v1427_v56  ;;  %v1856_v56 = vld [vmem:[%s2758_s11] sm:$0xff] }
 0x71f   : > { %v2646_v30 = vadd.f32 %v1428_v29, %v1265_v26  ;;  %v1857_v26 = vld [vmem:[%s2758_s11 + $0x8] sm:$0xff] }
 0x721   : > { %v1436_v31 = vsel %vm678_vm12, %v2646_v30, 0.0 }
 0x722   : > { %1437 = vadd.xlane.f32.xlu2 %v1436_v31  ;;  %v2019_v31 = vld [vmem:[%s2757_s10] ss:$0 sm:$0xff] }
 0x724   : > { %v1429_v32 = vpop.f32.mrf.mxu0 }
 0x725   : > { %v1430_v11 = vadd.f32 %v2016_v25, %v1429_v32  ;;  %v1858_v25 = vld [vmem:[%s2758_s11 + $0x10] sm:$0xff] }
 0x726   : > { %1611 = vmatpush.bf16.msra.mxu2 %v1858_v25 }
 0x727   : > { %v2651_v15 = vadd.f32 %v1430_v11, %v1266_v27 }
 0x729   : > { %v1439_v18 = vsel %vm678_vm12, %v2651_v15, 0.0 }
 0x72a   : > { %1440 = vadd.xlane.f32.xlu0 %v1439_v18  ;;  %1612 = vmatpush.bf16.msra.mxu2 %v1857_v26 }
 0x72e   : > { %1613 = vmatpush.bf16.msra.mxu2 %v1856_v56 }
 0x795   : > { %v1438_v42 = vpop.xlane.xlu2 %1437 }
 0x796   : > { %v1449_v22 = vmul.f32 %v1448_v38, %v1438_v42 }
 0x798   : > { %v1451_v43 = vsub.f32 %v2646_v30, %v1449_v22 }
 0x79a   : > { %v1453_v44 = vmul.f32 %v1451_v43, %v1451_v43 }
 0x79c   : > { %v1455_v47 = vsel %vm678_vm12, %v1453_v44, 0.0 }
 0x79d   : > { %v1441_v37 = vpop.xlane.xlu0 %1440  ;;  %1456 = vadd.xlane.f32.xlu1 %v1455_v47 }
 0x79e   : > { %v1450_v61 = vmul.f32 %v1448_v38, %v1441_v37 }
 0x7a0   : > { %v1452_v49 = vsub.f32 %v2651_v15, %v1450_v61 }
 0x7a2   : > { %v1454_v51 = vmul.f32 %v1452_v49, %v1452_v49 }
 0x7a4   : > { %v1458_v54 = vsel %vm678_vm12, %v1454_v51, 0.0 }
 0x7a5   : > { %1459 = vadd.xlane.f32.xlu2 %v1458_v54 }
 0x810   : > { %v1457_v60 = vpop.xlane.xlu1 %1456 }
 0x811   : > { %v1461_v63 = vmul.f32 %v1457_v60, %v1448_v38 }
 0x813   : > { %v1463_v2 = vadd.f32 1e-05, %v1461_v63 }
 0x815   : > { %2039 = vrsqrt.f32 %v1463_v2  ;;  %vm1471_vm9 = vweird.f32 %v1463_v2 }
 0x818   : > { %v1460_v59 = vpop.xlane.xlu2 %1459 }
 0x819   : > { %v1462_v50 = vmul.f32 %v1460_v59, %v1448_v38 }
 0x81b   : > { %v2040_v52 = vpop.eup %2039  ;;  %v1464_v4 = vadd.f32 1e-05, %v1462_v50 }
 0x81c   : > { %v1466_v5 = vmul.f32 %v2040_v52, %v1463_v2  ;;  %vm1472_vm8 = vweird.f32 %v2040_v52 }
 0x81d   : > { %2041 = vrsqrt.f32 %v1464_v4  ;;  %vm1473_vm10 = vmor %vm1471_vm9, %vm1472_vm8  ;;  %vm1481_vm13 = vweird.f32 %v1464_v4 }
 0x81e   : > { %v1467_v1 = vmul.f32 %v2040_v52, %v1466_v5 }
 0x820   : > { %v1468_v6 = vmul.f32 0.5, %v1467_v1 }
 0x822   : > { %v1469_v41 = vsub.f32 1.5, %v1468_v6 }
 0x823   : > { %v2042_v9 = vpop.eup %2041 }
 0x824   : > { %v1470_v3 = vmul.f32 %v2040_v52, %v1469_v41  ;;  %v1476_v7 = vmul.f32 %v2042_v9, %v1464_v4  ;;  %vm1482_vm11 = vweird.f32 %v2042_v9 }
 0x825   : > { %vm1483_vm14 = vmor %vm1481_vm13, %vm1482_vm11 }
 0x826   : > { %v1477_v10 = vmul.f32 %v2042_v9, %v1476_v7  ;;  %v1474_v16 = vsel %vm1473_vm10, %v2040_v52, %v1470_v3 }
 0x827   : > { %v1485_v19 = vmul.f32 %v1474_v16, %v1451_v43 }
 0x828   : > { %v1478_v12 = vmul.f32 0.5, %v1477_v10 }
 0x829   : > { %v1490_v20 = vmul.f32 %v2017_v13, %v1485_v19 }
 0x82a   : > { %v1479_v0 = vsub.f32 1.5, %v1478_v12 }
 0x82b   : > { %v1495_v40 = vadd.f32 %v2018_v21, %v1490_v20 }
 0x82c   : > { %v1480_v14 = vmul.f32 %v2042_v9, %v1479_v0 }
 0x82e   : > { %v1484_v17 = vsel %vm1483_vm14, %v2042_v9, %v1480_v14 }
 0x82f   : > { %v1486_v39 = vmul.f32 %v1484_v17, %v1452_v49 }
 0x831   : > { %v1491_v45 = vmul.f32 %v2017_v13, %v1486_v39 }
 0x833   : > { %v1496_v46 = vadd.f32 %v2018_v21, %v1491_v45 }
 0x835   : > { %v1497_v23 = vpack.c.bf16 %v1496_v46, %v1495_v40 }
 0x837   : > { %1804 = vmatmul.msk.bf16.vlgmr.msra.gmra.mxu1 %vm678_vm12, %v1497_v23 }
 0x8b4   : > { %v1530_v29 = vpop.f32.mrf.mxu1 }
 0x8b5   : > { %v1531_v27 = vadd.f32 %v2019_v31, %v1530_v29 }
 0x8b7   : > { %v1535_v18 = vmax.f32 %v1531_v27, 0.0 }
 0x8bc   : > { %v1532_v32 = vpop.f32.mrf.mxu1 }
 0x8bd   : > { %v1533_v11 = vadd.f32 %v2019_v31, %v1532_v32 }
 0x8bf   : > { %v1536_v34 = vmax.f32 %v1533_v11, 0.0 }
 0x8c1   : > { %v1537_v33 = vpack.c.bf16 %v1536_v34, %v1535_v18 }
 0x8c3   : > { %1614 = vmatmul.bf16.vlgmr.msra.gmra.mxu2 %v1537_v33 }
 0x946   : > { %v1615_v36 = vpop.f32.mrf.mxu2 }
 0x947   : > { %v1616_v53 = vadd.f32 %v2020_v35, %v1615_v36 }
 0x949   : > { %v1620_v55 = vadd.f32 %v1616_v53, %v2646_v30 }
 0x94b   : > { %1622 = vst.msk [vmem:[%s2357_s13] sm:$0xff] %vm678_vm12, %v1620_v55 }
 0x94e   : > { %v1617_v38 = vpop.f32.mrf.mxu2 }
 0x94f   : > { %v1618_v42 = vadd.f32 %v2020_v35, %v1617_v38 }
 0x951   : > { %v1621_v22 = vadd.f32 %v1618_v42, %v2651_v15 }
 0x953   : > { %1623 = vst.msk [vmem:[%s2357_s13 + $0x8] sm:$0xff] %vm678_vm12, %v1621_v22 }
 0x954 PF: > { %s1864_s18 = sshll.u32 %s2159_s29, 4  ;;  %s2788_s22 = sld [smem:[#allocation27_spill]] }
 0x955   : > { %s1637_s20 = sshll.u32 %s2357_s13, 4  ;;  %s1625_s24 = scalar_lea.sflag [#allocation13], %s460_s16  ;;  %s1638_s20 = int_to_ptr.vmem [resolvable:$true] %s1637_s20 }
 0x95a   : > { %s1636_s23 = scalar_lea.hbm %s2788_s22, %s1864_s18  ;;  %s2093_s29 = scalar_lea.hbm %s2788_s22, 32 }
 0x95b   : > { %s1639_s15 = sshll.u32 %s1636_s23, 4  ;;  %s1640_s15 = int_to_ptr.hbm [resolvable:$true] %s1639_s15 }
 0x95c   : > { %s2087_s9 = sshra.s32 %s1640_s15, 4  ;;  %s2088_s9 = int_to_ptr.hbm [resolvable:$true] %s2087_s9 }
 0x95d   : > { %s2089_s17 = scalar_lea.hbm %s2088_s9, 16  ;;  %p2094_p8 = scmp.lt.s32.totalorder %s2088_s9, %s2788_s22 }
 0x95e   : > { %p2090_p5 = scmp.ne.s32.totalorder %s2088_s9, %s2089_s17  ;;  %p2095_p10 = scmp.lt.s32.totalorder %s2093_s29, %s2089_s17 }
 0x960   : > { %p2091_p6 = pnand %p2090_p5, %p2317_p3  ;;  %p2096_p11 = por %p2095_p10, %p2094_p8 }
 0x962   : > { %p2092_p7 = pneg %p2091_p6 }
 0x964   : > { %p2097_p12 = pnand %p2096_p11, %p2092_p7 }
 0x966   : > { %2100 = shalt.err (!%p2097_p12)
}
 0x967   : > { %s2195_s16 = smov 128   ;;  %s2196_s13 = smov 8  }
 0x968   : > { %1869 = dma.vmem_to_hbm [thread:$0]  (%p2317_p3), %s1638_s20, 256, %s1640_s15, %s1625_s24, %s2195_s16, %s2195_s16, %s2196_s13  }
 0x969 PF: > { %s2789_s18 = sld [smem:[#allocation19_spill]] }
 0x96a   : > { %s2790_s21 = sld [smem:[#allocation17_spill]] }
 0x96f   : > { %p1881_p13 = scmp.ge.s32.totalorder %s2789_s18, 2 }
 0x970   : > { %s1654_s0 = sand.u32 1, %s2790_s21  }
 0x971   : > { %p1876_p0 = pnand %p1881_p13, %p2327_p9  ;;  %s1655_s1 = scalar_lea.sflag [#allocation13], %s1654_s0 }
 0x973   : > { %p1877_p1 = pneg %p1876_p0 }
 0x975   : > { %2138 = dma.done.wait (%p1877_p1), %s1655_s1, 256  }
 0x976   : > { %2140 = vsyncadd (%p1877_p1), %s1655_s1, 4294967040  ;;  %s27_s15 = sadd.s32 1, %s2789_s18   ;;  %s2792_s2 = smov %s2343_s25 }
 0x977   : > { %p24_p2 = scmp.ge.s32.totalorder %s27_s15, 6   ;;  %s2793_s28 = sld [smem:[#allocation18_spill]] }
 0x978   : > { %s2794_s30 = sld [smem:[#allocation20_spill]]  ;;  %s2795_s25 = smov %s2147_s26 }
 0x979   : > { %s2796_s26 = smov %s2151_s27  ;;  %s2797_s27 = smov %s2792_s2 }
 0x97a   : > { %s2798_s29 = smov %s2167_s14  ;;  %s2799_s14 = smov %s2805_s19 }
 0x97b   :  { %26 = sbr.rel (!%p24_p2) target bundleno = 12 (0xc), region = 136 }
 0x980   :  { %1661 = vsyncpa [#allocation12], 1 }
 0x981   :  { %1663 = vsyncpa [#allocation12 + $0x1], 1 }
 0x982   :  { %1664 = vsyncpa [#allocation13], 1 }
 0x983   :  { %1666 = vsyncpa [#allocation13 + $0x1], 1 }

// kernel: tpu_custom_call.1
= control target key start
LH: loop header
LB: loop body
LE: loop exit
PB: predicated region body
PF: predicated region fallthrough
CT: control target
= control target key end

     0   :  { %s2747_s0 = inlined_call_operand.vmem [shape: f32[2,16,32], index: 0, kind: input, shape index: {}]   ;;  %s2748_s1 = inlined_call_operand.vmem [shape: bf16[32,32], index: 1, kind: input, shape index: {}]   ;;  %s2749_s2 = inlined_call_operand.vmem [shape: bf16[32,64], index: 2, kind: input, shape index: {}]   ;;  %s2750_s3 = inlined_call_operand.vmem [shape: bf16[32,32], index: 3, kind: input, shape index: {}]   ;;  %s2751_s4 = inlined_call_operand.vmem [shape: f32[1,32], index: 4, kind: input, shape index: {}]   ;;  %s2752_s5 = inlined_call_operand.vmem [shape: f32[1,32], index: 5, kind: input, shape index: {}]   ;;  %s2753_s6 = inlined_call_operand.vmem [shape: f32[1,32], index: 6, kind: input, shape index: {}]   ;;  %s2754_s7 = inlined_call_operand.vmem [shape: f32[1,32], index: 7, kind: input, shape index: {}]   ;;  %s2755_s8 = inlined_call_operand.vmem [shape: f32[1,32], index: 8, kind: input, shape index: {}]   ;;  %s2756_s9 = inlined_call_operand.hbm [shape: bf16[32,128], index: 9, kind: input, shape index: {}]   ;;  %s2757_s10 = inlined_call_operand.vmem [shape: f32[1,128], index: 10, kind: input, shape index: {}]   ;;  %s2758_s11 = inlined_call_operand.vmem [shape: bf16[128,32], index: 11, kind: input, shape index: {}]   ;;  %s2759_s12 = inlined_call_operand.vmem [shape: f32[1,32], index: 12, kind: input, shape index: {}]   ;;  %s2760_s13 = inlined_call_operand.hbm [shape: f32[2,16,32], index: 13, kind: output, shape index: {}]  }
   0x1   :  { %2769 = sst [smem:[#allocation23_spill]] %s2747_s0 }
   0x2   :  { %2770 = sst [smem:[#allocation24_spill]] %s2748_s1 }
   0x3   :  { %2771 = sst [smem:[#allocation25_spill]] %s2749_s2 }
   0x4   :  { %2772 = sst [smem:[#allocation26_spill]] %s2756_s9 }
   0x5   :  { %2773 = sst [smem:[#allocation27_spill]] %s2760_s13 }
   0x6   :  { %18 = vsyncpa [#allocation12], 0 }
   0x7   :  { %19 = vsyncpa [#allocation13], 0 }
   0x8   :  { %21 = vsyncpa [#allocation13 + $0x1], 0  ;;  %s2267_s25 = smov 0   ;;  %s2269_s26 = smov 0  }
   0x9   :  { %s2271_s27 = smov 0   ;;  %s2273_s28 = smov 0  }
   0xa   :  { %s2275_s29 = smov 0   ;;  %s2277_s30 = smov 0  }
   0xb   :  { %s2279_s14 = smov 0   ;;  %s2281_s15 = smov 0  }
   0xc LB: > { %2774 = sst [smem:[#allocation17_spill]] %s2143_s25  ;;  %s1727_s16 = sadd.s32 4294967295, %s2171_s15   ;;  %s2171_s15 = sphi %s2281_s15, %s27_s15   ;;  %s2167_s14 = sphi %s2279_s14, %s2799_s14   ;;  %s2163_s30 = sphi %s2277_s30, %s2794_s30   ;;  %s2159_s29 = sphi %s2275_s29, %s2798_s29   ;;  %s2155_s28 = sphi %s2273_s28, %s2793_s28   ;;  %s2151_s27 = sphi %s2271_s27, %s2797_s27   ;;  %s2147_s26 = sphi %s2269_s26, %s2796_s26   ;;  %s2143_s25 = sphi %s2267_s25, %s2795_s25  }
   0xd   : > { %2775 = sst [smem:[#allocation18_spill]] %s2163_s30  ;;  %s1728_s17 = sadd.s32 4294967294, %s2171_s15  }
   0xe   : > { %2776 = sst [smem:[#allocation19_spill]] %s2171_s15  ;;  %s36_s18 = sadd.s32 1, %s2163_s30 }
   0xf   : > { %s39_s19 = sadd.s32 1, %s2167_s14  ;;  %p37_p0 = scmp.ge.s32.totalorder %s36_s18, 2 }
  0x10   : > { %s324_s20 = sadd.s32 1, %s2151_s27  ;;  %p334_p1 = scmp.ne.s32.totalorder %s2151_s27, %s2147_s26 }
  0x11   : > { %p335_p2 = scmp.eq.s32.totalorder %s1727_s16, 3  ;;  %s2801_s18 = smov (%p37_p0, %s36_s18), 0 }
  0x12   : > { %2777 = sst [smem:[#allocation20_spill]] %s2801_s18  ;;  %s2803_s19 = smov (!%p37_p0, %s39_s19), %s2167_s14 }
  0x13   : > { %p2317_p3 = por %p335_p2, %p334_p1  ;;  %p340_p4 = scmp.ne.s32.totalorder %s2147_s26, %s2143_s25 }
  0x14   : > { %p41_p5 = scmp.ge.s32.totalorder %s2803_s19, 2  ;;  %p341_p6 = scmp.eq.s32.totalorder %s1728_s17, 3 }
  0x15   : > { %s2778_s21 = scalar_select %p2317_p3, 1, 0 }
  0x16   : > { %p1729_p7 = scmp.ge.s32.totalorder %s2171_s15, 1  ;;  %p348_p8 = scmp.lt.s32.totalorder %s2171_s15, 5 }
  0x17   : > { %2779 = sst [smem:[#allocation21_spill]] %s2778_s21  ;;  %s2805_s19 = smov (%p41_p5, %s2803_s19), 0 }
  0x18   : > { %p2327_p9 = por %p341_p6, %p340_p4  ;;  %p2331_p10 = pnand %p1729_p7, %p348_p8 }
  0x19   : > { %s321_s24 = ssub.s32 %s2167_s14, %s2805_s19  ;;  %p1879_p13 = scmp.eq.s32.totalorder %s1727_s16, 0 }
  0x1a   : > { %s2780_s22 = scalar_select %p2327_p9, 1, 0 }
  0x1b   : > { %p322_p11 = scmp.eq.s32.totalorder %s321_s24, 0  ;;  %p1871_p12 = pneg %p2331_p10 }
  0x1c   : > { %2781 = sst [smem:[#allocation22_spill]] %s2780_s22  ;;  %s2173_s15 = smov [#allocation11]  }
  0x1d   : > { %s2783_s9 = sld [smem:[#allocation26_spill]]  ;;  %s385_s13 = sshll.u32 %s2173_s15, 4  ;;  %s386_s13 = int_to_ptr.vmem [resolvable:$true] %s385_s13 }
  0x1e   : > { %s2343_s25 = scalar_select %p322_p11, %s2151_s27, %s324_s20  }
  0x1f   : > { %p1872_p0 = pnand %p1879_p13, %p1871_p12  ;;  %s2174_s22 = smov 64  }
  0x20   : > { %s2175_s21 = smov 4   ;;  %418 = sbr.rel (%p2331_p10) target bundleno = 2409 (0x969), region = 72 }
  0x23   : > { %s383_s30 = sshll.u32 %s2783_s9, 4  ;;  %s384_s30 = int_to_ptr.hbm [resolvable:$true] %s383_s30 }
  0x24   : > { %1874 = dma.hbm_to_vmem [thread:$0]  (!%p1872_p0), %s384_s30, 256, %s386_s13, [#allocation12], %s2174_s22, %s2174_s22, %s2175_s21  }
  0x25   : > { %2134 = dma.done.wait (%p1879_p13), [#allocation12], 256  }
  0x26   : > { %2136 = vsyncadd (%p1879_p13), [#allocation12], 4294967040  ;;  %s460_s16 = sand.u32 1, %s2147_s26   ;;  %p463_p1 = scmp.lt.s32.totalorder %s2159_s29, 1 }
  0x27   : > { %s1734_s18 = sshll.u32 %s460_s16, 4  ;;  %s2784_s0 = sld [smem:[#allocation23_spill]] }
  0x28   : > { %s464_s20 = scalar_select %p463_p1, %s2159_s29, 1 }
  0x29   : > { %s2357_s13 = scalar_lea.vmem [#allocation14], %s1734_s18  ;;  %p1737_p2 = scmp.ne.s32.totalorder %s2155_s28, 0 }
  0x2a   : > { %s1842_s15 = sshll.u32 %s464_s20, 4  ;;  %s2785_s1 = sld [smem:[#allocation24_spill]] (!%p1737_p2) }
  0x2b   : > { %472 = sbr.rel (%p1737_p2) target bundleno = 591 (0x24f), region = 80  ;;  %s2177_s17 = smov (!%p1737_p2), 112  }
  0x2c   : > { %s2178_s30 = smov (!%p1737_p2), 120   ;;  %s2179_s21 = smov (!%p1737_p2), 104  }
  0x2d   : > { %s2355_s9 = scalar_lea.vmem %s2784_s0, %s1842_s15 }
  0x30   : > { %v473_v0 = vld [vmem:[%s2355_s9] sm:$0xff]  ;;  %vm477_vm0 = vcmask 261120   ;;  %v474_v2 = vld [vmem:[%s2355_s9 + $0x8] sm:$0xff]  ;;  %v2176_v4 = vmov 32.0   ;;  %vm541_vm7 = vcmask 257024   ;;  %vm588_vm9 = vcmask 60416  }
  0x31   : > { %v478_v1 = vsel %vm477_vm0, %v473_v0, 0.0  ;;  %v481_v3 = vsel %vm477_vm0, %v474_v2, 0.0  ;;  %1972 = vrcp.f32 %v2176_v4  ;;  %v1844_v21 = vld [vmem:[%s2785_s1 + $0x8] sm:$0xff]  ;;  %v1843_v24 = vld [vmem:[%s2785_s1] sm:$0xff]  ;;  %vm630_vm10 = vcmask 7168  }
  0x32   : > { %479 = vadd.xlane.f32.xlu0 %v478_v1  ;;  %574 = vmatpush.bf16.msra.mxu0 %v1844_v21  ;;  %v1970_v37 = vld [vmem:[%s2752_s5] ss:$0 sm:$0xff]  ;;  %vm647_vm11 = vcmask 64512  }
  0x33   : > { %v1971_v41 = vld [vmem:[%s2753_s6] ss:$0 sm:$0xff] }
  0x36   : > { %575 = vmatpush.bf16.msra.mxu0 %v1843_v24 }
  0x37   : > { %v1973_v5 = vpop.eup %1972 }
  0x38   : > { %v485_v6 = vmul.f32 32.0, %v1973_v5  ;;  %vm489_vm1 = vweird.f32 %v1973_v5 }
  0x3a   : > { %482 = vadd.xlane.f32.xlu0 %v481_v3  ;;  %v486_v7 = vsub.f32 1.0, %v485_v6 }
  0x3c   : > { %v487_v8 = vmul.f32 %v1973_v5, %v486_v7  ;;  %v2181_v7 = vmov 0.0  }
  0x3d   : > { %639 = vst.msk [vmem:[#allocation9] sm:$0xff] %vm630_vm10, %v2181_v7 }
  0x3e   : > { %v488_v9 = vadd.f32 %v1973_v5, %v487_v8  ;;  %640 = vst.msk [vmem:[#allocation9 + $0x8] sm:$0xff] %vm630_vm10, %v2181_v7 }
  0x3f   : > { %641 = vst.msk [vmem:[#allocation9 + $0x10] sm:$0xff] %vm630_vm10, %v2181_v7 }
  0x40   : > { %v490_v10 = vsel %vm489_vm1, %v1973_v5, %v488_v9  ;;  %v2180_v5 = vmov -1e+30   ;;  %642 = vst.msk [vmem:[#allocation9 + $0x18] sm:$0xff] %vm630_vm10, %v2181_v7 }
  0x41   : > { %631 = vst.msk [vmem:[#allocation8] sm:$0xff] %vm630_vm10, %v2180_v5 }
  0x42   : > { %632 = vst.msk [vmem:[#allocation8 + $0x8] sm:$0xff] %vm630_vm10, %v2180_v5 }
  0x43   : > { %633 = vst.msk [vmem:[#allocation8 + $0x10] sm:$0xff] %vm630_vm10, %v2180_v5 }
  0x44   : > { %634 = vst.msk [vmem:[#allocation8 + $0x18] sm:$0xff] %vm630_vm10, %v2180_v5 }
  0x45   : > { %635 = vst.msk [vmem:[#allocation8 + $0x20] sm:$0xff] %vm630_vm10, %v2180_v5 }
  0x46   : > { %636 = vst.msk [vmem:[#allocation8 + $0x28] sm:$0xff] %vm630_vm10, %v2180_v5 }
  0x47   : > { %637 = vst.msk [vmem:[#allocation8 + $0x30] sm:$0xff] %vm630_vm10, %v2180_v5 }
  0x48   : > { %638 = vst.msk [vmem:[#allocation8 + $0x38] sm:$0xff] %vm630_vm10, %v2180_v5 }
  0x49   : > { %643 = vst.msk [vmem:[#allocation9 + $0x20] sm:$0xff] %vm630_vm10, %v2181_v7 }
  0x4a   : > { %644 = vst.msk [vmem:[#allocation9 + $0x28] sm:$0xff] %vm630_vm10, %v2181_v7 }
  0x4b   : > { %645 = vst.msk [vmem:[#allocation9 + $0x30] sm:$0xff] %vm630_vm10, %v2181_v7 }
  0x4c   : > { %646 = vst.msk [vmem:[#allocation9 + $0x38] sm:$0xff] %vm630_vm10, %v2181_v7 }
  0x4d   : > { %648 = vst.msk [vmem:[#allocation10] sm:$0xff] %vm647_vm11, %v2181_v7 }
  0x4e   : > { %649 = vst.msk [vmem:[#allocation10 + $0x8] sm:$0xff] %vm647_vm11, %v2181_v7 }
  0x4f   : > { %650 = vst.msk [vmem:[#allocation10 + $0x10] sm:$0xff] %vm647_vm11, %v2181_v7 }
  0x50   : > { %651 = vst.msk [vmem:[#allocation10 + $0x18] sm:$0xff] %vm647_vm11, %v2181_v7 }
  0x51   : > { %652 = vst.msk [vmem:[#allocation10 + $0x20] sm:$0xff] %vm647_vm11, %v2181_v7 }
  0x52   : > { %653 = vst.msk [vmem:[#allocation10 + $0x28] sm:$0xff] %vm647_vm11, %v2181_v7 }
  0x53   : > { %654 = vst.msk [vmem:[#allocation10 + $0x30] sm:$0xff] %vm647_vm11, %v2181_v7 }
  0x54   : > { %655 = vst.msk [vmem:[#allocation10 + $0x38] sm:$0xff] %vm647_vm11, %v2181_v7 }
  0xa5   : > { %v480_v11 = vpop.xlane.xlu0 %479 }
  0xa6   : > { %v491_v12 = vmul.f32 %v490_v10, %v480_v11 }
  0xa8   : > { %v493_v13 = vsub.f32 %v473_v0, %v491_v12 }
  0xaa   : > { %v495_v14 = vmul.f32 %v493_v13, %v493_v13 }
  0xac   : > { %v497_v15 = vsel %vm477_vm0, %v495_v14, 0.0 }
  0xad   : > { %498 = vadd.xlane.f32.xlu1 %v497_v15  ;;  %v483_v16 = vpop.xlane.xlu0 %482 }
  0xae   : > { %v492_v17 = vmul.f32 %v490_v10, %v483_v16 }
  0xb0   : > { %v494_v18 = vsub.f32 %v474_v2, %v492_v17 }
  0xb2   : > { %v496_v19 = vmul.f32 %v494_v18, %v494_v18 }
  0xb4   : > { %v500_v20 = vsel %vm477_vm0, %v496_v19, 0.0 }
  0xb5   : > { %501 = vadd.xlane.f32.xlu1 %v500_v20 }
 0x120   : > { %v499_v22 = vpop.xlane.xlu1 %498 }
 0x121   : > { %v503_v23 = vmul.f32 %v499_v22, %v490_v10 }
 0x123   : > { %v505_v25 = vadd.f32 1e-05, %v503_v23 }
 0x125   : > { %1974 = vrsqrt.f32 %v505_v25  ;;  %vm513_vm3 = vweird.f32 %v505_v25 }
 0x128   : > { %v502_v26 = vpop.xlane.xlu1 %501 }
 0x129   : > { %v504_v27 = vmul.f32 %v502_v26, %v490_v10 }
 0x12b   : > { %v1975_v28 = vpop.eup %1974  ;;  %v506_v29 = vadd.f32 1e-05, %v504_v27 }
 0x12c   : > { %v508_v30 = vmul.f32 %v1975_v28, %v505_v25  ;;  %vm514_vm2 = vweird.f32 %v1975_v28 }
 0x12d   : > { %1976 = vrsqrt.f32 %v506_v29  ;;  %vm515_vm4 = vmor %vm513_vm3, %vm514_vm2  ;;  %vm523_vm6 = vweird.f32 %v506_v29 }
 0x12e   : > { %v509_v31 = vmul.f32 %v1975_v28, %v508_v30 }
 0x130   : > { %v510_v32 = vmul.f32 0.5, %v509_v31 }
 0x132   : > { %v511_v33 = vsub.f32 1.5, %v510_v32 }
 0x133   : > { %v1977_v34 = vpop.eup %1976 }
 0x134   : > { %v512_v35 = vmul.f32 %v1975_v28, %v511_v33  ;;  %v518_v36 = vmul.f32 %v1977_v34, %v506_v29  ;;  %vm524_vm5 = vweird.f32 %v1977_v34 }
 0x135   : > { %vm525_vm8 = vmor %vm523_vm6, %vm524_vm5 }
 0x136   : > { %v516_v38 = vsel %vm515_vm4, %v1975_v28, %v512_v35  ;;  %v519_v39 = vmul.f32 %v1977_v34, %v518_v36 }
 0x137   : > { %v527_v40 = vmul.f32 %v516_v38, %v493_v13 }
 0x138   : > { %v520_v42 = vmul.f32 0.5, %v519_v39 }
 0x139   : > { %v532_v43 = vmul.f32 %v1970_v37, %v527_v40 }
 0x13a   : > { %v521_v44 = vsub.f32 1.5, %v520_v42 }
 0x13b   : > { %v537_v45 = vadd.f32 %v1971_v41, %v532_v43 }
 0x13c   : > { %v522_v46 = vmul.f32 %v1977_v34, %v521_v44 }
 0x13d   : > { %v539_v47 = vpack.c.bf16 %v537_v45, %v537_v45 }
 0x13e   : > { %v526_v48 = vsel %vm525_vm8, %v1977_v34, %v522_v46 }
 0x13f   : > { %v528_v49 = vmul.f32 %v526_v48, %v494_v18  ;;  %542 = vst.msk [vmem:[#allocation2] sm:$0xf] %vm541_vm7, %v539_v47  ;;  %v550_v53 = vunpack.c.l.b16 %v539_v47 }
 0x141   : > { %v533_v50 = vmul.f32 %v1970_v37, %v528_v49 }
 0x143   : > { %v538_v51 = vadd.f32 %v1971_v41, %v533_v50 }
 0x145   : > { %v540_v52 = vpack.c.bf16 %v538_v51, %v538_v51 }
 0x147   : > { %v551_v54 = vunpack.c.l.b16 %v540_v52  ;;  %543 = vst.msk [vmem:[#allocation2 + $0x4] sm:$0xf] %vm541_vm7, %v540_v52 }
 0x149   : > { %v552_v55 = vpack.c.b16 %v551_v54, %v550_v53 }
 0x14b   : > { %1746 = vmatmul.msk.bf16.vlgmr.msra.gmra.mxu0 %vm477_vm0, %v552_v55 }
 0x1c8   : > { %v577_v56 = vpop.f32.mrf.mxu0 }
 0x1c9   : > { %v582_v57 = vpack.c.bf16 %v577_v56, %v577_v56 }
 0x1cb   : > { %584 = vst.msk [vmem:[#allocation7] sm:$0xf] %vm541_vm7, %v582_v57 }
 0x1d0   : > { %v579_v58 = vpop.f32.mrf.mxu0 }
 0x1d1   : > { %v583_v59 = vpack.c.bf16 %v579_v58, %v579_v58 }
 0x1d2   : > { %v604_v60 = vld [vmem:[#allocation7] sm:$0xf] }
 0x1d3   : > { %v591_v61 = vld [vmem:[#allocation7] sm:$0xf]  ;;  %585 = vst.msk [vmem:[#allocation7 + $0x4] sm:$0xf] %vm541_vm7, %v583_v59  ;;  %608 = vrot.lane.b32.xlu0 %v604_v60, %s2177_s17 }
 0x1d4   : > { %595 = vrot.lane.b32.xlu2 %v591_v61, %s2178_s30  ;;  %v586_v62 = vld [vmem:[#allocation7] sm:$0xf] }
 0x1d5   : > { %589 = vst.msk [vmem:[#allocation3] sm:$0xf] %vm588_vm9, %v586_v62  ;;  %v617_v2 = vld [vmem:[#allocation7] sm:$0xf] }
 0x1da   : > { %v605_v63 = vld [vmem:[#allocation7 + $0x4] sm:$0xf] }
 0x1db   : > { %v592_v0 = vld [vmem:[#allocation7 + $0x4] sm:$0xf]  ;;  %610 = vrot.lane.b32.xlu1 %v605_v63, %s2177_s17 }
 0x1dc   : > { %597 = vrot.lane.b32.xlu2 %v592_v0, %s2178_s30  ;;  %v587_v1 = vld [vmem:[#allocation7 + $0x4] sm:$0xf] }
 0x1dd   : > { %590 = vst.msk [vmem:[#allocation3 + $0x4] sm:$0xf] %vm588_vm9, %v587_v1  ;;  %v618_v3 = vld [vmem:[#allocation7 + $0x4] sm:$0xf] }
 0x1e4   : > { %621 = vrot.lane.b32.xlu2 %v617_v2, %s2179_s21 }
 0x1ec   : > { %623 = vrot.lane.b32.xlu2 %v618_v3, %s2179_s21 }
 0x22e   : > { %v596_v4 = vpop.permute.xlu2 %595 }
 0x22f   : > { %602 = vst.msk [vmem:[#allocation3 + $0x8] sm:$0xf] %vm588_vm9, %v596_v4 }
 0x236   : > { %v598_v6 = vpop.permute.xlu2 %597 }
 0x237   : > { %603 = vst.msk [vmem:[#allocation3 + $0xc] sm:$0xf] %vm588_vm9, %v598_v6 }
 0x23e   : > { %v622_v8 = vpop.permute.xlu2 %621 }
 0x23f   : > { %628 = vst.msk [vmem:[#allocation3 + $0x18] sm:$0xf] %vm588_vm9, %v622_v8 }
 0x245   : > { %v609_v9 = vpop.permute.xlu0 %608 }
 0x246   : > { %v624_v10 = vpop.permute.xlu2 %623  ;;  %615 = vst.msk [vmem:[#allocation3 + $0x10] sm:$0xf] %vm588_vm9, %v609_v9 }
 0x247   : > { %629 = vst.msk [vmem:[#allocation3 + $0x1c] sm:$0xf] %vm588_vm9, %v624_v10 }
 0x24d   : > { %v611_v11 = vpop.permute.xlu1 %610 }
 0x24e   : > { %616 = vst.msk [vmem:[#allocation3 + $0x14] sm:$0xf] %vm588_vm9, %v611_v11 }
 0x24f PF: > { %s2786_s2 = sld [smem:[#allocation25_spill]]  ;;  %s1747_s18 = sshll.u32 %s2155_s28, 3  ;;  %vm678_vm12 = vcmask 261120   ;;  %vm696_vm13 = vcmask 519168   ;;  %vm699_vm14 = vcmask 60416   ;;  %vm766_vm15 = vcmask 64512  }
 0x250   : > { %s657_s20 = sshra.s32 %s1747_s18, 3  ;;  %s2182_s21 = smov 104   ;;  %v1847_v24 = vld [vmem:[#allocation3] sm:$0xff]  ;;  %v1850_v32 = vld [vmem:[#allocation3 + $0x18] sm:$0xff]  ;;  %v1848_v33 = vld [vmem:[#allocation3 + $0x8] sm:$0xff]  ;;  %vm1059_vm0 = vcmask 7168  }
 0x251   : > { %s1748_s17 = sshll.u32 %s657_s20, 2  ;;  %s2183_s22 = smov 120   ;;  %v2441_v43 = vld [vmem:[#allocation8] sm:$0xff]  ;;  %v2185_v45 = vmov 0   ;;  %v2454_v50 = vld [vmem:[#allocation8 + $0x8] sm:$0xff]  ;;  %v2478_v62 = vld [vmem:[#allocation8 + $0x30] sm:$0xff] }
 0x252   : > { %s660_s30 = scalar_lea.vmem [#allocation2], %s1748_s17  ;;  %s2184_s23 = smov 112   ;;  %1980 = vset.pattern.permute.xlu1 %v2185_v45  ;;  %1978 = vset.pattern.permute.xlu2 %v2185_v45  ;;  %v873_v2 = vld [vmem:[#allocation8 + $0x10] sm:$0xff]  ;;  %v875_v5 = vld [vmem:[#allocation8 + $0x20] sm:$0xff]  ;;  %v2489_v11 = vld [vmem:[#allocation8 + $0x28] sm:$0xff]  ;;  %vm1144_vm1 = vcmask 1043456  }
 0x253   : > { %v661_v14 = vld [vmem:[%s660_s30] sm:$0xf]  ;;  %1979 = vset.pattern.permute.xlu0 %v2185_v45  ;;  %s2186_s20 = smov 88   ;;  %s2187_s15 = smov 80  }
 0x254   : > { %s2188_s24 = smov 96   ;;  %s2189_s17 = smov 72  }
 0x255   : > { %v1846_v12 = vld [vmem:[%s2786_s2 + $0x8] sm:$0xff]  ;;  %v1845_v13 = vld [vmem:[%s2786_s2] sm:$0xff]  ;;  %v1849_v36 = vld [vmem:[#allocation3 + $0x10] sm:$0xff]  ;;  %p1782_p4 = scmp.ne.s32.totalorder %s2155_s28, 1 }
 0x256   : > { %688 = vmatpush.bf16.msra.mxu0 %v1846_v12  ;;  %v2491_v12 = vld [vmem:[#allocation8 + $0x38] sm:$0xff]  ;;  %s2191_s28 = smov (!%p1782_p4), 16   ;;  %s2193_s30 = smov (!%p1782_p4), 24  }
 0x25a   : > { %689 = vmatpush.bf16.msra.mxu0 %v1845_v13 }
 0x25d   : > { %1757 = vmatmul.msk.bf16.vlgmr.msra.gmra.mxu0 %vm678_vm12, %v661_v14 }
 0x2da   : > { %v691_v15 = vpop.f32.mrf.mxu0 }
 0x2db   : > { %v695_v16 = vpack.c.bf16 %v691_v15, %v691_v15 }
 0x2dd   : > { %697 = vst.msk [vmem:[#allocation6] sm:$0xf] %vm696_vm13, %v695_v16 }
 0x2e2   : > { %v693_v17 = vpop.f32.mrf.mxu0 }
 0x2e4   : > { %v735_v18 = vld [vmem:[#allocation6] sm:$0xf] }
 0x2e5   : > { %v707_v19 = vld [vmem:[#allocation6] sm:$0xf]  ;;  %737 = vrot.lane.b32.xlu1 %v735_v18, %s2182_s21 }
 0x2e6   : > { %709 = vrot.lane.b32.xlu0 %v707_v19, %s2183_s22  ;;  %v698_v20 = vld [vmem:[#allocation6] sm:$0xf] }
 0x2e7   : > { %700 = vst.msk [vmem:[#allocation4] sm:$0xf] %vm699_vm14, %v698_v20  ;;  %v721_v21 = vld [vmem:[#allocation6] sm:$0xf] }
 0x2e8   : > { %v714_v61 = vld [vmem:[#allocation6] sm:$0xf] }
 0x2e9   : > { %v728_v9 = vld [vmem:[#allocation6] sm:$0xf] }
 0x2ea   : > { %v701_v17 = vld [vmem:[#allocation6] sm:$0xf] }
 0x2ee   : > { %723 = vrot.lane.b32.xlu0 %v721_v21, %s2184_s23  ;;  %v757_v22 = vld [vmem:[#allocation4] sm:$0xf]  ;;  %v874_v21 = vld [vmem:[#allocation8 + $0x18] sm:$0xff] }
 0x2ef   : > { %v771_v23 = vsel %vm766_vm15, %v757_v22, 0 }
 0x2f0   : > { %780 = vmatpush.bf16.xpose.msra.mxu1 %v771_v23 }
 0x2f7   : > { %1762 = vmatmul.msk.bf16.vlgmr.msra.gmra.mxu1 %vm766_vm15, %v1847_v24 }
 0x357   : > { %v738_v25 = vpop.permute.xlu1 %737 }
 0x358   : > { %v710_v26 = vpop.permute.xlu0 %709  ;;  %741 = vst.msk [vmem:[#allocation4 + $0xc] sm:$0xf] %vm699_vm14, %v738_v25 }
 0x359   : > { %713 = vst.msk [vmem:[#allocation4 + $0x4] sm:$0xf] %vm699_vm14, %v710_v26 }
 0x35f   : > { %v760_v28 = vld [vmem:[#allocation4 + $0xc] sm:$0xf] }
 0x360   : > { %v724_v27 = vpop.permute.xlu0 %723  ;;  %v758_v29 = vld [vmem:[#allocation4 + $0x4] sm:$0xf]  ;;  %v846_v30 = vsel %vm766_vm15, %v760_v28, 0 }
 0x361   : > { %727 = vst.msk [vmem:[#allocation4 + $0x8] sm:$0xf] %vm699_vm14, %v724_v27  ;;  %v796_v31 = vsel %vm766_vm15, %v758_v29, 0  ;;  %855 = vmatpush.bf16.xpose.msrb.mxu0 %v846_v30 }
 0x362   : > { %805 = vmatpush.bf16.xpose.msra.mxu2 %v796_v31  ;;  %v742_v31 = vld [vmem:[#allocation6] sm:$0xf] }
 0x368   : > { %v759_v34 = vld [vmem:[#allocation4 + $0x8] sm:$0xf]  ;;  %1777 = vmatmul.msk.bf16.vlgmr.msrb.gmra.mxu0 %vm766_vm15, %v1850_v32 }
 0x369   : > { %v821_v35 = vsel %vm766_vm15, %v759_v34, 0  ;;  %1767 = vmatmul.msk.bf16.vlgmr.msra.gmra.mxu2 %vm766_vm15, %v1848_v33 }
 0x36a   : > { %830 = vmatpush.bf16.xpose.msra.mxu3 %v821_v35 }
 0x371   : > { %1772 = vmatmul.msk.bf16.vlgmr.msra.gmra.mxu3 %vm766_vm15, %v1849_v36 }
 0x374   : > { %v2429_v37 = vpop.f32.mrf.mxu1 }
 0x375   : > { %v879_v38 = vsel %vm766_vm15, %v2429_v37, -inf }
 0x376   : > { %880 = vmax.xlane.f32.xlu2 %v879_v38  ;;  %v862_v38 = vlaneseq }
 0x37c   : > { %v2433_v39 = vpop.f32.mrf.mxu1 }
 0x37d   : > { %v882_v40 = vsel %vm766_vm15, %v2433_v39, -inf }
 0x37e   : > { %883 = vmax.xlane.f32.xlu2 %v882_v40 }
 0x3e5   : > { %v2437_v41 = vpop.f32.mrf.mxu0 }
 0x3e6   : > { %v897_v42 = vsel %vm766_vm15, %v2437_v41, -inf }
 0x3e7   : > { %898 = vmax.xlane.f32.xlu2 %v897_v42 }
 0x3e9   : > { %v881_v44 = vpop.xlane.xlu2 %880 }
 0x3ea   : > { %v2444_v46 = vmax.f32 %v2441_v43, %v881_v44  ;;  %v867_v44 = vstv %s1747_s18  ;;  %s2192_s18 = smov (!%p1782_p4), 8  }
 0x3ec   : > { %v911_v47 = vsub.f32 %v2441_v43, %v2444_v46  ;;  %1253 = vst.msk [vmem:[#allocation8] sm:$0xff] %vm1059_vm0, %v2444_v46  ;;  %v2450_v48 = vpop.f32.mrf.mxu2  ;;  %v866_v43 = vand.u32 127, %v862_v38 }
 0x3ed   : > { %v885_v49 = vsel %vm766_vm15, %v2450_v48, -inf  ;;  %v2465_v55 = vpop.f32.mrf.mxu0 }
 0x3ee   : > { %886 = vmax.xlane.f32.xlu1 %v885_v49  ;;  %v900_v58 = vsel %vm766_vm15, %v2465_v55, -inf  ;;  %v919_v30 = vmul.f32 1.442695, %v911_v47  ;;  %v2532_v45 = vadd.s32 %v867_v44, %v866_v43 }
 0x3f1   : > { %v884_v51 = vpop.xlane.xlu2 %883 }
 0x3f2   : > { %v2457_v52 = vmax.f32 %v2454_v50, %v884_v51 }
 0x3f4   : > { %v2459_v53 = vpop.f32.mrf.mxu3  ;;  %1254 = vst.msk [vmem:[#allocation8 + $0x8] sm:$0xff] %vm1059_vm0, %v2457_v52  ;;  %v2473_v59 = vpop.f32.mrf.mxu2  ;;  %v912_v51 = vsub.f32 %v2454_v50, %v2457_v52 }
 0x3f5   : > { %v891_v54 = vsel %vm766_vm15, %v2459_v53, -inf  ;;  %v888_v60 = vsel %vm766_vm15, %v2473_v59, -inf }
 0x3f6   : > { %892 = vmax.xlane.f32.xlu2 %v891_v54  ;;  %v921_v54 = vmul.f32 1.442695, %v912_v51 }
 0x3fc   : > { %v2467_v56 = vpop.f32.mrf.mxu3 }
 0x3fd   : > { %v894_v57 = vsel %vm766_vm15, %v2467_v56, -inf }
 0x3fe   : > { %895 = vmax.xlane.f32.xlu0 %v894_v57  ;;  %901 = vmax.xlane.f32.xlu2 %v900_v58 }
 0x406   : > { %889 = vmax.xlane.f32.xlu2 %v888_v60 }
 0x407   : > { %716 = vrot.lane.b32.xlu1 %v714_v61, %s2186_s20 }
 0x40f   : > { %937 = vperm.xlu1 %1980, %v2444_v46   ;;  %v2534_v46 = vshrl.u32 %v862_v38, 7 }
 0x411   : > { %vm869_vm2 = vcmp.ge.s32.totalorder %v2534_v46, %v2532_v45 }
 0x45a   : > { %v899_v63 = vpop.xlane.xlu2 %898 }
 0x45b   : > { %v2481_v0 = vmax.f32 %v2478_v62, %v899_v63 }
 0x45d   : > { %v917_v1 = vsub.f32 %v2478_v62, %v2481_v0  ;;  %1259 = vst.msk [vmem:[#allocation8 + $0x30] sm:$0xff] %vm1059_vm0, %v2481_v0 }
 0x461   : > { %v887_v3 = vpop.xlane.xlu1 %886 }
 0x462   : > { %v905_v4 = vmax.f32 %v873_v2, %v887_v3 }
 0x464   : > { %1255 = vst.msk [vmem:[#allocation8 + $0x10] sm:$0xff] %vm1059_vm0, %v905_v4  ;;  %947 = vperm.xlu2 %1978, %v905_v4   ;;  %v913_v8 = vsub.f32 %v873_v2, %v905_v4 }
 0x466   : > { %v923_v10 = vmul.f32 1.442695, %v913_v8 }
 0x468   : > { %1981 = vpow2.f32 %v923_v10 }
 0x469   : > { %v893_v6 = vpop.xlane.xlu2 %892 }
 0x46a   : > { %v907_v7 = vmax.f32 %v875_v5, %v893_v6 }
 0x46c   : > { %1257 = vst.msk [vmem:[#allocation8 + $0x20] sm:$0xff] %vm1059_vm0, %v907_v7  ;;  %957 = vperm.xlu0 %1979, %v907_v7   ;;  %730 = vrot.lane.b32.xlu2 %v728_v9, %s2187_s15  ;;  %v915_v20 = vsub.f32 %v875_v5, %v907_v7  ;;  %v864_v7 = vadd.s32 8, %v2534_v46  ;;  %v1011_v46 = vld [vmem:[#allocation9] sm:$0xff] }
 0x46e   : > { %v2508_v22 = vpop.eup %1981  ;;  %v927_v23 = vmul.f32 1.442695, %v915_v20  ;;  %vm870_vm3 = vcmp.ge.s32.totalorder %v864_v7, %v2532_v45 }
 0x470   : > { %1983 = vpow2.f32 %v927_v23 }
 0x471   : > { %v896_v13 = vpop.xlane.xlu0 %895  ;;  %v902_v14 = vpop.xlane.xlu2 %901  ;;  %1985 = vpow2.f32 %v919_v30 }
 0x472   : > { %v2494_v15 = vmax.f32 %v2489_v11, %v896_v13  ;;  %v2497_v16 = vmax.f32 %v2491_v12, %v902_v14 }
 0x474   : > { %v916_v18 = vsub.f32 %v2489_v11, %v2494_v15  ;;  %1258 = vst.msk [vmem:[#allocation8 + $0x28] sm:$0xff] %vm1059_vm0, %v2494_v15  ;;  %v918_v19 = vsub.f32 %v2491_v12, %v2497_v16  ;;  %703 = vrot.lane.b32.xlu0 %v701_v17, %s2188_s24  ;;  %942 = vperm.xlu2 %1978, %v2457_v52  }
 0x475   : > { %1260 = vst.msk [vmem:[#allocation8 + $0x38] sm:$0xff] %vm1059_vm0, %v2497_v16 }
 0x476   : > { %v2514_v28 = vpop.eup %1983  ;;  %v929_v45 = vmul.f32 1.442695, %v916_v18  ;;  %v1012_v18 = vld [vmem:[#allocation9 + $0x8] sm:$0xff] }
 0x477   : > { %v2523_v34 = vpop.eup %1985 }
 0x479   : > { %v890_v24 = vpop.xlane.xlu2 %889  ;;  %v717_v25 = vpop.permute.xlu1 %716 }
 0x47a   : > { %v906_v26 = vmax.f32 %v874_v21, %v890_v24  ;;  %720 = vst.msk [vmem:[#allocation5 + $0x4] sm:$0xf] %vm699_vm14, %v717_v25 }
 0x47c   : > { %1256 = vst.msk [vmem:[#allocation8 + $0x18] sm:$0xff] %vm1059_vm0, %v906_v26  ;;  %1088 = vperm.xlu0 %1979, %v2508_v22   ;;  %952 = vperm.xlu1 %1980, %v906_v26   ;;  %v914_v32 = vsub.f32 %v874_v21, %v906_v26 }
 0x47d   : > { %962 = vperm.xlu2 %1978, %v2494_v15  }
 0x47e   : > { %v925_v33 = vmul.f32 1.442695, %v914_v32 }
 0x480   : > { %1987 = vpow2.f32 %v925_v33 }
 0x481   : > { %v1133_v27 = vld [vmem:[#allocation5 + $0x4] sm:$0xf]  ;;  %v938_v35 = vpop.permute.xlu1 %937 }
 0x482   : > { %v1171_v29 = vsel %vm1144_vm1, %v1133_v27, 0  ;;  %v975_v36 = vsub.f32 %v2429_v37, %v938_v35 }
 0x483   : > { %1180 = vmatpush.bf16.msrb.mxu2 %v1171_v29 }
 0x484   : > { %1098 = vperm.xlu0 %1979, %v2514_v28   ;;  %967 = vperm.xlu1 %1980, %v2481_v0   ;;  %v983_v42 = vmul.f32 1.442695, %v975_v36 }
 0x485   : > { %972 = vperm.xlu2 %1978, %v2497_v16  }
 0x486   : > { %v2527_v40 = vpop.eup %1987  ;;  %1989 = vpow2.f32 %v983_v42 }
 0x487   : > { %1991 = vpow2.f32 %v921_v54 }
 0x48c   : > { %744 = vrot.lane.b32.xlu1 %v742_v31, %s2189_s17  ;;  %v1990_v47 = vpop.eup %1989 }
 0x48d   : > { %v1003_v37 = vsel %vm869_vm2, %v1990_v47, 0.0  ;;  %v2545_v61 = vpop.eup %1991 }
 0x48e   : > { %v1027_v49 = vsel %vm766_vm15, %v1003_v37, 0.0  ;;  %v1124_v13 = vpack.c.bf16 %v1003_v37, %v1003_v37 }
 0x490   : > { %v1138_v21 = vunpack.c.l.b16 %v1124_v13 }
 0x494   : > { %1078 = vperm.xlu1 %1980, %v2523_v34  }
 0x49c   : > { %1093 = vperm.xlu1 %1980, %v2527_v40  }
 0x4ae   : > { %1028 = vadd.xlane.f32.xlu2 %v1027_v49 }
 0x4be   : > { %v948_v57 = vpop.permute.xlu2 %947 }
 0x4bf   : > { %v977_v58 = vsub.f32 %v2450_v48, %v948_v57 }
 0x4c1   : > { %v987_v60 = vmul.f32 1.442695, %v977_v58 }
 0x4c3   : > { %1993 = vpow2.f32 %v987_v60 }
 0x4c6   : > { %1083 = vperm.xlu2 %1978, %v2545_v61   ;;  %v731_v63 = vpop.permute.xlu2 %730 }
 0x4c7   : > { %734 = vst.msk [vmem:[#allocation5 + $0x8] sm:$0xf] %vm699_vm14, %v731_v63  ;;  %v931_v63 = vmul.f32 1.442695, %v917_v1  ;;  %v933_v1 = vmul.f32 1.442695, %v918_v19 }
 0x4c9   : > { %v1994_v2 = vpop.eup %1993 }
 0x4ca   : > { %v2552_v3 = vsel %vm869_vm2, %v1994_v2, 0.0 }
 0x4cb   : > { %v1033_v50 = vsel %vm766_vm15, %v2552_v3, 0.0 }
 0x4cc   : > { %1034 = vadd.xlane.f32.xlu1 %v1033_v50 }
 0x4ce   : > { %v943_v48 = vpop.permute.xlu2 %942  ;;  %v1134_v52 = vld [vmem:[#allocation5 + $0x8] sm:$0xf] }
 0x4cf   : > { %v976_v4 = vsub.f32 %v2433_v39, %v943_v48  ;;  %v1196_v5 = vsel %vm1144_vm1, %v1134_v52, 0  ;;  %v1126_v52 = vpack.c.bf16 %v2552_v3, %v2552_v3 }
 0x4d0   : > { %1205 = vmatpush.bf16.msrb.mxu3 %v1196_v5 }
 0x4d1   : > { %v985_v6 = vmul.f32 1.442695, %v976_v4 }
 0x4d3   : > { %1995 = vpow2.f32 %v985_v6  ;;  %v1164_v6 = vunpack.c.l.b16 %v1126_v52 }
 0x4d7   : > { %v963_v8 = vpop.permute.xlu2 %962 }
 0x4d8   : > { %v980_v9 = vsub.f32 %v2467_v56, %v963_v8 }
 0x4d9   : > { %v1996_v10 = vpop.eup %1995 }
 0x4da   : > { %v993_v14 = vmul.f32 1.442695, %v980_v9  ;;  %v1004_v17 = vsel %vm870_vm3, %v1996_v10, 0.0 }
 0x4db   : > { %v1030_v39 = vsel %vm766_vm15, %v1004_v17, 0.0  ;;  %v1125_v20 = vpack.c.bf16 %v1004_v17, %v1004_v17 }
 0x4dc   : > { %1997 = vpow2.f32 %v993_v14  ;;  %1031 = vadd.xlane.f32.xlu0 %v1030_v39 }
 0x4dd   : > { %v1139_v23 = vunpack.c.l.b16 %v1125_v20 }
 0x4de   : > { %v958_v24 = vpop.permute.xlu0 %957 }
 0x4df   : > { %v979_v25 = vsub.f32 %v2459_v53, %v958_v24  ;;  %v973_v26 = vpop.permute.xlu2 %972  ;;  %v1140_v56 = vpack.c.b16 %v1139_v23, %v1138_v21  ;;  %v1019_v23 = vmul.f32 %v2523_v34, %v1011_v46  ;;  %v1020_v34 = vmul.f32 %v2545_v61, %v1012_v18 }
 0x4e0   : > { %v982_v27 = vsub.f32 %v2465_v55, %v973_v26 }
 0x4e1   : > { %v991_v29 = vmul.f32 1.442695, %v979_v25 }
 0x4e2   : > { %v1998_v30 = vpop.eup %1997  ;;  %v997_v31 = vmul.f32 1.442695, %v982_v27 }
 0x4e3   : > { %1999 = vpow2.f32 %v991_v29  ;;  %v1008_v32 = vsel %vm870_vm3, %v1998_v30, 0.0  ;;  %v1013_v29 = vld [vmem:[#allocation9 + $0x10] sm:$0xff] }
 0x4e4   : > { %v1042_v33 = vsel %vm766_vm15, %v1008_v32, 0.0  ;;  %2001 = vpow2.f32 %v997_v31  ;;  %v1129_v53 = vpack.c.bf16 %v1008_v32, %v1008_v32  ;;  %v1021_v31 = vmul.f32 %v2508_v22, %v1013_v29 }
 0x4e5   : > { %1043 = vadd.xlane.f32.xlu1 %v1042_v33 }
 0x4e6   : > { %v704_v35 = vpop.permute.xlu0 %703  ;;  %v1190_v44 = vunpack.c.l.b16 %v1129_v53 }
 0x4e7   : > { %706 = vst.msk [vmem:[#allocation5] sm:$0xf] %vm699_vm14, %v704_v35 }
 0x4e9   : > { %v2000_v36 = vpop.eup %1999 }
 0x4ea   : > { %v1007_v55 = vsel %vm869_vm2, %v2000_v36, 0.0  ;;  %v2002_v43 = vpop.eup %2001  ;;  %v1016_v36 = vld [vmem:[#allocation9 + $0x28] sm:$0xff] }
 0x4eb   : > { %v1039_v38 = vsel %vm766_vm15, %v1007_v55, 0.0  ;;  %v1128_v42 = vpack.c.bf16 %v1007_v55, %v1007_v55  ;;  %v1010_v58 = vsel %vm870_vm3, %v2002_v43, 0.0 }
 0x4ec   : > { %1040 = vadd.xlane.f32.xlu0 %v1039_v38  ;;  %v1048_v2 = vsel %vm766_vm15, %v1010_v58, 0.0  ;;  %v1131_v10 = vpack.c.bf16 %v1010_v58, %v1010_v58 }
 0x4ed   : > { %v1189_v47 = vunpack.c.l.b16 %v1128_v42  ;;  %v1015_v42 = vld [vmem:[#allocation9 + $0x20] sm:$0xff] }
 0x4ee   : > { %v953_v37 = vpop.permute.xlu1 %952  ;;  %v1132_v49 = vld [vmem:[#allocation5] sm:$0xf]  ;;  %v1215_v17 = vunpack.c.l.b16 %v1131_v10  ;;  %v1089_v30 = vpop.permute.xlu0 %1088  ;;  %v1023_v22 = vmul.f32 %v2514_v28, %v1015_v42  ;;  %v1069_v28 = vld [vmem:[#allocation10 + $0x8] sm:$0xff] }
 0x4ef   : > { %v1191_v51 = vpack.c.b16 %v1190_v44, %v1189_v47  ;;  %v978_v54 = vsub.f32 %v2473_v59, %v953_v37  ;;  %v1146_v57 = vsel %vm1144_vm1, %v1132_v49, 0  ;;  %v1018_v47 = vld [vmem:[#allocation9 + $0x38] sm:$0xff] }
 0x4f0   : > { %1155 = vmatpush.bf16.msrb.mxu1 %v1146_v57  ;;  %v1072_v57 = vld [vmem:[#allocation10 + $0x20] sm:$0xff] }
 0x4f1   : > { %v989_v60 = vmul.f32 1.442695, %v978_v54  ;;  %1780 = vmatmul.msk.bf16.vlgmr.msrb.gmra.mxu3 %vm766_vm15, %v1191_v51  ;;  %v1068_v51 = vld [vmem:[#allocation10] sm:$0xff] }
 0x4f3   : > { %2003 = vpow2.f32 %v989_v60  ;;  %1778 = vmatmul.msk.bf16.vlgmr.msrb.gmra.mxu1 %vm766_vm15, %v1140_v56 }
 0x4f4   : > { %1049 = vadd.xlane.f32.xlu0 %v1048_v2  ;;  %2005 = vpow2.f32 %v931_v63 }
 0x4f6   : > { %v968_v59 = vpop.permute.xlu1 %967  ;;  %v1099_v15 = vpop.permute.xlu0 %1098 }
 0x4f7   : > { %v981_v50 = vsub.f32 %v2437_v41, %v968_v59  ;;  %v1120_v2 = vmul.f32 %v1099_v15, %v1072_v57 }
 0x4f9   : > { %v2004_v48 = vpop.eup %2003  ;;  %v995_v5 = vmul.f32 1.442695, %v981_v50  ;;  %v1017_v50 = vld [vmem:[#allocation9 + $0x30] sm:$0xff] }
 0x4fa   : > { %v1006_v4 = vsel %vm870_vm3, %v2004_v48, 0.0  ;;  %v2589_v0 = vpop.eup %2005 }
 0x4fb   : > { %v1127_v62 = vpack.c.bf16 %v1006_v4, %v1006_v4  ;;  %2007 = vpow2.f32 %v995_v5  ;;  %v1036_v21 = vsel %vm766_vm15, %v1006_v4, 0.0  ;;  %v1025_v4 = vmul.f32 %v2589_v0, %v1017_v50 }
 0x4fc   : > { %2009 = vpow2.f32 %v933_v1 }
 0x4fd   : > { %v1165_v8 = vunpack.c.l.b16 %v1127_v62  ;;  %2011 = vpow2.f32 %v929_v45 }
 0x4fe   : > { %1108 = vperm.xlu1 %1980, %v2589_v0   ;;  %v745_v41 = vpop.permute.xlu1 %744 }
 0x4ff   : > { %v1166_v9 = vpack.c.b16 %v1165_v8, %v1164_v6  ;;  %748 = vst.msk [vmem:[#allocation5 + $0xc] sm:$0xf] %vm699_vm14, %v745_v41  ;;  %v1014_v8 = vld [vmem:[#allocation9 + $0x18] sm:$0xff] }
 0x500   : > { %v1022_v41 = vmul.f32 %v2527_v40, %v1014_v8 }
 0x501   : > { %1779 = vmatmul.msk.bf16.vlgmr.msrb.gmra.mxu2 %vm766_vm15, %v1166_v9  ;;  %v2008_v3 = vpop.eup %2007  ;;  %v1070_v9 = vld [vmem:[#allocation10 + $0x10] sm:$0xff] }
 0x502   : > { %v1009_v7 = vsel %vm869_vm2, %v2008_v3, 0.0  ;;  %v2010_v13 = vpop.eup %2009  ;;  %v1118_v10 = vmul.f32 %v1089_v30, %v1070_v9 }
 0x503   : > { %v1045_v12 = vsel %vm766_vm15, %v1009_v7, 0.0  ;;  %v1130_v16 = vpack.c.bf16 %v1009_v7, %v1009_v7  ;;  %v2012_v26 = vpop.eup %2011  ;;  %v1026_v37 = vmul.f32 %v2010_v13, %v1018_v47 }
 0x504   : > { %1046 = vadd.xlane.f32.xlu2 %v1045_v12  ;;  %v1024_v53 = vmul.f32 %v2012_v26, %v1016_v36 }
 0x505   : > { %v1214_v19 = vunpack.c.l.b16 %v1130_v16  ;;  %v1074_v16 = vld [vmem:[#allocation10 + $0x30] sm:$0xff] }
 0x506   : > { %v1135_v14 = vld [vmem:[#allocation5 + $0xc] sm:$0xf]  ;;  %v1079_v56 = vpop.permute.xlu1 %1078 }
 0x507   : > { %v1221_v39 = vsel %vm1144_vm1, %v1135_v14, 0  ;;  %v1216_v20 = vpack.c.b16 %v1215_v17, %v1214_v19  ;;  %v1116_v54 = vmul.f32 %v1079_v56, %v1068_v51  ;;  %v1071_v14 = vld [vmem:[#allocation10 + $0x18] sm:$0xff] }
 0x508   : > { %1113 = vperm.xlu0 %1979, %v2010_v13   ;;  %1230 = vmatpush.bf16.msra.mxu0 %v1221_v39  ;;  %v1073_v13 = vld [vmem:[#allocation10 + $0x28] sm:$0xff] }
 0x50b   : > { %1781 = vmatmul.msk.bf16.vlgmr.msra.gmra.mxu0 %vm766_vm15, %v1216_v20 }
 0x50c   : > { %1037 = vadd.xlane.f32.xlu2 %v1036_v21 }
 0x50e   : > { %v2609_v27 = vpop.permute.xlu1 %1093 }
 0x50f   : > { %v1119_v46 = vmul.f32 %v2609_v27, %v1071_v14 }
 0x521   : > { %v1029_v24 = vpop.xlane.xlu2 %1028 }
 0x522   : > { %v1051_v25 = vadd.f32 %v1029_v24, %v1019_v23 }
 0x524   : > { %1060 = vst.msk [vmem:[#allocation9] sm:$0xff] %vm1059_vm0, %v1051_v25  ;;  %1103 = vperm.xlu2 %1978, %v2012_v26   ;;  %v1075_v25 = vld [vmem:[#allocation10 + $0x38] sm:$0xff] }
 0x529   : > { %v1084_v58 = vpop.permute.xlu2 %1083 }
 0x52a   : > { %v1117_v52 = vmul.f32 %v1084_v58, %v1069_v28 }
 0x53f   : > { %v1035_v32 = vpop.xlane.xlu1 %1034 }
 0x540   : > { %v1053_v11 = vadd.f32 %v1035_v32, %v1021_v31 }
 0x542   : > { %1062 = vst.msk [vmem:[#allocation9 + $0x10] sm:$0xff] %vm1059_vm0, %v1053_v11 }
 0x54f   : > { %v1032_v33 = vpop.xlane.xlu0 %1031 }
 0x550   : > { %v1052_v35 = vadd.f32 %v1032_v33, %v1020_v34 }
 0x552   : > { %1061 = vst.msk [vmem:[#allocation9 + $0x8] sm:$0xff] %vm1059_vm0, %v1052_v35 }
 0x558   : > { %v1044_v55 = vpop.xlane.xlu1 %1043 }
 0x559   : > { %v1056_v38 = vadd.f32 %v1044_v55, %v1024_v53 }
 0x55b   : > { %1065 = vst.msk [vmem:[#allocation9 + $0x28] sm:$0xff] %vm1059_vm0, %v1056_v38 }
 0x55f   : > { %v1041_v43 = vpop.xlane.xlu0 %1040 }
 0x560   : > { %v1055_v44 = vadd.f32 %v1041_v43, %v1023_v22 }
 0x562   : > { %1064 = vst.msk [vmem:[#allocation9 + $0x20] sm:$0xff] %vm1059_vm0, %v1055_v44 }
 0x567   : > { %v1050_v61 = vpop.xlane.xlu0 %1049 }
 0x568   : > { %v1058_v49 = vadd.f32 %v1050_v61, %v1026_v37 }
 0x56a   : > { %1067 = vst.msk [vmem:[#allocation9 + $0x38] sm:$0xff] %vm1059_vm0, %v1058_v49 }
 0x570   : > { %v1157_v60 = vpop.f32.mrf.mxu1  ;;  %v1109_v0 = vpop.permute.xlu1 %1108 }
 0x571   : > { %v1237_v63 = vadd.f32 %v1157_v60, %v1116_v54  ;;  %v1122_v17 = vmul.f32 %v1109_v0, %v1074_v16 }
 0x573   : > { %1245 = vst.msk [vmem:[#allocation10] sm:$0xff] %vm766_vm15, %v1237_v63 }
 0x574   : > { %v1207_v59 = vpop.f32.mrf.mxu3 }
 0x575   : > { %v1241_v48 = vadd.f32 %v1207_v59, %v1120_v2 }
 0x577   : > { %1249 = vst.msk [vmem:[#allocation10 + $0x20] sm:$0xff] %vm766_vm15, %v1241_v48  ;;  %v1047_v5 = vpop.xlane.xlu2 %1046 }
 0x578   : > { %v1159_v62 = vpop.f32.mrf.mxu1  ;;  %v1057_v1 = vadd.f32 %v1047_v5, %v1025_v4 }
 0x579   : > { %v1238_v6 = vadd.f32 %v1159_v62, %v1117_v52 }
 0x57a   : > { %1066 = vst.msk [vmem:[#allocation9 + $0x30] sm:$0xff] %vm1059_vm0, %v1057_v1  ;;  %v1114_v26 = vpop.permute.xlu0 %1113 }
 0x57b   : > { %1246 = vst.msk [vmem:[#allocation10 + $0x8] sm:$0xff] %vm766_vm15, %v1238_v6  ;;  %v1123_v29 = vmul.f32 %v1114_v26, %v1075_v25 }
 0x57c   : > { %v1209_v45 = vpop.f32.mrf.mxu3 }
 0x57f   : > { %v1038_v3 = vpop.xlane.xlu2 %1037 }
 0x580   : > { %v1054_v7 = vadd.f32 %v1038_v3, %v1022_v41 }
 0x582   : > { %1063 = vst.msk [vmem:[#allocation9 + $0x18] sm:$0xff] %vm1059_vm0, %v1054_v7 }
 0x584   : > { %v1182_v12 = vpop.f32.mrf.mxu2 }
 0x585   : > { %v1239_v19 = vadd.f32 %v1182_v12, %v1118_v10 }
 0x587   : > { %1247 = vst.msk [vmem:[#allocation10 + $0x10] sm:$0xff] %vm766_vm15, %v1239_v19  ;;  %v1104_v39 = vpop.permute.xlu2 %1103 }
 0x588   : > { %v1121_v20 = vmul.f32 %v1104_v39, %v1073_v13  ;;  %v1232_v21 = vpop.f32.mrf.mxu0 }
 0x589   : > { %v1243_v40 = vadd.f32 %v1232_v21, %v1122_v17 }
 0x58a   : > { %v1242_v23 = vadd.f32 %v1209_v45, %v1121_v20 }
 0x58b   : > { %1251 = vst.msk [vmem:[#allocation10 + $0x30] sm:$0xff] %vm766_vm15, %v1243_v40 }
 0x58c   : > { %v1184_v24 = vpop.f32.mrf.mxu2  ;;  %1250 = vst.msk [vmem:[#allocation10 + $0x28] sm:$0xff] %vm766_vm15, %v1242_v23 }
 0x58d   : > { %v1240_v56 = vadd.f32 %v1184_v24, %v1119_v46 }
 0x58f   : > { %1248 = vst.msk [vmem:[#allocation10 + $0x18] sm:$0xff] %vm766_vm15, %v1240_v56  ;;  %1264 = sbr.rel (%p1782_p4) target bundleno = 2388 (0x954), region = 84 }
 0x590   : > { %v1234_v30 = vpop.f32.mrf.mxu0 }
 0x591   : > { %v1244_v31 = vadd.f32 %v1234_v30, %v1123_v29 }
 0x593   : > { %1252 = vst.msk [vmem:[#allocation10 + $0x38] sm:$0xff] %vm766_vm15, %v1244_v31 }
 0x594   : > { %v1326_v27 = vld [vmem:[#allocation9 + $0x20] sm:$0xff]  ;;  %v1293_v32 = vld [vmem:[#allocation9 + $0x10] sm:$0xff]  ;;  %v2190_v11 = vmov 0   ;;  %v1327_v15 = vld [vmem:[#allocation9 + $0x28] sm:$0xff]  ;;  %vm1319_vm4 = vcmask 126016   ;;  %vm1352_vm5 = vcmask 191616  }
 0x595   : > { %2014 = vset.pattern.permute.xlu1 %v2190_v11  ;;  %2013 = vset.pattern.permute.xlu0 %v2190_v11  ;;  %2021 = vrcp.f32 %v1326_v27  ;;  %v1359_v18 = vld [vmem:[#allocation9 + $0x30] sm:$0xff]  ;;  %v1294_v34 = vld [vmem:[#allocation9 + $0x18] sm:$0xff]  ;;  %v1270_v55 = vld [vmem:[#allocation9 + $0x8] sm:$0xff]  ;;  %vm1385_vm6 = vcmask 257216  }
 0x596   : > { %2023 = vrcp.f32 %v1293_v32  ;;  %2015 = vset.pattern.permute.xlu2 %v2190_v11  ;;  %v1360_v36 = vld [vmem:[#allocation9 + $0x38] sm:$0xff]  ;;  %v1269_v42 = vld [vmem:[#allocation9] sm:$0xff]  ;;  %v1290_v49 = vld [vmem:[#allocation10 + $0x10] sm:$0xff] }
 0x597   : > { %2025 = vrcp.f32 %v1327_v15  ;;  %v1323_v61 = vld [vmem:[#allocation10 + $0x20] sm:$0xff]  ;;  %v1324_v50 = vld [vmem:[#allocation10 + $0x28] sm:$0xff]  ;;  %v1291_v48 = vld [vmem:[#allocation10 + $0x18] sm:$0xff] }
 0x598   : > { %2027 = vrcp.f32 %v1359_v18  ;;  %v1356_v41 = vld [vmem:[#allocation10 + $0x30] sm:$0xff]  ;;  %v1268_v9 = vld [vmem:[#allocation10 + $0x8] sm:$0xff]  ;;  %v1267_v3 = vld [vmem:[#allocation10] sm:$0xff] }
 0x599   : > { %2029 = vrcp.f32 %v1294_v34  ;;  %v1853_v39 = vld [vmem:[%s2750_s3 + $0x8] sm:$0xff]  ;;  %v1852_v20 = vld [vmem:[%s2750_s3] sm:$0xff]  ;;  %v2194_v34 = vmov 32.0  }
 0x59a   : > { %2031 = vrcp.f32 %v1360_v36  ;;  %v1357_v60 = vld [vmem:[#allocation10 + $0x38] sm:$0xff]  ;;  %1424 = vmatpush.bf16.msra.mxu0 %v1853_v39  ;;  %v2016_v25 = vld [vmem:[%s2751_s4] ss:$0 sm:$0xff] }
 0x59b   : > { %v2022_v33 = vpop.eup %2021  ;;  %2033 = vrcp.f32 %v1270_v55  ;;  %v1265_v26 = vld [vmem:[%s2355_s9] sm:$0xff]  ;;  %v1266_v27 = vld [vmem:[%s2355_s9 + $0x8] sm:$0xff] }
 0x59c   : > { %v2024_v35 = vpop.eup %2023  ;;  %1332 = vperm.xlu1 %2014, %v2022_v33   ;;  %2035 = vrcp.f32 %v1269_v42 }
 0x59d   : > { %1299 = vperm.xlu0 %2013, %v2024_v35   ;;  %v2026_v53 = vpop.eup %2025  ;;  %2037 = vrcp.f32 %v2194_v34 }
 0x59e   : > { %v2028_v38 = vpop.eup %2027  ;;  %1425 = vmatpush.bf16.msra.mxu0 %v1852_v20 }
 0x59f   : > { %v2030_v22 = vpop.eup %2029  ;;  %1365 = vperm.xlu2 %2015, %v2028_v38  }
 0x5a0   : > { %v2032_v43 = vpop.eup %2031 }
 0x5a1   : > { %v2034_v44 = vpop.eup %2033 }
 0x5a2   : > { %v2036_v47 = vpop.eup %2035 }
 0x5a3   : > { %v2038_v33 = vpop.eup %2037 }
 0x5a4   : > { %1337 = vperm.xlu1 %2014, %v2026_v53   ;;  %v1443_v35 = vmul.f32 32.0, %v2038_v33  ;;  %vm1447_vm7 = vweird.f32 %v2038_v33 }
 0x5a5   : > { %1304 = vperm.xlu0 %2013, %v2030_v22  }
 0x5a6   : > { %v1444_v36 = vsub.f32 1.0, %v1443_v35  ;;  %v2020_v35 = vld [vmem:[%s2759_s12] ss:$0 sm:$0xff] }
 0x5a7   : > { %1370 = vperm.xlu2 %2015, %v2032_v43  }
 0x5a8   : > { %v1445_v53 = vmul.f32 %v2038_v33, %v1444_v36 }
 0x5aa   : > { %v1446_v55 = vadd.f32 %v2038_v33, %v1445_v53 }
 0x5ac   : > { %1280 = vperm.xlu1 %2014, %v2034_v44   ;;  %v1448_v38 = vsel %vm1447_vm7, %v2038_v33, %v1446_v55 }
 0x5ad   : > { %1275 = vperm.xlu0 %2013, %v2036_v47  }
 0x5f9   : > { %v1366_v37 = vpop.permute.xlu2 %1365 }
 0x5fa   : > { %v1373_v7 = vmul.f32 %v1366_v37, %v1356_v41 }
 0x5fc   : > { %v1375_v13 = vpack.c.bf16 %v1373_v7, %v1373_v7 }
 0x601   : > { %v1371_v63 = vpop.permute.xlu2 %1370 }
 0x602   : > { %v1374_v59 = vmul.f32 %v1371_v63, %v1357_v60 }
 0x604   : > { %v1376_v4 = vpack.c.bf16 %v1374_v59, %v1374_v59 }
 0x60e   : > { %v1333_v51 = vpop.permute.xlu1 %1332 }
 0x60f   : > { %v1340_v54 = vmul.f32 %v1333_v51, %v1323_v61  ;;  %v1300_v57 = vpop.permute.xlu0 %1299 }
 0x610   : > { %v1307_v58 = vmul.f32 %v1300_v57, %v1290_v49  ;;  %v1855_v57 = vld [vmem:[#allocation11 + $0x8] sm:$0xff] }
 0x611   : > { %v1342_v2 = vpack.c.bf16 %v1340_v54, %v1340_v54  ;;  %1527 = vmatpush.bf16.msra.mxu1 %v1855_v57 }
 0x612   : > { %v1309_v28 = vpack.c.bf16 %v1307_v58, %v1307_v58  ;;  %v1854_v58 = vld [vmem:[#allocation11] sm:$0xff] }
 0x613   : > { %1346 = vrot.lane.b32.xlu1 %v1342_v2, %s2191_s28 }
 0x614   : > { %1313 = vrot.lane.b32.xlu2 %v1309_v28, %s2192_s18  ;;  %v1863_v28 = vld [vmem:[%s2758_s11 + $0x38] sm:$0xff] }
 0x615   : > { %1528 = vmatpush.bf16.msra.mxu1 %v1854_v58  ;;  %1606 = vmatpush.bf16.msra.mxu2 %v1863_v28 }
 0x616   : > { %v1338_v52 = vpop.permute.xlu1 %1337 }
 0x617   : > { %v1341_v5 = vmul.f32 %v1338_v52, %v1324_v50  ;;  %v1305_v62 = vpop.permute.xlu0 %1304 }
 0x618   : > { %v1308_v1 = vmul.f32 %v1305_v62, %v1291_v48  ;;  %v1862_v48 = vld [vmem:[%s2758_s11 + $0x30] sm:$0xff]  ;;  %v1861_v62 = vld [vmem:[%s2758_s11 + $0x28] sm:$0xff] }
 0x619   : > { %v1343_v6 = vpack.c.bf16 %v1341_v5, %v1341_v5  ;;  %1607 = vmatpush.bf16.msra.mxu2 %v1862_v48 }
 0x61a   : > { %v1310_v8 = vpack.c.bf16 %v1308_v1, %v1308_v1 }
 0x61b   : > { %1381 = vrot.lane.b32.xlu1 %v1376_v4, %s2193_s30 }
 0x61c   : > { %1348 = vrot.lane.b32.xlu2 %v1343_v6, %s2191_s28  ;;  %1315 = vrot.lane.b32.xlu0 %v1310_v8, %s2192_s18  ;;  %v1860_v8 = vld [vmem:[%s2758_s11 + $0x20] sm:$0xff] }
 0x61d   : > { %1608 = vmatpush.bf16.msra.mxu2 %v1861_v62 }
 0x61e   : > { %v1281_v10 = vpop.permute.xlu1 %1280 }
 0x61f   : > { %v1284_v12 = vmul.f32 %v1281_v10, %v1268_v9  ;;  %v1276_v16 = vpop.permute.xlu0 %1275 }
 0x620   : > { %v1283_v0 = vmul.f32 %v1276_v16, %v1267_v3 }
 0x621   : > { %v1286_v19 = vpack.c.bf16 %v1284_v12, %v1284_v12  ;;  %1609 = vmatpush.bf16.msra.mxu2 %v1860_v8 }
 0x622   : > { %v1285_v14 = vpack.c.bf16 %v1283_v0, %v1283_v0 }
 0x623   : > { %1288 = vst.msk [vmem:[#allocation7 + $0x4] sm:$0xf] %vm699_vm14, %v1286_v19 }
 0x624   : > { %1287 = vst.msk [vmem:[#allocation7] sm:$0xf] %vm699_vm14, %v1285_v14  ;;  %1379 = vrot.lane.b32.xlu0 %v1375_v13, %s2193_s30  ;;  %v2017_v13 = vld [vmem:[%s2754_s7] ss:$0 sm:$0xff] }
 0x66e   : > { %v1314_v17 = vpop.permute.xlu2 %1313 }
 0x66f   : > { %1320 = vst.msk [vmem:[#allocation7] sm:$0xf] %vm1319_vm4, %v1314_v17 }
 0x676   : > { %v1349_v40 = vpop.permute.xlu2 %1348 }
 0x685   : > { %v1347_v21 = vpop.permute.xlu1 %1346 }
 0x686   : > { %1353 = vst.msk [vmem:[#allocation7] sm:$0xf] %vm1352_vm5, %v1347_v21  ;;  %v2018_v21 = vld [vmem:[%s2755_s8] ss:$0 sm:$0xff] }
 0x68d   : > { %v1382_v46 = vpop.permute.xlu1 %1381 }
 0x68e   : > { %v1316_v45 = vpop.permute.xlu0 %1315 }
 0x68f   : > { %1321 = vst.msk [vmem:[#allocation7 + $0x4] sm:$0xf] %vm1319_vm4, %v1316_v45 }
 0x690   : > { %1354 = vst.msk [vmem:[#allocation7 + $0x4] sm:$0xf] %vm1352_vm5, %v1349_v40 }
 0x691   : > { %1387 = vst.msk [vmem:[#allocation7 + $0x4] sm:$0xf] %vm1385_vm6, %v1382_v46 }
 0x696   : > { %v1380_v23 = vpop.permute.xlu0 %1379 }
 0x697   : > { %1386 = vst.msk [vmem:[#allocation7] sm:$0xf] %vm1385_vm6, %v1380_v23 }
 0x69e   : > { %v1851_v24 = vld [vmem:[#allocation7] sm:$0xff] }
 0x69f   : > { %1795 = vmatmul.msk.bf16.vlgmr.msra.gmra.mxu0 %vm678_vm12, %v1851_v24  ;;  %v1859_v24 = vld [vmem:[%s2758_s11 + $0x18] sm:$0xff] }
 0x6a0   : > { %1610 = vmatpush.bf16.msra.mxu2 %v1859_v24 }
 0x71c   : > { %v1427_v56 = vpop.f32.mrf.mxu0 }
 0x71d   : > { %v1428_v29 = vadd.f32 %v2016_v25, %v1427_v56  ;;  %v1856_v56 = vld [vmem:[%s2758_s11] sm:$0xff] }
 0x71f   : > { %v2646_v30 = vadd.f32 %v1428_v29, %v1265_v26  ;;  %v1857_v26 = vld [vmem:[%s2758_s11 + $0x8] sm:$0xff] }
 0x721   : > { %v1436_v31 = vsel %vm678_vm12, %v2646_v30, 0.0 }
 0x722   : > { %1437 = vadd.xlane.f32.xlu2 %v1436_v31  ;;  %v2019_v31 = vld [vmem:[%s2757_s10] ss:$0 sm:$0xff] }
 0x724   : > { %v1429_v32 = vpop.f32.mrf.mxu0 }
 0x725   : > { %v1430_v11 = vadd.f32 %v2016_v25, %v1429_v32  ;;  %v1858_v25 = vld [vmem:[%s2758_s11 + $0x10] sm:$0xff] }
 0x726   : > { %1611 = vmatpush.bf16.msra.mxu2 %v1858_v25 }
 0x727   : > { %v2651_v15 = vadd.f32 %v1430_v11, %v1266_v27 }
 0x729   : > { %v1439_v18 = vsel %vm678_vm12, %v2651_v15, 0.0 }
 0x72a   : > { %1440 = vadd.xlane.f32.xlu0 %v1439_v18  ;;  %1612 = vmatpush.bf16.msra.mxu2 %v1857_v26 }
 0x72e   : > { %1613 = vmatpush.bf16.msra.mxu2 %v1856_v56 }
 0x795   : > { %v1438_v42 = vpop.xlane.xlu2 %1437 }
 0x796   : > { %v1449_v22 = vmul.f32 %v1448_v38, %v1438_v42 }
 0x798   : > { %v1451_v43 = vsub.f32 %v2646_v30, %v1449_v22 }
 0x79a   : > { %v1453_v44 = vmul.f32 %v1451_v43, %v1451_v43 }
 0x79c   : > { %v1455_v47 = vsel %vm678_vm12, %v1453_v44, 0.0 }
 0x79d   : > { %v1441_v37 = vpop.xlane.xlu0 %1440  ;;  %1456 = vadd.xlane.f32.xlu1 %v1455_v47 }
 0x79e   : > { %v1450_v61 = vmul.f32 %v1448_v38, %v1441_v37 }
 0x7a0   : > { %v1452_v49 = vsub.f32 %v2651_v15, %v1450_v61 }
 0x7a2   : > { %v1454_v51 = vmul.f32 %v1452_v49, %v1452_v49 }
 0x7a4   : > { %v1458_v54 = vsel %vm678_vm12, %v1454_v51, 0.0 }
 0x7a5   : > { %1459 = vadd.xlane.f32.xlu2 %v1458_v54 }
 0x810   : > { %v1457_v60 = vpop.xlane.xlu1 %1456 }
 0x811   : > { %v1461_v63 = vmul.f32 %v1457_v60, %v1448_v38 }
 0x813   : > { %v1463_v2 = vadd.f32 1e-05, %v1461_v63 }
 0x815   : > { %2039 = vrsqrt.f32 %v1463_v2  ;;  %vm1471_vm9 = vweird.f32 %v1463_v2 }
 0x818   : > { %v1460_v59 = vpop.xlane.xlu2 %1459 }
 0x819   : > { %v1462_v50 = vmul.f32 %v1460_v59, %v1448_v38 }
 0x81b   : > { %v2040_v52 = vpop.eup %2039  ;;  %v1464_v4 = vadd.f32 1e-05, %v1462_v50 }
 0x81c   : > { %v1466_v5 = vmul.f32 %v2040_v52, %v1463_v2  ;;  %vm1472_vm8 = vweird.f32 %v2040_v52 }
 0x81d   : > { %2041 = vrsqrt.f32 %v1464_v4  ;;  %vm1473_vm10 = vmor %vm1471_vm9, %vm1472_vm8  ;;  %vm1481_vm13 = vweird.f32 %v1464_v4 }
 0x81e   : > { %v1467_v1 = vmul.f32 %v2040_v52, %v1466_v5 }
 0x820   : > { %v1468_v6 = vmul.f32 0.5, %v1467_v1 }
 0x822   : > { %v1469_v41 = vsub.f32 1.5, %v1468_v6 }
 0x823   : > { %v2042_v9 = vpop.eup %2041 }
 0x824   : > { %v1470_v3 = vmul.f32 %v2040_v52, %v1469_v41  ;;  %v1476_v7 = vmul.f32 %v2042_v9, %v1464_v4  ;;  %vm1482_vm11 = vweird.f32 %v2042_v9 }
 0x825   : > { %vm1483_vm14 = vmor %vm1481_vm13, %vm1482_vm11 }
 0x826   : > { %v1477_v10 = vmul.f32 %v2042_v9, %v1476_v7  ;;  %v1474_v16 = vsel %vm1473_vm10, %v2040_v52, %v1470_v3 }
 0x827   : > { %v1485_v19 = vmul.f32 %v1474_v16, %v1451_v43 }
 0x828   : > { %v1478_v12 = vmul.f32 0.5, %v1477_v10 }
 0x829   : > { %v1490_v20 = vmul.f32 %v2017_v13, %v1485_v19 }
 0x82a   : > { %v1479_v0 = vsub.f32 1.5, %v1478_v12 }
 0x82b   : > { %v1495_v40 = vadd.f32 %v2018_v21, %v1490_v20 }
 0x82c   : > { %v1480_v14 = vmul.f32 %v2042_v9, %v1479_v0 }
 0x82e   : > { %v1484_v17 = vsel %vm1483_vm14, %v2042_v9, %v1480_v14 }
 0x82f   : > { %v1486_v39 = vmul.f32 %v1484_v17, %v1452_v49 }
 0x831   : > { %v1491_v45 = vmul.f32 %v2017_v13, %v1486_v39 }
 0x833   : > { %v1496_v46 = vadd.f32 %v2018_v21, %v1491_v45 }
 0x835   : > { %v1497_v23 = vpack.c.bf16 %v1496_v46, %v1495_v40 }
 0x837   : > { %1804 = vmatmul.msk.bf16.vlgmr.msra.gmra.mxu1 %vm678_vm12, %v1497_v23 }
 0x8b4   : > { %v1530_v29 = vpop.f32.mrf.mxu1 }
 0x8b5   : > { %v1531_v27 = vadd.f32 %v2019_v31, %v1530_v29 }
 0x8b7   : > { %v1535_v18 = vmax.f32 %v1531_v27, 0.0 }
 0x8bc   : > { %v1532_v32 = vpop.f32.mrf.mxu1 }
 0x8bd   : > { %v1533_v11 = vadd.f32 %v2019_v31, %v1532_v32 }
 0x8bf   : > { %v1536_v34 = vmax.f32 %v1533_v11, 0.0 }
 0x8c1   : > { %v1537_v33 = vpack.c.bf16 %v1536_v34, %v1535_v18 }
 0x8c3   : > { %1614 = vmatmul.bf16.vlgmr.msra.gmra.mxu2 %v1537_v33 }
 0x946   : > { %v1615_v36 = vpop.f32.mrf.mxu2 }
 0x947   : > { %v1616_v53 = vadd.f32 %v2020_v35, %v1615_v36 }
 0x949   : > { %v1620_v55 = vadd.f32 %v1616_v53, %v2646_v30 }
 0x94b   : > { %1622 = vst.msk [vmem:[%s2357_s13] sm:$0xff] %vm678_vm12, %v1620_v55 }
 0x94e   : > { %v1617_v38 = vpop.f32.mrf.mxu2 }
 0x94f   : > { %v1618_v42 = vadd.f32 %v2020_v35, %v1617_v38 }
 0x951   : > { %v1621_v22 = vadd.f32 %v1618_v42, %v2651_v15 }
 0x953   : > { %1623 = vst.msk [vmem:[%s2357_s13 + $0x8] sm:$0xff] %vm678_vm12, %v1621_v22 }
 0x954 PF: > { %s1864_s18 = sshll.u32 %s2159_s29, 4  ;;  %s2788_s22 = sld [smem:[#allocation27_spill]] }
 0x955   : > { %s1637_s20 = sshll.u32 %s2357_s13, 4  ;;  %s1625_s24 = scalar_lea.sflag [#allocation13], %s460_s16  ;;  %s1638_s20 = int_to_ptr.vmem [resolvable:$true] %s1637_s20 }
 0x95a   : > { %s1636_s23 = scalar_lea.hbm %s2788_s22, %s1864_s18  ;;  %s2093_s29 = scalar_lea.hbm %s2788_s22, 32 }
 0x95b   : > { %s1639_s15 = sshll.u32 %s1636_s23, 4  ;;  %s1640_s15 = int_to_ptr.hbm [resolvable:$true] %s1639_s15 }
 0x95c   : > { %s2087_s9 = sshra.s32 %s1640_s15, 4  ;;  %s2088_s9 = int_to_ptr.hbm [resolvable:$true] %s2087_s9 }
 0x95d   : > { %s2089_s17 = scalar_lea.hbm %s2088_s9, 16  ;;  %p2094_p8 = scmp.lt.s32.totalorder %s2088_s9, %s2788_s22 }
 0x95e   : > { %p2090_p5 = scmp.ne.s32.totalorder %s2088_s9, %s2089_s17  ;;  %p2095_p10 = scmp.lt.s32.totalorder %s2093_s29, %s2089_s17 }
 0x960   : > { %p2091_p6 = pnand %p2090_p5, %p2317_p3  ;;  %p2096_p11 = por %p2095_p10, %p2094_p8 }
 0x962   : > { %p2092_p7 = pneg %p2091_p6 }
 0x964   : > { %p2097_p12 = pnand %p2096_p11, %p2092_p7 }
 0x966   : > { %2100 = shalt.err (!%p2097_p12)
}
 0x967   : > { %s2195_s16 = smov 128   ;;  %s2196_s13 = smov 8  }
 0x968   : > { %1869 = dma.vmem_to_hbm [thread:$0]  (%p2317_p3), %s1638_s20, 256, %s1640_s15, %s1625_s24, %s2195_s16, %s2195_s16, %s2196_s13  }
 0x969 PF: > { %s2789_s18 = sld [smem:[#allocation19_spill]] }
 0x96a   : > { %s2790_s21 = sld [smem:[#allocation17_spill]] }
 0x96f   : > { %p1881_p13 = scmp.ge.s32.totalorder %s2789_s18, 2 }
 0x970   : > { %s1654_s0 = sand.u32 1, %s2790_s21  }
 0x971   : > { %p1876_p0 = pnand %p1881_p13, %p2327_p9  ;;  %s1655_s1 = scalar_lea.sflag [#allocation13], %s1654_s0 }
 0x973   : > { %p1877_p1 = pneg %p1876_p0 }
 0x975   : > { %2138 = dma.done.wait (%p1877_p1), %s1655_s1, 256  }
 0x976   : > { %2140 = vsyncadd (%p1877_p1), %s1655_s1, 4294967040  ;;  %s27_s15 = sadd.s32 1, %s2789_s18   ;;  %s2792_s2 = smov %s2343_s25 }
 0x977   : > { %p24_p2 = scmp.ge.s32.totalorder %s27_s15, 6   ;;  %s2793_s28 = sld [smem:[#allocation18_spill]] }
 0x978   : > { %s2794_s30 = sld [smem:[#allocation20_spill]]  ;;  %s2795_s25 = smov %s2147_s26 }
 0x979   : > { %s2796_s26 = smov %s2151_s27  ;;  %s2797_s27 = smov %s2792_s2 }
 0x97a   : > { %s2798_s29 = smov %s2167_s14  ;;  %s2799_s14 = smov %s2805_s19 }
 0x97b   :  { %26 = sbr.rel (!%p24_p2) target bundleno = 12 (0xc), region = 136 }
 0x980   :  { %1661 = vsyncpa [#allocation12], 1 }
 0x981   :  { %1663 = vsyncpa [#allocation12 + $0x1], 1 }
 0x982   :  { %1664 = vsyncpa [#allocation13], 1 }
 0x983   :  { %1666 = vsyncpa [#allocation13 + $0x1], 1 }

</bundles_post_ra>
